<compile_context>
chip_gen: v7x
topology: tpu7x:2x2x1
jax: 0.10.0
libtpu: 0.0.40
codegen_flags: <defaults>
</compile_context>

<pallas_src>
import jax
import jax.numpy as jnp
from jax.experimental import pallas as pl
from jax.experimental.pallas import tpu as pltpu

EPS = 1e-5  # BatchNorm2d default eps


def _make_decoder_kernel(B, T, hidden):
    """Kernel for static (B, T, hidden). Grid axis = C (feature channel chunks)."""
    inv_n = 1.0 / float(B * hidden)  # BN normalizes over N*H*W = B * hidden * 1 elements

    def kernel(x_ref, w2_ref, bias_ref, gb_ref, w1_ref, o_ref, acc_ref):
        # x_ref   : (B, T, HW)   f32   -- channel chunk c of the input (C dim squeezed)
        # w2_ref  : (HW, hidden) bf16  -- rows c*HW:(c+1)*HW of dense2 weight
        # bias_ref: (1, 1, hidden + ncell_pad) f32  -- [b2 | b1]
        # gb_ref  : (2, T, 1)    f32   -- [gamma; beta]
        # w1_ref  : (hidden, ncell_pad) bf16
        # o_ref   : (B, T, ncell_pad)  f32
        # acc_ref : (B, T, hidden)     f32 scratch (dense2 accumulator)
        c = pl.program_id(0)

        @pl.when(c == 0)
        def _():
            # Fold dense2's bias into the accumulator init.
            b2 = bias_ref[:, :, :hidden]                         # (1, 1, hidden)
            acc_ref[...] = jnp.broadcast_to(b2, acc_ref.shape)

        # dense2 partial product for this channel chunk: acc[b] += x[b] @ W2_c
        w2 = w2_ref[...]                                         # (HW, hidden) bf16
        for b in range(B):                                       # B is tiny; static unroll
            xb = x_ref[b].astype(jnp.bfloat16)                   # (T, HW) bf16 (VPU cast)
            acc_ref[b] += jnp.dot(xb, w2, preferred_element_type=jnp.float32)

        @pl.when(c == pl.num_programs(0) - 1)
        def _():
            h = acc_ref[...]                                     # (B, T, hidden) f32

            # --- BatchNorm2d(T), train-mode batch stats (biased variance) ---
            # Per channel t, stats over the (B, hidden) plane.
            ch_sum = jnp.sum(jnp.sum(h, axis=-1, keepdims=True), axis=0, keepdims=True)
            mean = ch_sum * inv_n                                # (1, T, 1)
            centered = h - mean
            ch_sq = jnp.sum(jnp.sum(centered * centered, axis=-1, keepdims=True),
                            axis=0, keepdims=True)
            var = ch_sq * inv_n                                  # biased (PyTorch train BN)
            inv_std = jax.lax.rsqrt(var + EPS)                   # EUP

            gamma = gb_ref[0:1]                                  # (1, T, 1)
            beta = gb_ref[1:2]                                   # (1, T, 1)
            scale = inv_std * gamma
            shift = beta - mean * scale                          # fold subtract into affine

            # BN affine + ReLU in f32, then bf16 for the MXU.
            y = jnp.maximum(h * scale + shift, 0.0).astype(jnp.bfloat16)  # (B, T, hidden)

            # dense1
            w1 = w1_ref[...]                                     # (hidden, ncell_pad) bf16
            b1 = bias_ref[0, :, hidden:]                         # (1, ncell_pad) f32
            for b in range(B):
                o_ref[b] = jnp.dot(y[b], w1, preferred_element_type=jnp.float32) + b1

    return kernel


def inverse_spike_decoder(x, params):
    """x: (B, C, T, H, W) float32 with C*H*W == 3072, T == 45. Returns (B, T, ncell)."""
    W2, b2, gamma, beta, W1, b1 = params
    B, C, T, H, W = x.shape
    HW = H * W
    F_in = C * HW
    hidden = W2.shape[1]
    ncell = W1.shape[1]
    assert F_in == W2.shape[0] and T == gamma.shape[0]

    # Free, contiguous reshapes -- no transpose, no extra HBM traffic.
    x4 = x.reshape(B, C, T, HW)                                  # (B, C, T, HW)
    w2 = W2.reshape(C, HW, hidden).astype(jnp.bfloat16)          # rows are C-major already
    # (In a real model W2/W1 would be stored in bf16; the cast here is one-time prep.)

    # Keep the output lane dimension a multiple of 128 (lane-dense vst / clean MXU N-tiles).
    ncell_pad = max(128, ((ncell + 127) // 128) * 128)
    W1p = W1 if ncell_pad == ncell else jnp.pad(W1, ((0, 0), (0, ncell_pad - ncell)))
    b1p = b1 if ncell_pad == ncell else jnp.pad(b1, ((0, ncell_pad - ncell),))
    w1 = W1p.astype(jnp.bfloat16)

    # Pack the tiny parameters to cut DMA descriptor count.
    biases = jnp.concatenate([b2, b1p]).reshape(1, 1, hidden + ncell_pad).astype(jnp.float32)
    gb = jnp.stack([gamma, beta]).reshape(2, T, 1).astype(jnp.float32)

    kernel = _make_decoder_kernel(B, T, hidden)

    out = pl.pallas_call(
        kernel,
        out_shape=jax.ShapeDtypeStruct((B, T, ncell_pad), jnp.float32),
        grid_spec=pltpu.PrefetchScalarGridSpec(
            num_scalar_prefetch=0,
            grid=(C,),
            in_specs=[
                # x channel chunk: C dim squeezed out of the kernel view.
                pl.BlockSpec((B, None, T, HW), lambda c: (0, c, 0, 0)),
                # W2 channel chunk.
                pl.BlockSpec((None, HW, hidden), lambda c: (c, 0, 0)),
                # Resident (constant index) small params / weights.
                pl.BlockSpec((1, 1, hidden + ncell_pad), lambda c: (0, 0, 0)),
                pl.BlockSpec((2, T, 1), lambda c: (0, 0, 0)),
                pl.BlockSpec((hidden, ncell_pad), lambda c: (0, 0)),
            ],
            out_specs=pl.BlockSpec((B, T, ncell_pad), lambda c: (0, 0, 0)),
            scratch_shapes=[pltpu.VMEM((B, T, hidden), jnp.float32)],
        ),
        compiler_params=pltpu.CompilerParams(
            dimension_semantics=("arbitrary",),
            vmem_limit_bytes=24 * 1024 * 1024,
        ),
    )(x4, w2, biases, gb, w1)

    return out[..., :ncell]


def reference(x, params):
    """Pure-JAX reference mirroring the PyTorch forward (train-mode BN), full f32."""
    W2, b2, gamma, beta, W1, b1 = params
    B, C, T, H, W = x.shape
    xr = jnp.transpose(x, (0, 2, 1, 3, 4)).reshape(B, T, -1)
    h = jnp.dot(xr, W2, precision=jax.lax.Precision.HIGHEST) + b2       # (B, T, 512)
    mean = jnp.mean(h, axis=(0, 2), keepdims=True)
    var = jnp.mean((h - mean) ** 2, axis=(0, 2), keepdims=True)         # biased var
    y = (h - mean) / jnp.sqrt(var + EPS) * gamma[None, :, None] + beta[None, :, None]
    y = jnp.maximum(y, 0.0)
    return jnp.dot(y, W1, precision=jax.lax.Precision.HIGHEST) + b1


if __name__ == "__main__":
    # Shapes implied by the module: C*H*W = 1024*3 = 3072 features, BN channels T = 45.
    B, C, T, H, W = 2, 3, 45, 32, 32
    ncell = 128

    key = jax.random.PRNGKey(0)
    kx, k1, k2, k3, k4, k5, k6 = jax.random.split(key, 7)

    x = jax.random.normal(kx, (B, C, T, H, W), jnp.float32)

    # Deterministic synthetic parameters (shapes from __init__).
    W2 = jax.random.normal(k1, (3072, 512), jnp.float32) * 0.02   # dense2.weight.T
    b2 = jax.random.normal(k2, (512,), jnp.float32) * 0.01        # dense2.bias
    W1 = jax.random.normal(k3, (512, ncell), jnp.float32) * 0.02  # dense1.weight.T
    b1 = jax.random.normal(k4, (ncell,), jnp.float32) * 0.01      # dense1.bias
    gamma = 1.0 + 0.1 * jax.random.normal(k5, (T,), jnp.float32)  # bn1.weight
    beta = 0.1 * jax.random.normal(k6, (T,), jnp.float32)         # bn1.bias
    params = (W2, b2, gamma, beta, W1, b1)

    out = jax.jit(inverse_spike_decoder)(x, params)
    out = jax.block_until_ready(out)

    ref = jax.block_until_ready(reference(x, params))
    assert out.shape == (B, T, ncell), out.shape
    # bf16 matmul operands (f32 accumulate) => bf16-class rounding over the K=3072
    # contraction; tolerance relaxed accordingly vs the f32-HIGHEST reference.
    err = jnp.max(jnp.abs(out - ref))
    if not bool(err < 2.5e-2):
        raise AssertionError(f"mismatch vs reference: max abs err = {err}")

    print("KERNEL_OK")
</pallas_src>

<mosaic_0001>
module attributes {stable_mosaic.version = 11 : i64} {
  func.func @kernel(%arg0: i32, %arg1: memref<2x1x45x1024xf32, #tpu.memory_space<vmem>>, %arg2: memref<1x1024x512xbf16, #tpu.memory_space<vmem>>, %arg3: memref<1x1x640xf32, #tpu.memory_space<vmem>>, %arg4: memref<2x45x1xf32, #tpu.memory_space<vmem>>, %arg5: memref<512x128xbf16, #tpu.memory_space<vmem>>, %arg6: memref<2x45x128xf32, #tpu.memory_space<vmem>>, %arg7: memref<2x45x512xf32, #tpu.memory_space<vmem>>) attributes {dimension_semantics = [#tpu.dimension_semantics<arbitrary>], iteration_bounds = array<i64: 3>, scalar_prefetch = 0 : i64, scratch_operands = 1 : i64, tpu.core_type = #tpu.core_type<tc>, window_params = [{transform_indices = @transform_0, window_bounds = array<i64: 2, 1, 45, 1024>}, {transform_indices = @transform_1, window_bounds = array<i64: 1, 1024, 512>}, {pipeline_mode = #tpu.pipeline_mode<synchronous>, transform_indices = @transform_2, window_bounds = array<i64: 1, 1, 640>}, {pipeline_mode = #tpu.pipeline_mode<synchronous>, transform_indices = @transform_3, window_bounds = array<i64: 2, 45, 1>}, {pipeline_mode = #tpu.pipeline_mode<synchronous>, transform_indices = @transform_4, window_bounds = array<i64: 512, 128>}, {pipeline_mode = #tpu.pipeline_mode<synchronous>, transform_indices = @transform_5, window_bounds = array<i64: 2, 45, 128>}]} {
    %c0_i32 = arith.constant 0 : i32
    %0 = arith.cmpi eq, %arg0, %c0_i32 : i32
    %1 = arith.extui %0 : i1 to i32
    %c0_i32_0 = arith.constant 0 : i32
    %2 = arith.cmpi ne, %1, %c0_i32_0 : i32
    scf.if %2 {
      %c0_24 = arith.constant 0 : index
      %c0_25 = arith.constant 0 : index
      %c0_26 = arith.constant 0 : index
      %28 = vector.load %arg3[%c0_24, %c0_25, %c0_26] : memref<1x1x640xf32, #tpu.memory_space<vmem>>, vector<1x1x512xf32>
      %29 = vector.shape_cast %28 : vector<1x1x512xf32> to vector<1x1x512xf32>
      %30 = vector.broadcast %29 : vector<1x1x512xf32> to vector<2x45x512xf32>
      %c0_27 = arith.constant 0 : index
      %c0_28 = arith.constant 0 : index
      %c0_29 = arith.constant 0 : index
      %31 = vector.load %arg7[%c0_27, %c0_28, %c0_29] : memref<2x45x512xf32, #tpu.memory_space<vmem>>, vector<2x45x512xf32>
      tpu.vector_store %arg7[%c0_27, %c0_28, %c0_29], %30 {strides = array<i32>} : memref<2x45x512xf32, #tpu.memory_space<vmem>>, vector<2x45x512xf32>,
    } else {
    }
    %c0 = arith.constant 0 : index
    %c0_1 = arith.constant 0 : index
    %c0_2 = arith.constant 0 : index
    %3 = vector.load %arg2[%c0, %c0_1, %c0_2] : memref<1x1024x512xbf16, #tpu.memory_space<vmem>>, vector<1x1024x512xbf16>
    %4 = vector.shape_cast %3 : vector<1x1024x512xbf16> to vector<1024x512xbf16>
    %c0_3 = arith.constant 0 : index
    %c0_4 = arith.constant 0 : index
    %c0_5 = arith.constant 0 : index
    %c0_6 = arith.constant 0 : index
    %5 = vector.load %arg1[%c0_3, %c0_4, %c0_5, %c0_6] : memref<2x1x45x1024xf32, #tpu.memory_space<vmem>>, vector<1x1x45x1024xf32>
    %6 = vector.shape_cast %5 : vector<1x1x45x1024xf32> to vector<45x1024xf32>
    %7 = arith.truncf %6 : vector<45x1024xf32> to vector<45x1024xbf16>
    %c0_7 = arith.constant 0 : index
    %c0_8 = arith.constant 0 : index
    %c0_9 = arith.constant 0 : index
    %8 = vector.load %arg7[%c0_7, %c0_8, %c0_9] : memref<2x45x512xf32, #tpu.memory_space<vmem>>, vector<1x45x512xf32>
    %9 = vector.shape_cast %8 : vector<1x45x512xf32> to vector<45x512xf32>
    %cst = arith.constant dense<0.000000e+00> : vector<45x512xf32>
    %10 = tpu.matmul %7, %4, %cst {dimension_numbers = #tpu.dot_dimension_numbers<[1], [0], [0], [1], [0, 0, 1, 1], [], []>} : vector<45x1024xbf16>, vector<1024x512xbf16>, vector<45x512xf32> -> vector<45x512xf32>
    %11 = arith.addf %9, %10 : vector<45x512xf32>
    %c0_10 = arith.constant 0 : index
    %c0_11 = arith.constant 0 : index
    %c0_12 = arith.constant 0 : index
    %12 = vector.load %arg7[%c0_10, %c0_11, %c0_12] : memref<2x45x512xf32, #tpu.memory_space<vmem>>, vector<1x45x512xf32>
    %13 = vector.shape_cast %12 : vector<1x45x512xf32> to vector<45x512xf32>
    %14 = vector.shape_cast %11 : vector<45x512xf32> to vector<1x45x512xf32>
    tpu.vector_store %arg7[%c0_10, %c0_11, %c0_12], %14 {strides = array<i32>} : memref<2x45x512xf32, #tpu.memory_space<vmem>>, vector<1x45x512xf32>,
    %c1 = arith.constant 1 : index
    %c0_13 = arith.constant 0 : index
    %c0_14 = arith.constant 0 : index
    %c0_15 = arith.constant 0 : index
    %15 = vector.load %arg1[%c1, %c0_13, %c0_14, %c0_15] : memref<2x1x45x1024xf32, #tpu.memory_space<vmem>>, vector<1x1x45x1024xf32>
    %16 = vector.shape_cast %15 : vector<1x1x45x1024xf32> to vector<45x1024xf32>
    %17 = arith.truncf %16 : vector<45x1024xf32> to vector<45x1024xbf16>
    %c1_16 = arith.constant 1 : index
    %c0_17 = arith.constant 0 : index
    %c0_18 = arith.constant 0 : index
    %18 = vector.load %arg7[%c1_16, %c0_17, %c0_18] : memref<2x45x512xf32, #tpu.memory_space<vmem>>, vector<1x45x512xf32>
    %19 = vector.shape_cast %18 : vector<1x45x512xf32> to vector<45x512xf32>
    %cst_19 = arith.constant dense<0.000000e+00> : vector<45x512xf32>
    %20 = tpu.matmul %17, %4, %cst_19 {dimension_numbers = #tpu.dot_dimension_numbers<[1], [0], [0], [1], [0, 0, 1, 1], [], []>} : vector<45x1024xbf16>, vector<1024x512xbf16>, vector<45x512xf32> -> vector<45x512xf32>
    %21 = arith.addf %19, %20 : vector<45x512xf32>
    %c1_20 = arith.constant 1 : index
    %c0_21 = arith.constant 0 : index
    %c0_22 = arith.constant 0 : index
    %22 = vector.load %arg7[%c1_20, %c0_21, %c0_22] : memref<2x45x512xf32, #tpu.memory_space<vmem>>, vector<1x45x512xf32>
    %23 = vector.shape_cast %22 : vector<1x45x512xf32> to vector<45x512xf32>
    %24 = vector.shape_cast %21 : vector<45x512xf32> to vector<1x45x512xf32>
    tpu.vector_store %arg7[%c1_20, %c0_21, %c0_22], %24 {strides = array<i32>} : memref<2x45x512xf32, #tpu.memory_space<vmem>>, vector<1x45x512xf32>,
    %c2_i32 = arith.constant 2 : i32
    %25 = arith.cmpi eq, %arg0, %c2_i32 : i32
    %26 = arith.extui %25 : i1 to i32
    %c0_i32_23 = arith.constant 0 : i32
    %27 = arith.cmpi ne, %26, %c0_i32_23 : i32
    scf.if %27 {
      %c0_24 = arith.constant 0 : index
      %c0_25 = arith.constant 0 : index
      %c0_26 = arith.constant 0 : index
      %28 = vector.load %arg7[%c0_24, %c0_25, %c0_26] : memref<2x45x512xf32, #tpu.memory_space<vmem>>, vector<2x45x512xf32>
      %cst_27 = arith.constant dense<0.000000e+00> : vector<2x45xf32>
      %29 = vector.multi_reduction <add>, %28, %cst_27 [2] : vector<2x45x512xf32> to vector<2x45xf32>
      %30 = vector.shape_cast %29 : vector<2x45xf32> to vector<2x45x1xf32>
      %cst_28 = arith.constant dense<0.000000e+00> : vector<45x1xf32>
      %31 = vector.multi_reduction <add>, %30, %cst_28 [0] : vector<2x45x1xf32> to vector<45x1xf32>
      %32 = vector.shape_cast %31 : vector<45x1xf32> to vector<1x45x1xf32>
      %cst_29 = arith.constant 9.765625E-4 : f32
      %33 = vector.broadcast %cst_29 : f32 to vector<1x45x1xf32>
      %34 = arith.mulf %32, %33 : vector<1x45x1xf32>
      %35 = vector.broadcast %34 : vector<1x45x1xf32> to vector<2x45x512xf32>
      %36 = arith.subf %28, %35 : vector<2x45x512xf32>
      %37 = arith.mulf %36, %36 : vector<2x45x512xf32>
      %cst_30 = arith.constant dense<0.000000e+00> : vector<2x45xf32>
      %38 = vector.multi_reduction <add>, %37, %cst_30 [2] : vector<2x45x512xf32> to vector<2x45xf32>
      %39 = vector.shape_cast %38 : vector<2x45xf32> to vector<2x45x1xf32>
      %cst_31 = arith.constant dense<0.000000e+00> : vector<45x1xf32>
      %40 = vector.multi_reduction <add>, %39, %cst_31 [0] : vector<2x45x1xf32> to vector<45x1xf32>
      %41 = vector.shape_cast %40 : vector<45x1xf32> to vector<1x45x1xf32>
      %cst_32 = arith.constant 9.765625E-4 : f32
      %42 = vector.broadcast %cst_32 : f32 to vector<1x45x1xf32>
      %43 = arith.mulf %41, %42 : vector<1x45x1xf32>
      %cst_33 = arith.constant 9.99999974E-6 : f32
      %44 = vector.broadcast %cst_33 : f32 to vector<1x45x1xf32>
      %45 = arith.addf %43, %44 : vector<1x45x1xf32>
      %46 = math.rsqrt %45 : vector<1x45x1xf32>
      %c0_34 = arith.constant 0 : index
      %c0_35 = arith.constant 0 : index
      %c0_36 = arith.constant 0 : index
      %47 = vector.load %arg4[%c0_34, %c0_35, %c0_36] : memref<2x45x1xf32, #tpu.memory_space<vmem>>, vector<1x45x1xf32>
      %c1_37 = arith.constant 1 : index
      %c0_38 = arith.constant 0 : index
      %c0_39 = arith.constant 0 : index
      %48 = vector.load %arg4[%c1_37, %c0_38, %c0_39] : memref<2x45x1xf32, #tpu.memory_space<vmem>>, vector<1x45x1xf32>
      %49 = arith.mulf %46, %47 : vector<1x45x1xf32>
      %50 = arith.mulf %34, %49 : vector<1x45x1xf32>
      %51 = arith.subf %48, %50 : vector<1x45x1xf32>
      %52 = vector.broadcast %49 : vector<1x45x1xf32> to vector<2x45x512xf32>
      %53 = arith.mulf %28, %52 : vector<2x45x512xf32>
      %54 = vector.broadcast %51 : vector<1x45x1xf32> to vector<2x45x512xf32>
      %55 = arith.addf %53, %54 : vector<2x45x512xf32>
      %cst_40 = arith.constant 0.000000e+00 : f32
      %56 = vector.broadcast %cst_40 : f32 to vector<2x45x512xf32>
      %57 = arith.maximumf %55, %56 : vector<2x45x512xf32>
      %58 = arith.truncf %57 : vector<2x45x512xf32> to vector<2x45x512xbf16>
      %c0_41 = arith.constant 0 : index
      %c0_42 = arith.constant 0 : index
      %59 = vector.load %arg5[%c0_41, %c0_42] : memref<512x128xbf16, #tpu.memory_space<vmem>>, vector<512x128xbf16>
      %c0_43 = arith.constant 0 : index
      %c0_44 = arith.constant 0 : index
      %c512 = arith.constant 512 : index
      %60 = vector.load %arg3[%c0_43, %c0_44, %c512] : memref<1x1x640xf32, #tpu.memory_space<vmem>>, vector<1x1x128xf32>
      %61 = vector.shape_cast %60 : vector<1x1x128xf32> to vector<1x128xf32>
      %62 = vector.extract_strided_slice %58 {offsets = [0, 0, 0], sizes = [1, 45, 512], strides = [1, 1, 1]} : vector<2x45x512xbf16> to vector<1x45x512xbf16>
      %63 = vector.shape_cast %62 : vector<1x45x512xbf16> to vector<45x512xbf16>
      %cst_45 = arith.constant dense<0.000000e+00> : vector<45x128xf32>
      %64 = tpu.matmul %63, %59, %cst_45 {dimension_numbers = #tpu.dot_dimension_numbers<[1], [0], [0], [1], [0, 0, 1, 1], [], []>} : vector<45x512xbf16>, vector<512x128xbf16>, vector<45x128xf32> -> vector<45x128xf32>
      %65 = vector.broadcast %61 : vector<1x128xf32> to vector<45x128xf32>
      %66 = arith.addf %64, %65 : vector<45x128xf32>
      %c0_46 = arith.constant 0 : index
      %c0_47 = arith.constant 0 : index
      %c0_48 = arith.constant 0 : index
      %67 = vector.load %arg6[%c0_46, %c0_47, %c0_48] : memref<2x45x128xf32, #tpu.memory_space<vmem>>, vector<1x45x128xf32>
      %68 = vector.shape_cast %67 : vector<1x45x128xf32> to vector<45x128xf32>
      %69 = vector.shape_cast %66 : vector<45x128xf32> to vector<1x45x128xf32>
      tpu.vector_store %arg6[%c0_46, %c0_47, %c0_48], %69 {strides = array<i32>} : memref<2x45x128xf32, #tpu.memory_space<vmem>>, vector<1x45x128xf32>,
      %70 = vector.extract_strided_slice %58 {offsets = [1, 0, 0], sizes = [1, 45, 512], strides = [1, 1, 1]} : vector<2x45x512xbf16> to vector<1x45x512xbf16>
      %71 = vector.shape_cast %70 : vector<1x45x512xbf16> to vector<45x512xbf16>
      %cst_49 = arith.constant dense<0.000000e+00> : vector<45x128xf32>
      %72 = tpu.matmul %71, %59, %cst_49 {dimension_numbers = #tpu.dot_dimension_numbers<[1], [0], [0], [1], [0, 0, 1, 1], [], []>} : vector<45x512xbf16>, vector<512x128xbf16>, vector<45x128xf32> -> vector<45x128xf32>
      %73 = vector.broadcast %61 : vector<1x128xf32> to vector<45x128xf32>
      %74 = arith.addf %72, %73 : vector<45x128xf32>
      %c1_50 = arith.constant 1 : index
      %c0_51 = arith.constant 0 : index
      %c0_52 = arith.constant 0 : index
      %75 = vector.load %arg6[%c1_50, %c0_51, %c0_52] : memref<2x45x128xf32, #tpu.memory_space<vmem>>, vector<1x45x128xf32>
      %76 = vector.shape_cast %75 : vector<1x45x128xf32> to vector<45x128xf32>
      %77 = vector.shape_cast %74 : vector<45x128xf32> to vector<1x45x128xf32>
      tpu.vector_store %arg6[%c1_50, %c0_51, %c0_52], %77 {strides = array<i32>} : memref<2x45x128xf32, #tpu.memory_space<vmem>>, vector<1x45x128xf32>,
    } else {
    }
    return
  }
  func.func @transform_0(%arg0: i32) -> (i32, i32, i32, i32) {
    %c0_i32 = arith.constant 0 : i32
    %c0_i32_0 = arith.constant 0 : i32
    %c0_i32_1 = arith.constant 0 : i32
    %c0_i32_2 = arith.constant 0 : i32
    return %c0_i32, %arg0, %c0_i32_0, %c0_i32_1 : i32, i32, i32, i32
  }
  func.func @transform_1(%arg0: i32) -> (i32, i32, i32) {
    %c0_i32 = arith.constant 0 : i32
    %c0_i32_0 = arith.constant 0 : i32
    %c0_i32_1 = arith.constant 0 : i32
    return %arg0, %c0_i32, %c0_i32_0 : i32, i32, i32
  }
  func.func @transform_2(%arg0: i32) -> (i32, i32, i32) {
    %c0_i32 = arith.constant 0 : i32
    %c0_i32_0 = arith.constant 0 : i32
    %c0_i32_1 = arith.constant 0 : i32
    %c0_i32_2 = arith.constant 0 : i32
    return %c0_i32, %c0_i32_0, %c0_i32_1 : i32, i32, i32
  }
  func.func @transform_3(%arg0: i32) -> (i32, i32, i32) {
    %c0_i32 = arith.constant 0 : i32
    %c0_i32_0 = arith.constant 0 : i32
    %c0_i32_1 = arith.constant 0 : i32
    %c0_i32_2 = arith.constant 0 : i32
    return %c0_i32, %c0_i32_0, %c0_i32_1 : i32, i32, i32
  }
  func.func @transform_4(%arg0: i32) -> (i32, i32) {
    %c0_i32 = arith.constant 0 : i32
    %c0_i32_0 = arith.constant 0 : i32
    %c0_i32_1 = arith.constant 0 : i32
    return %c0_i32, %c0_i32_0 : i32, i32
  }
  func.func @transform_5(%arg0: i32) -> (i32, i32, i32) {
    %c0_i32 = arith.constant 0 : i32
    %c0_i32_0 = arith.constant 0 : i32
    %c0_i32_1 = arith.constant 0 : i32
    %c0_i32_2 = arith.constant 0 : i32
    return %c0_i32, %c0_i32_0, %c0_i32_1 : i32, i32, i32
  }
}

</mosaic_0001>

<bundles_post_ra>
// kernel: inverse_spike_decoder.1
= control target key start
LH: loop header
LB: loop body
LE: loop exit
PB: predicated region body
PF: predicated region fallthrough
CT: control target
= control target key end

     0   :  { %s5837_s18 = smov 0   ;;  %s5839_s19 = smov 0   ;;  %s7713_s0 = inlined_call_operand.vmem [shape: f32[2,3,45,1024], index: 0, kind: input, shape index: {}]   ;;  %s7714_s1 = inlined_call_operand.vmem [shape: bf16[3,1024,512], index: 1, kind: input, shape index: {}]   ;;  %s7715_s2 = inlined_call_operand.vmem [shape: f32[1,1,640], index: 2, kind: input, shape index: {}]   ;;  %s7716_s3 = inlined_call_operand.vmem [shape: f32[2,45,1], index: 3, kind: input, shape index: {}]   ;;  %s7717_s4 = inlined_call_operand.vmem [shape: bf16[512,128], index: 4, kind: input, shape index: {}]   ;;  %s7718_s5 = inlined_call_operand.vmem [shape: f32[2,45,128], index: 5, kind: output, shape index: {}]  }
   0x1   :  { %s5841_s20 = smov 0  }
   0x2 LB: > { %s5853_s21 = sadd.s32 4294967295, %s5804_s20   ;;  %s5856_s22 = sadd.s32 1, %s5804_s20   ;;  %s5804_s20 = sphi %s5841_s20, %s7880_s20   ;;  %s5800_s19 = sphi %s5839_s19, %s7879_s19   ;;  %s5796_s18 = sphi %s5837_s18, %s7878_s18  }
   0x3   : > { %s19_s23 = ssub.s32 %s5804_s20, %s5856_s22  ;;  %s22_s24 = sadd.s32 1, %s5800_s19 }
   0x4   : > { %p20_p0 = scmp.eq.s32.totalorder %s19_s23, 0  ;;  %p29_p1 = scmp.ne.s32.totalorder %s5800_s19, %s5796_s18 }
   0x5   : > { %p30_p2 = scmp.eq.s32.totalorder %s5804_s20, 0  ;;  %p4485_p4 = scmp.ge.s32.totalorder %s5804_s20, 3 }
   0x6   : > { %s5865_s25 = scalar_select %p20_p0, %s5800_s19, %s22_s24  }
   0x7   : > { %p31_p3 = por %p30_p2, %p29_p1  ;;  %174 = sbr.rel (%p4485_p4) target bundleno = 67 (0x43), region = 28 }
   0xe   : > { %177 = sbr.rel (!%p31_p3) target bundleno = 67 (0x43), region = 32  ;;  %s179_s26 = sand.u32 (%p31_p3), 1, %s5800_s19  }
   0xf   : > { %s5125_s27 = smul.u32 (%p31_p3), 384, %s5804_s20 }
  0x10   : > { %s5124_s28 = smul.u32 (%p31_p3), 768, %s179_s26 }
  0x11   : > { %s5873_s6 = scalar_lea.vmem (%p31_p3), %s7713_s0, %s5125_s27 }
  0x12   : > { %v197_v0 = vld [vmem:[%s5873_s6] sm:$0xff] (%p31_p3)  ;;  %v199_v1 = vld [vmem:[%s5873_s6 + $0x8] sm:$0xff] (%p31_p3)  ;;  %v201_v2 = vld [vmem:[%s5873_s6 + $0x10] sm:$0xff] (%p31_p3)  ;;  %s5878_s7 = scalar_lea.vmem (%p31_p3), [#allocation3], %s5124_s28 }
  0x13   : > { %198 = vst [vmem:[%s5878_s7] sm:$0xff] (%p31_p3), %v197_v0  ;;  %200 = vst [vmem:[%s5878_s7 + $0x8] sm:$0xff] (%p31_p3), %v199_v1  ;;  %v203_v3 = vld [vmem:[%s5873_s6 + $0x18] sm:$0xff] (%p31_p3)  ;;  %v205_v4 = vld [vmem:[%s5873_s6 + $0x20] sm:$0xff] (%p31_p3) }
  0x14   : > { %202 = vst [vmem:[%s5878_s7 + $0x10] sm:$0xff] (%p31_p3), %v201_v2  ;;  %v207_v5 = vld [vmem:[%s5873_s6 + $0x28] sm:$0xff] (%p31_p3)  ;;  %204 = vst [vmem:[%s5878_s7 + $0x18] sm:$0xff] (%p31_p3), %v203_v3  ;;  %v209_v6 = vld [vmem:[%s5873_s6 + $0x30] sm:$0xff] (%p31_p3) }
  0x15   : > { %206 = vst [vmem:[%s5878_s7 + $0x20] sm:$0xff] %v205_v4  ;;  %208 = vst [vmem:[%s5878_s7 + $0x28] sm:$0xff] %v207_v5  ;;  %v211_v7 = vld [vmem:[%s5873_s6 + $0x38] sm:$0xff]  ;;  %v213_v8 = vld [vmem:[%s5873_s6 + $0x40] sm:$0xff] }
  0x16   : > { %210 = vst [vmem:[%s5878_s7 + $0x30] sm:$0xff] %v209_v6  ;;  %212 = vst [vmem:[%s5878_s7 + $0x38] sm:$0xff] %v211_v7  ;;  %v215_v9 = vld [vmem:[%s5873_s6 + $0x48] sm:$0xff]  ;;  %v217_v10 = vld [vmem:[%s5873_s6 + $0x50] sm:$0xff] }
  0x17   : > { %214 = vst [vmem:[%s5878_s7 + $0x40] sm:$0xff] %v213_v8  ;;  %v219_v11 = vld [vmem:[%s5873_s6 + $0x58] sm:$0xff]  ;;  %216 = vst [vmem:[%s5878_s7 + $0x48] sm:$0xff] %v215_v9  ;;  %v221_v12 = vld [vmem:[%s5873_s6 + $0x60] sm:$0xff] }
  0x18   : > { %218 = vst [vmem:[%s5878_s7 + $0x50] sm:$0xff] %v217_v10  ;;  %220 = vst [vmem:[%s5878_s7 + $0x58] sm:$0xff] %v219_v11  ;;  %v223_v13 = vld [vmem:[%s5873_s6 + $0x68] sm:$0xff]  ;;  %v225_v14 = vld [vmem:[%s5873_s6 + $0x70] sm:$0xff] }
  0x19   : > { %222 = vst [vmem:[%s5878_s7 + $0x60] sm:$0xff] %v221_v12  ;;  %224 = vst [vmem:[%s5878_s7 + $0x68] sm:$0xff] %v223_v13  ;;  %v227_v15 = vld [vmem:[%s5873_s6 + $0x78] sm:$0xff]  ;;  %v229_v16 = vld [vmem:[%s5873_s6 + $0x80] sm:$0xff] }
  0x1a   : > { %226 = vst [vmem:[%s5878_s7 + $0x70] sm:$0xff] %v225_v14  ;;  %v231_v17 = vld [vmem:[%s5873_s6 + $0x88] sm:$0xff]  ;;  %228 = vst [vmem:[%s5878_s7 + $0x78] sm:$0xff] %v227_v15  ;;  %v233_v18 = vld [vmem:[%s5873_s6 + $0x90] sm:$0xff] }
  0x1b   : > { %230 = vst [vmem:[%s5878_s7 + $0x80] sm:$0xff] %v229_v16  ;;  %232 = vst [vmem:[%s5878_s7 + $0x88] sm:$0xff] %v231_v17  ;;  %v235_v19 = vld [vmem:[%s5873_s6 + $0x98] sm:$0xff]  ;;  %v237_v20 = vld [vmem:[%s5873_s6 + $0xa0] sm:$0xff] }
  0x1c   : > { %234 = vst [vmem:[%s5878_s7 + $0x90] sm:$0xff] %v233_v18  ;;  %236 = vst [vmem:[%s5878_s7 + $0x98] sm:$0xff] %v235_v19  ;;  %v239_v21 = vld [vmem:[%s5873_s6 + $0xa8] sm:$0xff]  ;;  %v241_v22 = vld [vmem:[%s5873_s6 + $0xb0] sm:$0xff] }
  0x1d   : > { %238 = vst [vmem:[%s5878_s7 + $0xa0] sm:$0xff] %v237_v20  ;;  %v243_v23 = vld [vmem:[%s5873_s6 + $0xb8] sm:$0xff]  ;;  %240 = vst [vmem:[%s5878_s7 + $0xa8] sm:$0xff] %v239_v21  ;;  %v245_v24 = vld [vmem:[%s5873_s6 + $0xc0] sm:$0xff] }
  0x1e   : > { %242 = vst [vmem:[%s5878_s7 + $0xb0] sm:$0xff] %v241_v22  ;;  %244 = vst [vmem:[%s5878_s7 + $0xb8] sm:$0xff] %v243_v23  ;;  %v247_v25 = vld [vmem:[%s5873_s6 + $0xc8] sm:$0xff]  ;;  %v249_v26 = vld [vmem:[%s5873_s6 + $0xd0] sm:$0xff] }
  0x1f   : > { %246 = vst [vmem:[%s5878_s7 + $0xc0] sm:$0xff] %v245_v24  ;;  %248 = vst [vmem:[%s5878_s7 + $0xc8] sm:$0xff] %v247_v25  ;;  %v251_v27 = vld [vmem:[%s5873_s6 + $0xd8] sm:$0xff]  ;;  %v253_v28 = vld [vmem:[%s5873_s6 + $0xe0] sm:$0xff] }
  0x20   : > { %250 = vst [vmem:[%s5878_s7 + $0xd0] sm:$0xff] %v249_v26  ;;  %v255_v29 = vld [vmem:[%s5873_s6 + $0xe8] sm:$0xff]  ;;  %252 = vst [vmem:[%s5878_s7 + $0xd8] sm:$0xff] %v251_v27  ;;  %v257_v30 = vld [vmem:[%s5873_s6 + $0xf0] sm:$0xff] }
  0x21   : > { %254 = vst [vmem:[%s5878_s7 + $0xe0] sm:$0xff] %v253_v28  ;;  %256 = vst [vmem:[%s5878_s7 + $0xe8] sm:$0xff] %v255_v29  ;;  %v259_v31 = vld [vmem:[%s5873_s6 + $0xf8] sm:$0xff]  ;;  %v261_v32 = vld [vmem:[%s5873_s6 + $0x100] sm:$0xff] }
  0x22   : > { %258 = vst [vmem:[%s5878_s7 + $0xf0] sm:$0xff] %v257_v30  ;;  %260 = vst [vmem:[%s5878_s7 + $0xf8] sm:$0xff] %v259_v31  ;;  %v263_v33 = vld [vmem:[%s5873_s6 + $0x108] sm:$0xff]  ;;  %v265_v34 = vld [vmem:[%s5873_s6 + $0x110] sm:$0xff] }
  0x23   : > { %262 = vst [vmem:[%s5878_s7 + $0x100] sm:$0xff] %v261_v32  ;;  %v267_v35 = vld [vmem:[%s5873_s6 + $0x118] sm:$0xff]  ;;  %264 = vst [vmem:[%s5878_s7 + $0x108] sm:$0xff] %v263_v33  ;;  %v269_v36 = vld [vmem:[%s5873_s6 + $0x120] sm:$0xff] }
  0x24   : > { %266 = vst [vmem:[%s5878_s7 + $0x110] sm:$0xff] %v265_v34  ;;  %268 = vst [vmem:[%s5878_s7 + $0x118] sm:$0xff] %v267_v35  ;;  %v271_v37 = vld [vmem:[%s5873_s6 + $0x128] sm:$0xff]  ;;  %v273_v38 = vld [vmem:[%s5873_s6 + $0x130] sm:$0xff] }
  0x25   : > { %270 = vst [vmem:[%s5878_s7 + $0x120] sm:$0xff] %v269_v36  ;;  %272 = vst [vmem:[%s5878_s7 + $0x128] sm:$0xff] %v271_v37  ;;  %v275_v39 = vld [vmem:[%s5873_s6 + $0x138] sm:$0xff]  ;;  %v277_v40 = vld [vmem:[%s5873_s6 + $0x140] sm:$0xff] }
  0x26   : > { %274 = vst [vmem:[%s5878_s7 + $0x130] sm:$0xff] %v273_v38  ;;  %v279_v41 = vld [vmem:[%s5873_s6 + $0x148] sm:$0xff]  ;;  %276 = vst [vmem:[%s5878_s7 + $0x138] sm:$0xff] %v275_v39  ;;  %v281_v42 = vld [vmem:[%s5873_s6 + $0x150] sm:$0xff] }
  0x27   : > { %278 = vst [vmem:[%s5878_s7 + $0x140] sm:$0xff] %v277_v40  ;;  %280 = vst [vmem:[%s5878_s7 + $0x148] sm:$0xff] %v279_v41  ;;  %v283_v43 = vld [vmem:[%s5873_s6 + $0x158] sm:$0xff]  ;;  %v285_v44 = vld [vmem:[%s5873_s6 + $0x160] sm:$0xff] }
  0x28   : > { %282 = vst [vmem:[%s5878_s7 + $0x150] sm:$0xff] %v281_v42  ;;  %284 = vst [vmem:[%s5878_s7 + $0x158] sm:$0xff] %v283_v43  ;;  %v287_v45 = vld [vmem:[%s5873_s6 + $0x168] sm:$0xff]  ;;  %v289_v46 = vld [vmem:[%s5873_s6 + $0x170] sm:$0xff] }
  0x29   : > { %286 = vst [vmem:[%s5878_s7 + $0x160] sm:$0xff] %v285_v44  ;;  %v291_v47 = vld [vmem:[%s5873_s6 + $0x178] sm:$0xff]  ;;  %288 = vst [vmem:[%s5878_s7 + $0x168] sm:$0xff] %v287_v45  ;;  %v293_v48 = vld [vmem:[%s5873_s6 + $0x480] sm:$0xff] }
  0x2a   : > { %290 = vst [vmem:[%s5878_s7 + $0x170] sm:$0xff] %v289_v46  ;;  %292 = vst [vmem:[%s5878_s7 + $0x178] sm:$0xff] %v291_v47  ;;  %v295_v49 = vld [vmem:[%s5873_s6 + $0x488] sm:$0xff]  ;;  %v297_v50 = vld [vmem:[%s5873_s6 + $0x490] sm:$0xff] }
  0x2b   : > { %294 = vst [vmem:[%s5878_s7 + $0x180] sm:$0xff] %v293_v48  ;;  %296 = vst [vmem:[%s5878_s7 + $0x188] sm:$0xff] %v295_v49  ;;  %v299_v51 = vld [vmem:[%s5873_s6 + $0x498] sm:$0xff]  ;;  %v301_v52 = vld [vmem:[%s5873_s6 + $0x4a0] sm:$0xff] }
  0x2c   : > { %298 = vst [vmem:[%s5878_s7 + $0x190] sm:$0xff] %v297_v50  ;;  %v303_v53 = vld [vmem:[%s5873_s6 + $0x4a8] sm:$0xff]  ;;  %300 = vst [vmem:[%s5878_s7 + $0x198] sm:$0xff] %v299_v51  ;;  %v305_v54 = vld [vmem:[%s5873_s6 + $0x4b0] sm:$0xff] }
  0x2d   : > { %302 = vst [vmem:[%s5878_s7 + $0x1a0] sm:$0xff] %v301_v52  ;;  %304 = vst [vmem:[%s5878_s7 + $0x1a8] sm:$0xff] %v303_v53  ;;  %v307_v55 = vld [vmem:[%s5873_s6 + $0x4b8] sm:$0xff]  ;;  %v309_v56 = vld [vmem:[%s5873_s6 + $0x4c0] sm:$0xff] }
  0x2e   : > { %306 = vst [vmem:[%s5878_s7 + $0x1b0] sm:$0xff] %v305_v54  ;;  %308 = vst [vmem:[%s5878_s7 + $0x1b8] sm:$0xff] %v307_v55  ;;  %v311_v57 = vld [vmem:[%s5873_s6 + $0x4c8] sm:$0xff]  ;;  %v313_v58 = vld [vmem:[%s5873_s6 + $0x4d0] sm:$0xff] }
  0x2f   : > { %310 = vst [vmem:[%s5878_s7 + $0x1c0] sm:$0xff] %v309_v56  ;;  %v315_v59 = vld [vmem:[%s5873_s6 + $0x4d8] sm:$0xff]  ;;  %312 = vst [vmem:[%s5878_s7 + $0x1c8] sm:$0xff] %v311_v57  ;;  %v317_v60 = vld [vmem:[%s5873_s6 + $0x4e0] sm:$0xff] }
  0x30   : > { %314 = vst [vmem:[%s5878_s7 + $0x1d0] sm:$0xff] %v313_v58  ;;  %316 = vst [vmem:[%s5878_s7 + $0x1d8] sm:$0xff] %v315_v59  ;;  %v319_v61 = vld [vmem:[%s5873_s6 + $0x4e8] sm:$0xff]  ;;  %v321_v62 = vld [vmem:[%s5873_s6 + $0x4f0] sm:$0xff] }
  0x31   : > { %318 = vst [vmem:[%s5878_s7 + $0x1e0] sm:$0xff] %v317_v60  ;;  %320 = vst [vmem:[%s5878_s7 + $0x1e8] sm:$0xff] %v319_v61  ;;  %v323_v63 = vld [vmem:[%s5873_s6 + $0x4f8] sm:$0xff]  ;;  %v325_v0 = vld [vmem:[%s5873_s6 + $0x500] sm:$0xff] }
  0x32   : > { %322 = vst [vmem:[%s5878_s7 + $0x1f0] sm:$0xff] %v321_v62  ;;  %v327_v1 = vld [vmem:[%s5873_s6 + $0x508] sm:$0xff]  ;;  %324 = vst [vmem:[%s5878_s7 + $0x1f8] sm:$0xff] %v323_v63  ;;  %v329_v2 = vld [vmem:[%s5873_s6 + $0x510] sm:$0xff] }
  0x33   : > { %326 = vst [vmem:[%s5878_s7 + $0x200] sm:$0xff] %v325_v0  ;;  %328 = vst [vmem:[%s5878_s7 + $0x208] sm:$0xff] %v327_v1  ;;  %v331_v3 = vld [vmem:[%s5873_s6 + $0x518] sm:$0xff]  ;;  %v333_v4 = vld [vmem:[%s5873_s6 + $0x520] sm:$0xff] }
  0x34   : > { %330 = vst [vmem:[%s5878_s7 + $0x210] sm:$0xff] %v329_v2  ;;  %332 = vst [vmem:[%s5878_s7 + $0x218] sm:$0xff] %v331_v3  ;;  %v335_v5 = vld [vmem:[%s5873_s6 + $0x528] sm:$0xff]  ;;  %v337_v6 = vld [vmem:[%s5873_s6 + $0x530] sm:$0xff] }
  0x35   : > { %334 = vst [vmem:[%s5878_s7 + $0x220] sm:$0xff] %v333_v4  ;;  %v339_v7 = vld [vmem:[%s5873_s6 + $0x538] sm:$0xff]  ;;  %336 = vst [vmem:[%s5878_s7 + $0x228] sm:$0xff] %v335_v5  ;;  %v341_v8 = vld [vmem:[%s5873_s6 + $0x540] sm:$0xff] }
  0x36   : > { %338 = vst [vmem:[%s5878_s7 + $0x230] sm:$0xff] %v337_v6  ;;  %340 = vst [vmem:[%s5878_s7 + $0x238] sm:$0xff] %v339_v7  ;;  %v343_v9 = vld [vmem:[%s5873_s6 + $0x548] sm:$0xff]  ;;  %v345_v10 = vld [vmem:[%s5873_s6 + $0x550] sm:$0xff] }
  0x37   : > { %342 = vst [vmem:[%s5878_s7 + $0x240] sm:$0xff] %v341_v8  ;;  %344 = vst [vmem:[%s5878_s7 + $0x248] sm:$0xff] %v343_v9  ;;  %v347_v11 = vld [vmem:[%s5873_s6 + $0x558] sm:$0xff]  ;;  %v349_v12 = vld [vmem:[%s5873_s6 + $0x560] sm:$0xff] }
  0x38   : > { %346 = vst [vmem:[%s5878_s7 + $0x250] sm:$0xff] %v345_v10  ;;  %v351_v13 = vld [vmem:[%s5873_s6 + $0x568] sm:$0xff]  ;;  %348 = vst [vmem:[%s5878_s7 + $0x258] sm:$0xff] %v347_v11  ;;  %v353_v14 = vld [vmem:[%s5873_s6 + $0x570] sm:$0xff] }
  0x39   : > { %350 = vst [vmem:[%s5878_s7 + $0x260] sm:$0xff] %v349_v12  ;;  %352 = vst [vmem:[%s5878_s7 + $0x268] sm:$0xff] %v351_v13  ;;  %v355_v15 = vld [vmem:[%s5873_s6 + $0x578] sm:$0xff]  ;;  %v357_v16 = vld [vmem:[%s5873_s6 + $0x580] sm:$0xff] }
  0x3a   : > { %354 = vst [vmem:[%s5878_s7 + $0x270] sm:$0xff] %v353_v14  ;;  %356 = vst [vmem:[%s5878_s7 + $0x278] sm:$0xff] %v355_v15  ;;  %v359_v17 = vld [vmem:[%s5873_s6 + $0x588] sm:$0xff]  ;;  %v361_v18 = vld [vmem:[%s5873_s6 + $0x590] sm:$0xff] }
  0x3b   : > { %358 = vst [vmem:[%s5878_s7 + $0x280] sm:$0xff] %v357_v16  ;;  %v363_v19 = vld [vmem:[%s5873_s6 + $0x598] sm:$0xff]  ;;  %360 = vst [vmem:[%s5878_s7 + $0x288] sm:$0xff] %v359_v17  ;;  %v365_v20 = vld [vmem:[%s5873_s6 + $0x5a0] sm:$0xff] }
  0x3c   : > { %362 = vst [vmem:[%s5878_s7 + $0x290] sm:$0xff] %v361_v18  ;;  %364 = vst [vmem:[%s5878_s7 + $0x298] sm:$0xff] %v363_v19  ;;  %v367_v21 = vld [vmem:[%s5873_s6 + $0x5a8] sm:$0xff]  ;;  %v369_v22 = vld [vmem:[%s5873_s6 + $0x5b0] sm:$0xff] }
  0x3d   : > { %366 = vst [vmem:[%s5878_s7 + $0x2a0] sm:$0xff] %v365_v20  ;;  %368 = vst [vmem:[%s5878_s7 + $0x2a8] sm:$0xff] %v367_v21  ;;  %v371_v23 = vld [vmem:[%s5873_s6 + $0x5b8] sm:$0xff]  ;;  %v373_v24 = vld [vmem:[%s5873_s6 + $0x5c0] sm:$0xff] }
  0x3e   : > { %370 = vst [vmem:[%s5878_s7 + $0x2b0] sm:$0xff] %v369_v22  ;;  %v375_v25 = vld [vmem:[%s5873_s6 + $0x5c8] sm:$0xff]  ;;  %372 = vst [vmem:[%s5878_s7 + $0x2b8] sm:$0xff] %v371_v23  ;;  %v377_v26 = vld [vmem:[%s5873_s6 + $0x5d0] sm:$0xff] }
  0x3f   : > { %374 = vst [vmem:[%s5878_s7 + $0x2c0] sm:$0xff] %v373_v24  ;;  %376 = vst [vmem:[%s5878_s7 + $0x2c8] sm:$0xff] %v375_v25  ;;  %v379_v27 = vld [vmem:[%s5873_s6 + $0x5d8] sm:$0xff]  ;;  %v381_v28 = vld [vmem:[%s5873_s6 + $0x5e0] sm:$0xff] }
  0x40   : > { %378 = vst [vmem:[%s5878_s7 + $0x2d0] sm:$0xff] %v377_v26  ;;  %380 = vst [vmem:[%s5878_s7 + $0x2d8] sm:$0xff] %v379_v27  ;;  %v383_v29 = vld [vmem:[%s5873_s6 + $0x5e8] sm:$0xff]  ;;  %v385_v30 = vld [vmem:[%s5873_s6 + $0x5f0] sm:$0xff] }
  0x41   : > { %382 = vst [vmem:[%s5878_s7 + $0x2e0] sm:$0xff] %v381_v28  ;;  %v387_v31 = vld [vmem:[%s5873_s6 + $0x5f8] sm:$0xff]  ;;  %384 = vst [vmem:[%s5878_s7 + $0x2e8] sm:$0xff] %v383_v29 }
  0x42   : > { %386 = vst [vmem:[%s5878_s7 + $0x2f0] sm:$0xff] %v385_v30  ;;  %388 = vst [vmem:[%s5878_s7 + $0x2f8] sm:$0xff] %v387_v31 }
  0x43 PF: > { %p4487_p5 = scmp.ge.s32.totalorder %s5804_s20, 1  ;;  %p401_p6 = scmp.lt.s32.totalorder %s5804_s20, 4 }
  0x45   : > { %p402_p7 = pnand %p4487_p5, %p401_p6 }
  0x47   : > { %405 = sbr.rel (%p402_p7) target bundleno = 1607 (0x647), region = 59 }
  0x4e   : > { %s408_s8 = sand.u32 1, %s5796_s18   ;;  %p435_p8 = scmp.lt.s32.totalorder %s5853_s21, 2 }
  0x4f   : > { %s5126_s9 = smul.u32 768, %s408_s8  ;;  %p4490_p9 = scmp.ne.s32.totalorder %s5853_s21, 0 }
  0x50   : > { %s436_s10 = scalar_select %p435_p8, %s5853_s21, 2 }
  0x51   : > { %s6079_s15 = scalar_lea.vmem [#allocation3], %s5126_s9  ;;  %444 = sbr.rel (%p4490_p9) target bundleno = 113 (0x71), region = 67  ;;  %v447_v32 = vlaneseq (!%p4490_p9)  ;;  %v445_v34 = vld [vmem:[%s7715_s2] sm:$0xf] (!%p4490_p9) }
  0x52   : > { %s4843_s11 = sshll.u32 %s436_s10, 11 }
  0x53   : > { %s6077_s14 = scalar_lea.vmem %s7714_s1, %s4843_s11  ;;  %v448_v33 = vshrl.u32 (!%p4490_p9), %v447_v32, 7 }
  0x55   : > { %v449_v35 = vsub.s32 (!%p4490_p9), 0, %v448_v33  ;;  %v453_v36 = vsub.s32 (!%p4490_p9), 1, %v448_v33  ;;  %v457_v37 = vsub.s32 (!%p4490_p9), 2, %v448_v33  ;;  %v461_v38 = vsub.s32 (!%p4490_p9), 3, %v448_v33 }
  0x57   : > { %v450_v39 = vrot.slane (!%p4490_p9), %v445_v34, %v449_v35  ;;  %v454_v40 = vrot.slane (!%p4490_p9), %v445_v34, %v453_v36  ;;  %v458_v41 = vrot.slane (!%p4490_p9), %v445_v34, %v457_v37  ;;  %v462_v42 = vrot.slane (!%p4490_p9), %v445_v34, %v461_v38 }
  0x59   : > { %467 = vst [vmem:[#allocation2] sm:$0xff] %v450_v39  ;;  %471 = vst [vmem:[#allocation2 + $0x20] sm:$0xff] %v450_v39 }
  0x5a   : > { %475 = vst [vmem:[#allocation2 + $0x40] sm:$0xff] %v450_v39  ;;  %479 = vst [vmem:[#allocation2 + $0x60] sm:$0xff] %v450_v39 }
  0x5b   : > { %483 = vst [vmem:[#allocation2 + $0x80] sm:$0xff] %v450_v39  ;;  %487 = vst [vmem:[#allocation2 + $0xa0] sm:$0x1f] %v450_v39 }
  0x5c   : > { %491 = vst [vmem:[#allocation2 + $0xc0] sm:$0xff] %v450_v39  ;;  %495 = vst [vmem:[#allocation2 + $0xe0] sm:$0xff] %v450_v39 }
  0x5d   : > { %499 = vst [vmem:[#allocation2 + $0x100] sm:$0xff] %v450_v39  ;;  %503 = vst [vmem:[#allocation2 + $0x120] sm:$0xff] %v450_v39 }
  0x5e   : > { %507 = vst [vmem:[#allocation2 + $0x140] sm:$0xff] %v450_v39  ;;  %511 = vst [vmem:[#allocation2 + $0x160] sm:$0x1f] %v450_v39 }
  0x5f   : > { %468 = vst [vmem:[#allocation2 + $0x8] sm:$0xff] %v454_v40  ;;  %472 = vst [vmem:[#allocation2 + $0x28] sm:$0xff] %v454_v40 }
  0x60   : > { %476 = vst [vmem:[#allocation2 + $0x48] sm:$0xff] %v454_v40  ;;  %480 = vst [vmem:[#allocation2 + $0x68] sm:$0xff] %v454_v40 }
  0x61   : > { %484 = vst [vmem:[#allocation2 + $0x88] sm:$0xff] %v454_v40  ;;  %488 = vst [vmem:[#allocation2 + $0xa8] sm:$0x1f] %v454_v40 }
  0x62   : > { %492 = vst [vmem:[#allocation2 + $0xc8] sm:$0xff] %v454_v40  ;;  %496 = vst [vmem:[#allocation2 + $0xe8] sm:$0xff] %v454_v40 }
  0x63   : > { %500 = vst [vmem:[#allocation2 + $0x108] sm:$0xff] %v454_v40  ;;  %504 = vst [vmem:[#allocation2 + $0x128] sm:$0xff] %v454_v40 }
  0x64   : > { %508 = vst [vmem:[#allocation2 + $0x148] sm:$0xff] %v454_v40  ;;  %512 = vst [vmem:[#allocation2 + $0x168] sm:$0x1f] %v454_v40 }
  0x65   : > { %469 = vst [vmem:[#allocation2 + $0x10] sm:$0xff] %v458_v41  ;;  %473 = vst [vmem:[#allocation2 + $0x30] sm:$0xff] %v458_v41 }
  0x66   : > { %477 = vst [vmem:[#allocation2 + $0x50] sm:$0xff] %v458_v41  ;;  %481 = vst [vmem:[#allocation2 + $0x70] sm:$0xff] %v458_v41 }
  0x67   : > { %485 = vst [vmem:[#allocation2 + $0x90] sm:$0xff] %v458_v41  ;;  %489 = vst [vmem:[#allocation2 + $0xb0] sm:$0x1f] %v458_v41 }
  0x68   : > { %493 = vst [vmem:[#allocation2 + $0xd0] sm:$0xff] %v458_v41  ;;  %497 = vst [vmem:[#allocation2 + $0xf0] sm:$0xff] %v458_v41 }
  0x69   : > { %501 = vst [vmem:[#allocation2 + $0x110] sm:$0xff] %v458_v41  ;;  %505 = vst [vmem:[#allocation2 + $0x130] sm:$0xff] %v458_v41 }
  0x6a   : > { %509 = vst [vmem:[#allocation2 + $0x150] sm:$0xff] %v458_v41  ;;  %513 = vst [vmem:[#allocation2 + $0x170] sm:$0x1f] %v458_v41 }
  0x6b   : > { %470 = vst [vmem:[#allocation2 + $0x18] sm:$0xff] %v462_v42  ;;  %474 = vst [vmem:[#allocation2 + $0x38] sm:$0xff] %v462_v42 }
  0x6c   : > { %478 = vst [vmem:[#allocation2 + $0x58] sm:$0xff] %v462_v42  ;;  %482 = vst [vmem:[#allocation2 + $0x78] sm:$0xff] %v462_v42 }
  0x6d   : > { %486 = vst [vmem:[#allocation2 + $0x98] sm:$0xff] %v462_v42  ;;  %490 = vst [vmem:[#allocation2 + $0xb8] sm:$0x1f] %v462_v42 }
  0x6e   : > { %494 = vst [vmem:[#allocation2 + $0xd8] sm:$0xff] %v462_v42  ;;  %498 = vst [vmem:[#allocation2 + $0xf8] sm:$0xff] %v462_v42 }
  0x6f   : > { %502 = vst [vmem:[#allocation2 + $0x118] sm:$0xff] %v462_v42  ;;  %506 = vst [vmem:[#allocation2 + $0x138] sm:$0xff] %v462_v42 }
  0x70   : > { %510 = vst [vmem:[#allocation2 + $0x158] sm:$0xff] %v462_v42  ;;  %514 = vst [vmem:[#allocation2 + $0x178] sm:$0x1f] %v462_v42 }
  0x71 PF: > { %v5152_v43 = vld [vmem:[%s6077_s14 + $0x4] ss:$16 sps:$4 sm:$0xff]   ;;  %v5154_v44 = vld [vmem:[%s6077_s14 + $0xc] ss:$16 sps:$4 sm:$0xff]   ;;  %v5156_v45 = vld [vmem:[%s6077_s14] ss:$16 sps:$4 sm:$0xff]  }
  0x72   : > { %2147 = vmatprep.subr.bf16.mxu0 %v5152_v43  ;;  %v5157_v46 = vld [vmem:[%s6077_s14 + $0x8] ss:$16 sps:$4 sm:$0xff]   ;;  %2399 = vmatprep.subr.bf16.mxu1 %v5154_v44  ;;  %v5158_v47 = vld [vmem:[%s6077_s14 + $0x24] ss:$16 sps:$4 sm:$0xff]   ;;  %v5160_v48 = vld [vmem:[%s6077_s14 + $0x2c] ss:$16 sps:$4 sm:$0xff]  }
  0x73   : > { %2148 = vmatpush1.bf16.msra.mxu0 %v5156_v45  ;;  %2400 = vmatpush1.bf16.msra.mxu1 %v5157_v46  ;;  %v5162_v49 = vld [vmem:[%s6077_s14 + $0x20] ss:$16 sps:$4 sm:$0xff]   ;;  %v5163_v50 = vld [vmem:[%s6077_s14 + $0x28] ss:$16 sps:$4 sm:$0xff]   ;;  %v5164_v51 = vld [vmem:[%s6077_s14 + $0x44] ss:$16 sps:$4 sm:$0xff]  }
  0x74   : > { %2149 = vmatprep.subr.bf16.mxu0 %v5158_v47  ;;  %2401 = vmatprep.subr.bf16.mxu1 %v5160_v48  ;;  %v5166_v52 = vld [vmem:[%s6077_s14 + $0x4c] ss:$16 sps:$4 sm:$0xff]   ;;  %v5168_v53 = vld [vmem:[%s6077_s14 + $0x40] ss:$16 sps:$4 sm:$0xff]   ;;  %v5169_v54 = vld [vmem:[%s6077_s14 + $0x48] ss:$16 sps:$4 sm:$0xff]  }
  0x75   : > { %v5170_v55 = vld [vmem:[%s6077_s14 + $0x64] ss:$16 sps:$4 sm:$0xff]   ;;  %v5172_v56 = vld [vmem:[%s6077_s14 + $0x6c] ss:$16 sps:$4 sm:$0xff]   ;;  %v5174_v57 = vld [vmem:[%s6077_s14 + $0x60] ss:$16 sps:$4 sm:$0xff]  }
  0x76   : > { %v5175_v58 = vld [vmem:[%s6077_s14 + $0x68] ss:$16 sps:$4 sm:$0xff]   ;;  %v5176_v59 = vld [vmem:[%s6077_s14 + $0x84] ss:$16 sps:$4 sm:$0xff]   ;;  %v5178_v60 = vld [vmem:[%s6077_s14 + $0x8c] ss:$16 sps:$4 sm:$0xff]  }
  0x77   : > { %2150 = vmatpush1.bf16.msra.mxu0 %v5162_v49  ;;  %2402 = vmatpush1.bf16.msra.mxu1 %v5163_v50  ;;  %v5180_v61 = vld [vmem:[%s6077_s14 + $0x80] ss:$16 sps:$4 sm:$0xff]   ;;  %v5181_v62 = vld [vmem:[%s6077_s14 + $0x88] ss:$16 sps:$4 sm:$0xff]   ;;  %v5182_v63 = vld [vmem:[%s6077_s14 + $0xa4] ss:$16 sps:$4 sm:$0xff]  }
  0x78   : > { %2151 = vmatprep.subr.bf16.mxu0 %v5164_v51  ;;  %2403 = vmatprep.subr.bf16.mxu1 %v5166_v52  ;;  %v5184_v0 = vld [vmem:[%s6077_s14 + $0xac] ss:$16 sps:$4 sm:$0xff]   ;;  %v5186_v1 = vld [vmem:[%s6077_s14 + $0xa0] ss:$16 sps:$4 sm:$0xff]   ;;  %v5187_v2 = vld [vmem:[%s6077_s14 + $0xa8] ss:$16 sps:$4 sm:$0xff]  }
  0x79   : > { %v5188_v3 = vld [vmem:[%s6077_s14 + $0xc4] ss:$16 sps:$4 sm:$0xff]   ;;  %v5190_v4 = vld [vmem:[%s6077_s14 + $0xcc] ss:$16 sps:$4 sm:$0xff]   ;;  %v5192_v5 = vld [vmem:[%s6077_s14 + $0xc0] ss:$16 sps:$4 sm:$0xff]  }
  0x7a   : > { %v5193_v6 = vld [vmem:[%s6077_s14 + $0xc8] ss:$16 sps:$4 sm:$0xff]   ;;  %v5194_v7 = vld [vmem:[%s6077_s14 + $0xe4] ss:$16 sps:$4 sm:$0xff]   ;;  %v5196_v8 = vld [vmem:[%s6077_s14 + $0xec] ss:$16 sps:$4 sm:$0xff]  }
  0x7b   : > { %2152 = vmatpush1.bf16.msra.mxu0 %v5168_v53  ;;  %2404 = vmatpush1.bf16.msra.mxu1 %v5169_v54  ;;  %v5198_v9 = vld [vmem:[%s6077_s14 + $0xe0] ss:$16 sps:$4 sm:$0xff]   ;;  %v5199_v10 = vld [vmem:[%s6077_s14 + $0xe8] ss:$16 sps:$4 sm:$0xff]   ;;  %v5200_v11 = vld [vmem:[%s6077_s14 + $0x104] ss:$16 sps:$4 sm:$0xff]  }
  0x7c   : > { %2153 = vmatprep.subr.bf16.mxu0 %v5170_v55  ;;  %2405 = vmatprep.subr.bf16.mxu1 %v5172_v56  ;;  %v5202_v12 = vld [vmem:[%s6077_s14 + $0x10c] ss:$16 sps:$4 sm:$0xff]   ;;  %v5204_v13 = vld [vmem:[%s6077_s14 + $0x100] ss:$16 sps:$4 sm:$0xff]   ;;  %v5205_v14 = vld [vmem:[%s6077_s14 + $0x108] ss:$16 sps:$4 sm:$0xff]  }
  0x7d   : > { %v5206_v15 = vld [vmem:[%s6077_s14 + $0x124] ss:$16 sps:$4 sm:$0xff]   ;;  %v5208_v16 = vld [vmem:[%s6077_s14 + $0x12c] ss:$16 sps:$4 sm:$0xff]   ;;  %v5210_v17 = vld [vmem:[%s6077_s14 + $0x120] ss:$16 sps:$4 sm:$0xff]  }
  0x7e   : > { %v5211_v18 = vld [vmem:[%s6077_s14 + $0x128] ss:$16 sps:$4 sm:$0xff]   ;;  %v5212_v19 = vld [vmem:[%s6077_s14 + $0x144] ss:$16 sps:$4 sm:$0xff]   ;;  %v5214_v20 = vld [vmem:[%s6077_s14 + $0x14c] ss:$16 sps:$4 sm:$0xff]  }
  0x7f   : > { %2154 = vmatpush1.bf16.msra.mxu0 %v5174_v57  ;;  %2406 = vmatpush1.bf16.msra.mxu1 %v5175_v58  ;;  %v5216_v21 = vld [vmem:[%s6077_s14 + $0x140] ss:$16 sps:$4 sm:$0xff]   ;;  %v5217_v22 = vld [vmem:[%s6077_s14 + $0x148] ss:$16 sps:$4 sm:$0xff]   ;;  %v5218_v23 = vld [vmem:[%s6077_s14 + $0x164] ss:$16 sps:$4 sm:$0xff]  }
  0x80   : > { %2155 = vmatprep.subr.bf16.mxu0 %v5176_v59  ;;  %2407 = vmatprep.subr.bf16.mxu1 %v5178_v60  ;;  %v5220_v24 = vld [vmem:[%s6077_s14 + $0x16c] ss:$16 sps:$4 sm:$0xff]   ;;  %v5222_v27 = vld [vmem:[%s6077_s14 + $0x160] ss:$16 sps:$4 sm:$0xff]   ;;  %v5223_v28 = vld [vmem:[%s6077_s14 + $0x168] ss:$16 sps:$4 sm:$0xff]  }
  0x81   : > { %v772_v25 = vld [vmem:[%s6079_s15 + $0x8] sm:$0xff]  ;;  %v5224_v30 = vld [vmem:[%s6077_s14 + $0x184] ss:$16 sps:$4 sm:$0xff]   ;;  %v5228_v32 = vld [vmem:[%s6077_s14 + $0x180] ss:$16 sps:$4 sm:$0xff]   ;;  %p4795_p10 = scmp.ne.s32.totalorder %s5853_s21, 2 }
  0x82   : > { %v780_v26 = vld [vmem:[%s6079_s15 + $0x48] sm:$0xff]  ;;  %v5230_v34 = vld [vmem:[%s6077_s14 + $0x1a4] ss:$16 sps:$4 sm:$0xff]   ;;  %v5234_v36 = vld [vmem:[%s6077_s14 + $0x1a0] ss:$16 sps:$4 sm:$0xff]  }
  0x83   : > { %2156 = vmatpush1.bf16.msra.mxu0 %v5180_v61  ;;  %2408 = vmatpush1.bf16.msra.mxu1 %v5181_v62  ;;  %v820_v29 = vpack.c.bf16 %v780_v26, %v772_v25  ;;  %v5226_v31 = vld [vmem:[%s6077_s14 + $0x18c] ss:$16 sps:$4 sm:$0xff]   ;;  %v5229_v33 = vld [vmem:[%s6077_s14 + $0x188] ss:$16 sps:$4 sm:$0xff]   ;;  %v5236_v38 = vld [vmem:[%s6077_s14 + $0x1c4] ss:$16 sps:$4 sm:$0xff]  }
  0x84   : > { %2157 = vmatprep.subr.bf16.mxu0 %v5182_v63  ;;  %2409 = vmatprep.subr.bf16.mxu1 %v5184_v0  ;;  %v5232_v35 = vld [vmem:[%s6077_s14 + $0x1ac] ss:$16 sps:$4 sm:$0xff]   ;;  %v5235_v37 = vld [vmem:[%s6077_s14 + $0x1a8] ss:$16 sps:$4 sm:$0xff]   ;;  %v5240_v40 = vld [vmem:[%s6077_s14 + $0x1c0] ss:$16 sps:$4 sm:$0xff]  }
  0x85   : > { %2179 = vmatprep.mubr.bf16.mxu0 %v820_v29  ;;  %2431 = vmatprep.mubr.bf16.mxu1 %v820_v29  ;;  %v5238_v39 = vld [vmem:[%s6077_s14 + $0x1cc] ss:$16 sps:$4 sm:$0xff]   ;;  %v5241_v41 = vld [vmem:[%s6077_s14 + $0x1c8] ss:$16 sps:$4 sm:$0xff]   ;;  %v5242_v42 = vld [vmem:[%s6077_s14 + $0x1e4] ss:$16 sps:$4 sm:$0xff]  }
  0x86   : > { %v5244_v43 = vld [vmem:[%s6077_s14 + $0x1ec] ss:$16 sps:$4 sm:$0xff]   ;;  %v5246_v44 = vld [vmem:[%s6077_s14 + $0x1e0] ss:$16 sps:$4 sm:$0xff]   ;;  %v5247_v45 = vld [vmem:[%s6077_s14 + $0x1e8] ss:$16 sps:$4 sm:$0xff]  }
  0x87   : > { %2158 = vmatpush1.bf16.msra.mxu0 %v5186_v1  ;;  %2410 = vmatpush1.bf16.msra.mxu1 %v5187_v2  ;;  %v5250_v46 = vld [vmem:[%s6077_s14 + $0x204] ss:$16 sps:$4 sm:$0xff]   ;;  %v5253_v49 = vld [vmem:[%s6077_s14 + $0x20c] ss:$16 sps:$4 sm:$0xff]   ;;  %v5248_v50 = vld [vmem:[%s6077_s14 + $0x200] ss:$16 sps:$4 sm:$0xff]  }
  0x88   : > { %2159 = vmatprep.subr.bf16.mxu0 %v5188_v3  ;;  %2411 = vmatprep.subr.bf16.mxu1 %v5190_v4  ;;  %v771_v47 = vld [vmem:[%s6079_s15] sm:$0xff]  ;;  %v5251_v51 = vld [vmem:[%s6077_s14 + $0x208] ss:$16 sps:$4 sm:$0xff]   ;;  %v5259_v54 = vld [vmem:[%s6077_s14 + $0x22c] ss:$16 sps:$4 sm:$0xff]  }
  0x89   : > { %v779_v48 = vld [vmem:[%s6079_s15 + $0x40] sm:$0xff]  ;;  %v5257_v56 = vld [vmem:[%s6077_s14 + $0x228] ss:$16 sps:$4 sm:$0xff]   ;;  %v5265_v58 = vld [vmem:[%s6077_s14 + $0x24c] ss:$16 sps:$4 sm:$0xff]  }
  0x8a   : > { %v819_v52 = vpack.c.bf16 %v779_v48, %v771_v47  ;;  %v5256_v53 = vld [vmem:[%s6077_s14 + $0x224] ss:$16 sps:$4 sm:$0xff]   ;;  %v5254_v55 = vld [vmem:[%s6077_s14 + $0x220] ss:$16 sps:$4 sm:$0xff]   ;;  %v5263_v60 = vld [vmem:[%s6077_s14 + $0x248] ss:$16 sps:$4 sm:$0xff]  }
  0x8b   : > { %2160 = vmatpush1.bf16.msra.mxu0 %v5192_v5  ;;  %2412 = vmatpush1.bf16.msra.mxu1 %v5193_v6  ;;  %v5262_v57 = vld [vmem:[%s6077_s14 + $0x244] ss:$16 sps:$4 sm:$0xff]   ;;  %v5260_v59 = vld [vmem:[%s6077_s14 + $0x240] ss:$16 sps:$4 sm:$0xff]   ;;  %v5271_v62 = vld [vmem:[%s6077_s14 + $0x26c] ss:$16 sps:$4 sm:$0xff]  }
  0x8c   : > { %2161 = vmatprep.subr.bf16.mxu0 %v5194_v7  ;;  %2413 = vmatprep.subr.bf16.mxu1 %v5196_v8  ;;  %v5268_v61 = vld [vmem:[%s6077_s14 + $0x264] ss:$16 sps:$4 sm:$0xff]   ;;  %v5266_v63 = vld [vmem:[%s6077_s14 + $0x260] ss:$16 sps:$4 sm:$0xff]   ;;  %v5269_v0 = vld [vmem:[%s6077_s14 + $0x268] ss:$16 sps:$4 sm:$0xff]  }
  0x8d   : > { %v788_v1 = vld [vmem:[%s6079_s15 + $0x88] sm:$0xff]  ;;  %v5274_v3 = vld [vmem:[%s6077_s14 + $0x284] ss:$16 sps:$4 sm:$0xff]   ;;  %v5272_v6 = vld [vmem:[%s6077_s14 + $0x280] ss:$16 sps:$4 sm:$0xff]  }
  0x8e   : > { %v796_v2 = vld [vmem:[%s6079_s15 + $0xc8] sm:$0xff]  ;;  %v787_v8 = vld [vmem:[%s6079_s15 + $0x80] sm:$0xff] }
  0x8f   : > { %2162 = vmatpush1.bf16.msra.mxu0 %v5198_v9  ;;  %2414 = vmatpush1.bf16.msra.mxu1 %v5199_v10  ;;  %v5277_v4 = vld [vmem:[%s6077_s14 + $0x28c] ss:$16 sps:$4 sm:$0xff]   ;;  %v828_v5 = vpack.c.bf16 %v796_v2, %v788_v1  ;;  %v5275_v7 = vld [vmem:[%s6077_s14 + $0x288] ss:$16 sps:$4 sm:$0xff]   ;;  %v795_v9 = vld [vmem:[%s6079_s15 + $0xc0] sm:$0xff] }
  0x90   : > { %2163 = vmatprep.subr.bf16.mxu0 %v5200_v11  ;;  %2415 = vmatprep.subr.bf16.mxu1 %v5202_v12  ;;  %v5280_v10 = vld [vmem:[%s6077_s14 + $0x2a4] ss:$16 sps:$4 sm:$0xff]   ;;  %v827_v11 = vpack.c.bf16 %v795_v9, %v787_v8  ;;  %v5283_v12 = vld [vmem:[%s6077_s14 + $0x2ac] ss:$16 sps:$4 sm:$0xff]   ;;  %v5317_v47 = vld [vmem:[%s6077_s14 + $0x368] ss:$16 sps:$4 sm:$0xff]  }
  0x91   : > { %v5292_v25 = vld [vmem:[%s6077_s14 + $0x2e4] ss:$16 sps:$4 sm:$0xff]   ;;  %v5295_v26 = vld [vmem:[%s6077_s14 + $0x2ec] ss:$16 sps:$4 sm:$0xff]   ;;  %v5347_v8 = vld [vmem:[%s6077_s14 + $0x408] ss:$16 sps:$4 sm:$0xff]  }
  0x92   : > { %v5322_v48 = vld [vmem:[%s6077_s14 + $0x384] ss:$16 sps:$4 sm:$0xff]  }
  0x93   : > { %2164 = vmatpush1.bf16.msra.mxu0 %v5204_v13  ;;  %2416 = vmatpush1.bf16.msra.mxu1 %v5205_v14  ;;  %v804_v13 = vld [vmem:[%s6079_s15 + $0x108] sm:$0xff]  ;;  %v781_v1 = vld [vmem:[%s6079_s15 + $0x50] sm:$0xff] }
  0x94   : > { %2165 = vmatprep.subr.bf16.mxu0 %v5206_v15  ;;  %2417 = vmatprep.subr.bf16.mxu1 %v5208_v16  ;;  %v812_v14 = vld [vmem:[%s6079_s15 + $0x148] sm:$0x1f]  ;;  %v5278_v15 = vld [vmem:[%s6077_s14 + $0x2a0] ss:$16 sps:$4 sm:$0xff]   ;;  %v5346_v2 = vld [vmem:[%s6077_s14 + $0x404] ss:$16 sps:$4 sm:$0xff]  }
  0x95   : > { %v5281_v16 = vld [vmem:[%s6077_s14 + $0x2a8] ss:$16 sps:$4 sm:$0xff]   ;;  %v5352_v9 = vld [vmem:[%s6077_s14 + $0x424] ss:$16 sps:$4 sm:$0xff]  }
  0x97   : > { %2166 = vmatpush1.bf16.msra.mxu0 %v5210_v17  ;;  %2418 = vmatpush1.bf16.msra.mxu1 %v5211_v18  ;;  %v836_v17 = vpack.c.bf16 %v812_v14, %v804_v13  ;;  %v5286_v18 = vld [vmem:[%s6077_s14 + $0x2c4] ss:$16 sps:$4 sm:$0xff]   ;;  %v5353_v13 = vld [vmem:[%s6077_s14 + $0x428] ss:$16 sps:$4 sm:$0xff]  }
  0x98   : > { %2167 = vmatprep.subr.bf16.mxu0 %v5212_v19  ;;  %2419 = vmatprep.subr.bf16.mxu1 %v5214_v20  ;;  %v5289_v19 = vld [vmem:[%s6077_s14 + $0x2cc] ss:$16 sps:$4 sm:$0xff]   ;;  %v803_v20 = vld [vmem:[%s6079_s15 + $0x100] sm:$0xff] }
  0x99   : > { %v5358_v14 = vld [vmem:[%s6077_s14 + $0x444] ss:$16 sps:$4 sm:$0xff]  }
  0x9b   : > { %2168 = vmatpush1.bf16.msra.mxu0 %v5216_v21  ;;  %2420 = vmatpush1.bf16.msra.mxu1 %v5217_v22  ;;  %v811_v21 = vld [vmem:[%s6079_s15 + $0x140] sm:$0x1f] }
  0x9c   : > { %2169 = vmatprep.subr.bf16.mxu0 %v5218_v23  ;;  %2421 = vmatprep.subr.bf16.mxu1 %v5220_v24  ;;  %v5284_v22 = vld [vmem:[%s6077_s14 + $0x2c0] ss:$16 sps:$4 sm:$0xff]   ;;  %v5287_v23 = vld [vmem:[%s6077_s14 + $0x2c8] ss:$16 sps:$4 sm:$0xff]   ;;  %v835_v24 = vpack.c.bf16 %v811_v21, %v803_v20 }
  0x9d   : > { %v814_v20 = vld [vmem:[%s6079_s15 + $0x158] sm:$0x1f]  ;;  %v5356_v21 = vld [vmem:[%s6077_s14 + $0x440] ss:$16 sps:$4 sm:$0xff]  }
  0x9f   : > { %2170 = vmatpush1.bf16.msra.mxu0 %v5222_v27  ;;  %2422 = vmatpush1.bf16.msra.mxu1 %v5223_v28  ;;  %v774_v27 = vld [vmem:[%s6079_s15 + $0x18] sm:$0xff] }
  0xa0   : > { %2171 = vmatprep.subr.bf16.mxu0 %v5224_v30  ;;  %2423 = vmatprep.subr.bf16.mxu1 %v5226_v31  ;;  %v782_v28 = vld [vmem:[%s6079_s15 + $0x58] sm:$0xff]  ;;  %v5290_v30 = vld [vmem:[%s6077_s14 + $0x2e0] ss:$16 sps:$4 sm:$0xff]  }
  0xa1   : > { %v822_v29 = vpack.c.bf16 %v782_v28, %v774_v27  ;;  %v5293_v31 = vld [vmem:[%s6077_s14 + $0x2e8] ss:$16 sps:$4 sm:$0xff]   ;;  %v5370_v28 = vld [vmem:[%s6077_s14 + $0x484] ss:$16 sps:$4 sm:$0xff]  }
  0xa2   : > { %v5365_v27 = vld [vmem:[%s6077_s14 + $0x468] ss:$16 sps:$4 sm:$0xff]  }
  0xa3   : > { %2172 = vmatpush1.bf16.msra.mxu0 %v5228_v32  ;;  %2424 = vmatpush1.bf16.msra.mxu1 %v5229_v33  ;;  %v5298_v32 = vld [vmem:[%s6077_s14 + $0x304] ss:$16 sps:$4 sm:$0xff]   ;;  %v5301_v33 = vld [vmem:[%s6077_s14 + $0x30c] ss:$16 sps:$4 sm:$0xff]  }
  0xa4   : > { %2173 = vmatprep.subr.bf16.mxu0 %v5230_v34  ;;  %2425 = vmatprep.subr.bf16.mxu1 %v5232_v35  ;;  %v5296_v34 = vld [vmem:[%s6077_s14 + $0x300] ss:$16 sps:$4 sm:$0xff]   ;;  %v5299_v35 = vld [vmem:[%s6077_s14 + $0x308] ss:$16 sps:$4 sm:$0xff]  }
  0xa7   : > { %2174 = vmatpush1.bf16.msra.mxu0 %v5234_v36  ;;  %2426 = vmatpush1.bf16.msra.mxu1 %v5235_v37  ;;  %v5304_v36 = vld [vmem:[%s6077_s14 + $0x324] ss:$16 sps:$4 sm:$0xff]   ;;  %v5307_v37 = vld [vmem:[%s6077_s14 + $0x32c] ss:$16 sps:$4 sm:$0xff]  }
  0xa8   : > { %2175 = vmatprep.subr.bf16.mxu0 %v5236_v38  ;;  %2427 = vmatprep.subr.bf16.mxu1 %v5238_v39  ;;  %v5302_v38 = vld [vmem:[%s6077_s14 + $0x320] ss:$16 sps:$4 sm:$0xff]   ;;  %v5305_v39 = vld [vmem:[%s6077_s14 + $0x328] ss:$16 sps:$4 sm:$0xff]  }
  0xab   : > { %2176 = vmatpush1.bf16.msra.mxu0 %v5240_v40  ;;  %2428 = vmatpush1.bf16.msra.mxu1 %v5241_v41  ;;  %v5310_v40 = vld [vmem:[%s6077_s14 + $0x344] ss:$16 sps:$4 sm:$0xff]   ;;  %v5313_v41 = vld [vmem:[%s6077_s14 + $0x34c] ss:$16 sps:$4 sm:$0xff]  }
  0xac   : > { %2177 = vmatprep.subr.bf16.mxu0 %v5242_v42  ;;  %2429 = vmatprep.subr.bf16.mxu1 %v5244_v43  ;;  %v5308_v42 = vld [vmem:[%s6077_s14 + $0x340] ss:$16 sps:$4 sm:$0xff]   ;;  %v5311_v43 = vld [vmem:[%s6077_s14 + $0x348] ss:$16 sps:$4 sm:$0xff]  }
  0xaf   : > { %2178 = vmatpush1.bf16.msra.mxu0 %v5246_v44  ;;  %2430 = vmatpush1.bf16.msra.mxu1 %v5247_v45  ;;  %v5316_v44 = vld [vmem:[%s6077_s14 + $0x364] ss:$16 sps:$4 sm:$0xff]   ;;  %v5319_v45 = vld [vmem:[%s6077_s14 + $0x36c] ss:$16 sps:$4 sm:$0xff]  }
  0xb0   : > { %2210 = vmatprep.subr.bf16.mxu0 %v5250_v46  ;;  %2462 = vmatprep.subr.bf16.mxu1 %v5253_v49  ;;  %v5314_v46 = vld [vmem:[%s6077_s14 + $0x360] ss:$16 sps:$4 sm:$0xff]   ;;  %v5325_v49 = vld [vmem:[%s6077_s14 + $0x38c] ss:$16 sps:$4 sm:$0xff]  }
  0xb2   : > { %2180 = vmatmul.mubr.bf16.vlgmr.msra.gmra.mrb[0].mxu0 %v819_v52  ;;  %2432 = vmatmul.mubr.bf16.vlgmr.msra.gmra.mrb[0].mxu1 %v819_v52  ;;  %v5328_v52 = vld [vmem:[%s6077_s14 + $0x3a4] ss:$16 sps:$4 sm:$0xff]  }
  0xb3   : > { %2211 = vmatpush1.bf16.msra.mxu0 %v5248_v50  ;;  %2463 = vmatpush1.bf16.msra.mxu1 %v5251_v51  ;;  %v5320_v50 = vld [vmem:[%s6077_s14 + $0x380] ss:$16 sps:$4 sm:$0xff]   ;;  %v5323_v51 = vld [vmem:[%s6077_s14 + $0x388] ss:$16 sps:$4 sm:$0xff]  }
  0xb4   : > { %2212 = vmatprep.subr.bf16.mxu0 %v5256_v53  ;;  %2464 = vmatprep.subr.bf16.mxu1 %v5259_v54  ;;  %v5331_v53 = vld [vmem:[%s6077_s14 + $0x3ac] ss:$16 sps:$4 sm:$0xff]   ;;  %v5326_v54 = vld [vmem:[%s6077_s14 + $0x3a0] ss:$16 sps:$4 sm:$0xff]  }
  0xb5   : > { %2189 = vmatprep.mubr.bf16.mxu0 %v828_v5  ;;  %2441 = vmatprep.mubr.bf16.mxu1 %v828_v5 }
  0xb7   : > { %2213 = vmatpush1.bf16.msra.mxu0 %v5254_v55  ;;  %2465 = vmatpush1.bf16.msra.mxu1 %v5257_v56  ;;  %v5329_v55 = vld [vmem:[%s6077_s14 + $0x3a8] ss:$16 sps:$4 sm:$0xff]   ;;  %v5334_v56 = vld [vmem:[%s6077_s14 + $0x3c4] ss:$16 sps:$4 sm:$0xff]  }
  0xb8   : > { %2214 = vmatprep.subr.bf16.mxu0 %v5262_v57  ;;  %2466 = vmatprep.subr.bf16.mxu1 %v5265_v58  ;;  %v5337_v57 = vld [vmem:[%s6077_s14 + $0x3cc] ss:$16 sps:$4 sm:$0xff]   ;;  %v5332_v58 = vld [vmem:[%s6077_s14 + $0x3c0] ss:$16 sps:$4 sm:$0xff]  }
  0xba   : > { %2190 = vmatmul.mubr.bf16.gmra.mrb[4].mxu0 %v827_v11  ;;  %2442 = vmatmul.mubr.bf16.gmra.mrb[4].mxu1 %v827_v11  ;;  %v5350_v11 = vld [vmem:[%s6077_s14 + $0x420] ss:$16 sps:$4 sm:$0xff]  }
  0xbb   : > { %2215 = vmatpush1.bf16.msra.mxu0 %v5260_v59  ;;  %2467 = vmatpush1.bf16.msra.mxu1 %v5263_v60  ;;  %v5335_v59 = vld [vmem:[%s6077_s14 + $0x3c8] ss:$16 sps:$4 sm:$0xff]   ;;  %v5340_v60 = vld [vmem:[%s6077_s14 + $0x3e4] ss:$16 sps:$4 sm:$0xff]  }
  0xbc   : > { %2216 = vmatprep.subr.bf16.mxu0 %v5268_v61  ;;  %2468 = vmatprep.subr.bf16.mxu1 %v5271_v62  ;;  %v5343_v61 = vld [vmem:[%s6077_s14 + $0x3ec] ss:$16 sps:$4 sm:$0xff]   ;;  %v5338_v62 = vld [vmem:[%s6077_s14 + $0x3e0] ss:$16 sps:$4 sm:$0xff]  }
  0xbd   : > { %2199 = vmatprep.mubr.bf16.mxu0 %v836_v17  ;;  %2451 = vmatprep.mubr.bf16.mxu1 %v836_v17  ;;  %v5361_v17 = vld [vmem:[%s6077_s14 + $0x44c] ss:$16 sps:$4 sm:$0xff]  }
  0xbf   : > { %2217 = vmatpush1.bf16.msra.mxu0 %v5266_v63  ;;  %2469 = vmatpush1.bf16.msra.mxu1 %v5269_v0  ;;  %v5341_v63 = vld [vmem:[%s6077_s14 + $0x3e8] ss:$16 sps:$4 sm:$0xff]   ;;  %v773_v0 = vld [vmem:[%s6079_s15 + $0x10] sm:$0xff] }
  0xc0   : > { %2218 = vmatprep.subr.bf16.mxu0 %v5274_v3  ;;  %2470 = vmatprep.subr.bf16.mxu1 %v5277_v4  ;;  %v5349_v3 = vld [vmem:[%s6077_s14 + $0x40c] ss:$16 sps:$4 sm:$0xff]   ;;  %v5344_v4 = vld [vmem:[%s6077_s14 + $0x400] ss:$16 sps:$4 sm:$0xff]   ;;  %v821_v5 = vpack.c.bf16 %v781_v1, %v773_v0  ;;  %v6324_v1 = vld [vmem:[%s6077_s14 + $0x568] ss:$16 sps:$4 sm:$0xff]  }
  0xc1   : > { %v6321_v0 = vld [vmem:[%s6077_s14 + $0x560] ss:$16 sps:$4 sm:$0xff]  }
  0xc2   : > { %2200 = vmatmul.mubr.bf16.gmra.mrb[8].mxu0 %v835_v24  ;;  %2452 = vmatmul.mubr.bf16.gmra.mrb[8].mxu1 %v835_v24  ;;  %v5367_v24 = vld [vmem:[%s6077_s14 + $0x46c] ss:$16 sps:$4 sm:$0xff]  }
  0xc3   : > { %2219 = vmatpush1.bf16.msra.mxu0 %v5272_v6  ;;  %2471 = vmatpush1.bf16.msra.mxu1 %v5275_v7  ;;  %v790_v6 = vld [vmem:[%s6079_s15 + $0x98] sm:$0xff] }
  0xc4   : > { %2220 = vmatprep.subr.bf16.mxu0 %v5280_v10  ;;  %2472 = vmatprep.subr.bf16.mxu1 %v5283_v12  ;;  %v798_v7 = vld [vmem:[%s6079_s15 + $0xd8] sm:$0xff] }
  0xc5   : > { %2242 = vmatprep.mubr.bf16.mxu0 %v822_v29  ;;  %2494 = vmatprep.mubr.bf16.mxu1 %v822_v29  ;;  %v5355_v10 = vld [vmem:[%s6077_s14 + $0x42c] ss:$16 sps:$4 sm:$0xff]   ;;  %v830_v12 = vpack.c.bf16 %v798_v7, %v790_v6  ;;  %v805_v29 = vld [vmem:[%s6079_s15 + $0x110] sm:$0xff] }
  0xc6   : > { %v6345_v6 = vld [vmem:[%s6077_s14 + $0x5a4] ss:$16 sps:$4 sm:$0xff]   ;;  %v6350_v7 = vld [vmem:[%s6077_s14 + $0x5ac] ss:$16 sps:$4 sm:$0xff]  }
  0xc7   : > { %2221 = vmatpush1.bf16.msra.mxu0 %v5278_v15  ;;  %2473 = vmatpush1.bf16.msra.mxu1 %v5281_v16  ;;  %v789_v15 = vld [vmem:[%s6079_s15 + $0x90] sm:$0xff] }
  0xc8   : > { %2222 = vmatprep.subr.bf16.mxu0 %v5286_v18  ;;  %2474 = vmatprep.subr.bf16.mxu1 %v5289_v19  ;;  %v797_v16 = vld [vmem:[%s6079_s15 + $0xd0] sm:$0xff]  ;;  %v806_v19 = vld [vmem:[%s6079_s15 + $0x118] sm:$0xff] }
  0xc9   : > { %v829_v18 = vpack.c.bf16 %v797_v16, %v789_v15  ;;  %v6382_v15 = vld [vmem:[%s6077_s14 + $0x5ec] ss:$16 sps:$4 sm:$0xff]   ;;  %v6385_v16 = vld [vmem:[%s6077_s14 + $0x5e0] ss:$16 sps:$4 sm:$0xff]  }
  0xcb   : > { %2223 = vmatpush1.bf16.msra.mxu0 %v5284_v22  ;;  %2475 = vmatpush1.bf16.msra.mxu1 %v5287_v23  ;;  %v5359_v22 = vld [vmem:[%s6077_s14 + $0x448] ss:$16 sps:$4 sm:$0xff]   ;;  %v5364_v23 = vld [vmem:[%s6077_s14 + $0x464] ss:$16 sps:$4 sm:$0xff]  }
  0xcc   : > { %2224 = vmatprep.subr.bf16.mxu0 %v5292_v25  ;;  %2476 = vmatprep.subr.bf16.mxu1 %v5295_v26  ;;  %v5362_v25 = vld [vmem:[%s6077_s14 + $0x460] ss:$16 sps:$4 sm:$0xff]   ;;  %v838_v26 = vpack.c.bf16 %v814_v20, %v806_v19  ;;  %v6397_v20 = vld [vmem:[%s6077_s14 + $0x604] ss:$16 sps:$4 sm:$0xff]  }
  0xcd   : > { %v783_v19 = vld [vmem:[%s6079_s15 + $0x60] sm:$0xff] }
  0xcf   : > { %2225 = vmatpush1.bf16.msra.mxu0 %v5290_v30  ;;  %2477 = vmatpush1.bf16.msra.mxu1 %v5293_v31  ;;  %v813_v30 = vld [vmem:[%s6079_s15 + $0x150] sm:$0x1f]  ;;  %v5373_v31 = vld [vmem:[%s6077_s14 + $0x48c] ss:$16 sps:$4 sm:$0xff]  }
  0xd0   : > { %2226 = vmatprep.subr.bf16.mxu0 %v5298_v32  ;;  %2478 = vmatprep.subr.bf16.mxu1 %v5301_v33  ;;  %v5368_v32 = vld [vmem:[%s6077_s14 + $0x480] ss:$16 sps:$4 sm:$0xff]   ;;  %v5371_v33 = vld [vmem:[%s6077_s14 + $0x488] ss:$16 sps:$4 sm:$0xff]  }
  0xd3   : > { %2227 = vmatpush1.bf16.msra.mxu0 %v5296_v34  ;;  %2479 = vmatpush1.bf16.msra.mxu1 %v5299_v35  ;;  %v837_v34 = vpack.c.bf16 %v813_v30, %v805_v29  ;;  %v776_v35 = vld [vmem:[%s6079_s15 + $0x28] sm:$0xff]  ;;  %v6421_v30 = vld [vmem:[%s6077_s14 + $0x620] ss:$16 sps:$4 sm:$0xff]  }
  0xd4   : > { %2228 = vmatprep.subr.bf16.mxu0 %v5304_v36  ;;  %2480 = vmatprep.subr.bf16.mxu1 %v5307_v37  ;;  %v784_v36 = vld [vmem:[%s6079_s15 + $0x68] sm:$0xff]  ;;  %v5376_v37 = vld [vmem:[%s6077_s14 + $0x4a4] ss:$16 sps:$4 sm:$0xff]  }
  0xd7   : > { %2229 = vmatpush1.bf16.msra.mxu0 %v5302_v38  ;;  %2481 = vmatpush1.bf16.msra.mxu1 %v5305_v39  ;;  %v5379_v38 = vld [vmem:[%s6077_s14 + $0x4ac] ss:$16 sps:$4 sm:$0xff]   ;;  %v824_v39 = vpack.c.bf16 %v784_v36, %v776_v35 }
  0xd8   : > { %2230 = vmatprep.subr.bf16.mxu0 %v5310_v40  ;;  %2482 = vmatprep.subr.bf16.mxu1 %v5313_v41  ;;  %v5374_v40 = vld [vmem:[%s6077_s14 + $0x4a0] ss:$16 sps:$4 sm:$0xff]   ;;  %v5377_v41 = vld [vmem:[%s6077_s14 + $0x4a8] ss:$16 sps:$4 sm:$0xff]   ;;  %v6436_v35 = vld [vmem:[%s6077_s14 + $0x64c] ss:$16 sps:$4 sm:$0xff]  }
  0xdb   : > { %2231 = vmatpush1.bf16.msra.mxu0 %v5308_v42  ;;  %2483 = vmatpush1.bf16.msra.mxu1 %v5311_v43  ;;  %v5382_v42 = vld [vmem:[%s6077_s14 + $0x4c4] ss:$16 sps:$4 sm:$0xff]   ;;  %v5385_v43 = vld [vmem:[%s6077_s14 + $0x4cc] ss:$16 sps:$4 sm:$0xff]  }
  0xdc   : > { %2232 = vmatprep.subr.bf16.mxu0 %v5316_v44  ;;  %2484 = vmatprep.subr.bf16.mxu1 %v5319_v45  ;;  %v5380_v44 = vld [vmem:[%s6077_s14 + $0x4c0] ss:$16 sps:$4 sm:$0xff]   ;;  %v5383_v45 = vld [vmem:[%s6077_s14 + $0x4c8] ss:$16 sps:$4 sm:$0xff]  }
  0xdf   : > { %2233 = vmatpush1.bf16.msra.mxu0 %v5314_v46  ;;  %2485 = vmatpush1.bf16.msra.mxu1 %v5317_v47  ;;  %v5388_v46 = vld [vmem:[%s6077_s14 + $0x4e4] ss:$16 sps:$4 sm:$0xff]   ;;  %v5391_v47 = vld [vmem:[%s6077_s14 + $0x4ec] ss:$16 sps:$4 sm:$0xff]  }
  0xe0   : > { %2234 = vmatprep.subr.bf16.mxu0 %v5322_v48  ;;  %2486 = vmatprep.subr.bf16.mxu1 %v5325_v49  ;;  %v5386_v48 = vld [vmem:[%s6077_s14 + $0x4e0] ss:$16 sps:$4 sm:$0xff]   ;;  %v5389_v49 = vld [vmem:[%s6077_s14 + $0x4e8] ss:$16 sps:$4 sm:$0xff]  }
  0xe3   : > { %2235 = vmatpush1.bf16.msra.mxu0 %v5320_v50  ;;  %2487 = vmatpush1.bf16.msra.mxu1 %v5323_v51  ;;  %v5394_v50 = vld [vmem:[%s6077_s14 + $0x504] ss:$16 sps:$4 sm:$0xff]   ;;  %v6273_v51 = vld [vmem:[%s6077_s14 + $0x50c] ss:$16 sps:$4 sm:$0xff]  }
  0xe4   : > { %2236 = vmatprep.subr.bf16.mxu0 %v5328_v52  ;;  %2488 = vmatprep.subr.bf16.mxu1 %v5331_v53  ;;  %v6276_v52 = vld [vmem:[%s6077_s14 + $0x500] ss:$16 sps:$4 sm:$0xff]   ;;  %v6279_v53 = vld [vmem:[%s6077_s14 + $0x508] ss:$16 sps:$4 sm:$0xff]  }
  0xe7   : > { %2237 = vmatpush1.bf16.msra.mxu0 %v5326_v54  ;;  %2489 = vmatpush1.bf16.msra.mxu1 %v5329_v55  ;;  %v6282_v54 = vld [vmem:[%s6077_s14 + $0x524] ss:$16 sps:$4 sm:$0xff]   ;;  %v6286_v55 = vld [vmem:[%s6077_s14 + $0x52c] ss:$16 sps:$4 sm:$0xff]  }
  0xe8   : > { %2238 = vmatprep.subr.bf16.mxu0 %v5334_v56  ;;  %2490 = vmatprep.subr.bf16.mxu1 %v5337_v57  ;;  %v6289_v56 = vld [vmem:[%s6077_s14 + $0x520] ss:$16 sps:$4 sm:$0xff]   ;;  %v6292_v57 = vld [vmem:[%s6077_s14 + $0x528] ss:$16 sps:$4 sm:$0xff]  }
  0xeb   : > { %2239 = vmatpush1.bf16.msra.mxu0 %v5332_v58  ;;  %2491 = vmatpush1.bf16.msra.mxu1 %v5335_v59  ;;  %v6297_v58 = vld [vmem:[%s6077_s14 + $0x544] ss:$16 sps:$4 sm:$0xff]   ;;  %v6302_v59 = vld [vmem:[%s6077_s14 + $0x54c] ss:$16 sps:$4 sm:$0xff]  }
  0xec   : > { %2240 = vmatprep.subr.bf16.mxu0 %v5340_v60  ;;  %2492 = vmatprep.subr.bf16.mxu1 %v5343_v61  ;;  %v6305_v60 = vld [vmem:[%s6077_s14 + $0x540] ss:$16 sps:$4 sm:$0xff]   ;;  %v6310_v61 = vld [vmem:[%s6077_s14 + $0x548] ss:$16 sps:$4 sm:$0xff]  }
  0xef   : > { %2241 = vmatpush1.bf16.msra.mxu0 %v5338_v62  ;;  %2493 = vmatpush1.bf16.msra.mxu1 %v5341_v63  ;;  %v6315_v62 = vld [vmem:[%s6077_s14 + $0x564] ss:$16 sps:$4 sm:$0xff]   ;;  %v6318_v63 = vld [vmem:[%s6077_s14 + $0x56c] ss:$16 sps:$4 sm:$0xff]  }
  0xf0   : > { %2273 = vmatprep.subr.bf16.mxu0 %v5346_v2  ;;  %2525 = vmatprep.subr.bf16.mxu1 %v5349_v3  ;;  %v6329_v2 = vld [vmem:[%s6077_s14 + $0x584] ss:$16 sps:$4 sm:$0xff]   ;;  %v6334_v3 = vld [vmem:[%s6077_s14 + $0x58c] ss:$16 sps:$4 sm:$0xff]  }
  0xf2   : > { %2243 = vmatmul.mubr.bf16.vlgmr.msra.gmra.mrb[0].mxu0 %v821_v5  ;;  %2495 = vmatmul.mubr.bf16.vlgmr.msra.gmra.mrb[0].mxu1 %v821_v5  ;;  %v6342_v5 = vld [vmem:[%s6077_s14 + $0x588] ss:$16 sps:$4 sm:$0xff]  }
  0xf3   : > { %2274 = vmatpush1.bf16.msra.mxu0 %v5344_v4  ;;  %2526 = vmatpush1.bf16.msra.mxu1 %v5347_v8  ;;  %v6339_v4 = vld [vmem:[%s6077_s14 + $0x580] ss:$16 sps:$4 sm:$0xff]  }
  0xf4   : > { %2275 = vmatprep.subr.bf16.mxu0 %v5352_v9  ;;  %2527 = vmatprep.subr.bf16.mxu1 %v5355_v10  ;;  %v6353_v8 = vld [vmem:[%s6077_s14 + $0x5a0] ss:$16 sps:$4 sm:$0xff]   ;;  %v6356_v9 = vld [vmem:[%s6077_s14 + $0x5a8] ss:$16 sps:$4 sm:$0xff]   ;;  %v6361_v10 = vld [vmem:[%s6077_s14 + $0x5c4] ss:$16 sps:$4 sm:$0xff]  }
  0xf5   : > { %2252 = vmatprep.mubr.bf16.mxu0 %v830_v12  ;;  %2504 = vmatprep.mubr.bf16.mxu1 %v830_v12  ;;  %v6371_v12 = vld [vmem:[%s6077_s14 + $0x5c0] ss:$16 sps:$4 sm:$0xff]  }
  0xf7   : > { %2276 = vmatpush1.bf16.msra.mxu0 %v5350_v11  ;;  %2528 = vmatpush1.bf16.msra.mxu1 %v5353_v13  ;;  %v6366_v11 = vld [vmem:[%s6077_s14 + $0x5cc] ss:$16 sps:$4 sm:$0xff]   ;;  %v6374_v13 = vld [vmem:[%s6077_s14 + $0x5c8] ss:$16 sps:$4 sm:$0xff]  }
  0xf8   : > { %2277 = vmatprep.subr.bf16.mxu0 %v5358_v14  ;;  %2529 = vmatprep.subr.bf16.mxu1 %v5361_v17  ;;  %v6379_v14 = vld [vmem:[%s6077_s14 + $0x5e4] ss:$16 sps:$4 sm:$0xff]   ;;  %v6390_v17 = vld [vmem:[%s6077_s14 + $0x5e8] ss:$16 sps:$4 sm:$0xff]  }
  0xfa   : > { %2253 = vmatmul.mubr.bf16.gmra.mrb[4].mxu0 %v829_v18  ;;  %2505 = vmatmul.mubr.bf16.gmra.mrb[4].mxu1 %v829_v18  ;;  %v775_v18 = vld [vmem:[%s6079_s15 + $0x20] sm:$0xff] }
  0xfb   : > { %2278 = vmatpush1.bf16.msra.mxu0 %v5356_v21  ;;  %2530 = vmatpush1.bf16.msra.mxu1 %v5359_v22  ;;  %v6400_v21 = vld [vmem:[%s6077_s14 + $0x60c] ss:$16 sps:$4 sm:$0xff]   ;;  %v823_v22 = vpack.c.bf16 %v783_v19, %v775_v18 }
  0xfc   : > { %2279 = vmatprep.subr.bf16.mxu0 %v5364_v23  ;;  %2531 = vmatprep.subr.bf16.mxu1 %v5367_v24  ;;  %v792_v23 = vld [vmem:[%s6079_s15 + $0xa8] sm:$0xff]  ;;  %v778_v18 = vld [vmem:[%s6079_s15 + $0x38] sm:$0xff] }
  0xfd   : > { %2262 = vmatprep.mubr.bf16.mxu0 %v838_v26  ;;  %2514 = vmatprep.mubr.bf16.mxu1 %v838_v26  ;;  %v800_v24 = vld [vmem:[%s6079_s15 + $0xe8] sm:$0xff]  ;;  %v786_v19 = vld [vmem:[%s6079_s15 + $0x78] sm:$0xff] }
  0xfe   : > { %v6410_v26 = vld [vmem:[%s6077_s14 + $0x608] ss:$16 sps:$4 sm:$0xff]   ;;  %v832_v29 = vpack.c.bf16 %v800_v24, %v792_v23  ;;  %v6487_v24 = vld [vmem:[%s6077_s14 + $0x6a4] ss:$16 sps:$4 sm:$0xff]  }
  0xff   : > { %2280 = vmatpush1.bf16.msra.mxu0 %v5362_v25  ;;  %2532 = vmatpush1.bf16.msra.mxu1 %v5365_v27  ;;  %v6407_v25 = vld [vmem:[%s6077_s14 + $0x600] ss:$16 sps:$4 sm:$0xff]   ;;  %v6415_v27 = vld [vmem:[%s6077_s14 + $0x624] ss:$16 sps:$4 sm:$0xff]   ;;  %v6482_v23 = vld [vmem:[%s6077_s14 + $0x688] ss:$16 sps:$4 sm:$0xff]  }
 0x100   : > { %2281 = vmatprep.subr.bf16.mxu0 %v5370_v28  ;;  %2533 = vmatprep.subr.bf16.mxu1 %v5373_v31  ;;  %v6418_v28 = vld [vmem:[%s6077_s14 + $0x62c] ss:$16 sps:$4 sm:$0xff]   ;;  %v6426_v31 = vld [vmem:[%s6077_s14 + $0x628] ss:$16 sps:$4 sm:$0xff]  }
 0x102   : > { %2263 = vmatmul.mubr.bf16.gmra.mrb[8].mxu0 %v837_v34  ;;  %2515 = vmatmul.mubr.bf16.gmra.mrb[8].mxu1 %v837_v34  ;;  %v6433_v34 = vld [vmem:[%s6077_s14 + $0x644] ss:$16 sps:$4 sm:$0xff]  }
 0x103   : > { %2282 = vmatpush1.bf16.msra.mxu0 %v5368_v32  ;;  %2534 = vmatpush1.bf16.msra.mxu1 %v5371_v33  ;;  %v791_v32 = vld [vmem:[%s6079_s15 + $0xa0] sm:$0xff] }
 0x104   : > { %2283 = vmatprep.subr.bf16.mxu0 %v5376_v37  ;;  %2535 = vmatprep.subr.bf16.mxu1 %v5379_v38  ;;  %v799_v33 = vld [vmem:[%s6079_s15 + $0xe0] sm:$0xff]  ;;  %v808_v37 = vld [vmem:[%s6079_s15 + $0x128] sm:$0xff] }
 0x105   : > { %2305 = vmatprep.mubr.bf16.mxu0 %v824_v39  ;;  %2557 = vmatprep.mubr.bf16.mxu1 %v824_v39  ;;  %v831_v36 = vpack.c.bf16 %v799_v33, %v791_v32  ;;  %v816_v38 = vld [vmem:[%s6079_s15 + $0x168] sm:$0x1f]  ;;  %v6443_v39 = vld [vmem:[%s6077_s14 + $0x640] ss:$16 sps:$4 sm:$0xff]   ;;  %v826_v32 = vpack.c.bf16 %v786_v19, %v778_v18 }
 0x106   : > { %v6495_v33 = vld [vmem:[%s6077_s14 + $0x6a0] ss:$16 sps:$4 sm:$0xff]   ;;  %v6530_v19 = vld [vmem:[%s6077_s14 + $0x6e8] ss:$16 sps:$4 sm:$0xff]  }
 0x107   : > { %2284 = vmatpush1.bf16.msra.mxu0 %v5374_v40  ;;  %2536 = vmatpush1.bf16.msra.mxu1 %v5377_v41  ;;  %v6446_v40 = vld [vmem:[%s6077_s14 + $0x648] ss:$16 sps:$4 sm:$0xff]   ;;  %v6451_v41 = vld [vmem:[%s6077_s14 + $0x664] ss:$16 sps:$4 sm:$0xff]   ;;  %7773 = vst [vmem:[#allocation5_spill] sm:$0xff] %v6495_v33  ;;  %7782 = vst [vmem:[#allocation14_spill] sm:$0xff] %v6530_v19 }
 0x108   : > { %2285 = vmatprep.subr.bf16.mxu0 %v5382_v42  ;;  %2537 = vmatprep.subr.bf16.mxu1 %v5385_v43  ;;  %v6454_v42 = vld [vmem:[%s6077_s14 + $0x66c] ss:$16 sps:$4 sm:$0xff]   ;;  %v840_v43 = vpack.c.bf16 %v816_v38, %v808_v37  ;;  %v6503_v37 = vld [vmem:[%s6077_s14 + $0x6c4] ss:$16 sps:$4 sm:$0xff]   ;;  %v6527_v18 = vld [vmem:[%s6077_s14 + $0x6e0] ss:$16 sps:$4 sm:$0xff]  }
 0x109   : > { %7775 = vst [vmem:[#allocation7_spill] sm:$0xff] %v6503_v37  ;;  %v6506_v38 = vld [vmem:[%s6077_s14 + $0x6cc] ss:$16 sps:$4 sm:$0xff]   ;;  %7781 = vst [vmem:[#allocation13_spill] sm:$0xff] %v6527_v18 }
 0x10a   : > { %7776 = vst [vmem:[#allocation8_spill] sm:$0xff] %v6506_v38 }
 0x10b   : > { %2286 = vmatpush1.bf16.msra.mxu0 %v5380_v44  ;;  %2538 = vmatpush1.bf16.msra.mxu1 %v5383_v45  ;;  %v6457_v44 = vld [vmem:[%s6077_s14 + $0x660] ss:$16 sps:$4 sm:$0xff]   ;;  %v6462_v45 = vld [vmem:[%s6077_s14 + $0x668] ss:$16 sps:$4 sm:$0xff]  }
 0x10c   : > { %2287 = vmatprep.subr.bf16.mxu0 %v5388_v46  ;;  %2539 = vmatprep.subr.bf16.mxu1 %v5391_v47  ;;  %v807_v46 = vld [vmem:[%s6079_s15 + $0x120] sm:$0xff] }
 0x10d   : > { %v815_v47 = vld [vmem:[%s6079_s15 + $0x160] sm:$0x1f] }
 0x10f   : > { %2288 = vmatpush1.bf16.msra.mxu0 %v5386_v48  ;;  %2540 = vmatpush1.bf16.msra.mxu1 %v5389_v49  ;;  %v6469_v48 = vld [vmem:[%s6077_s14 + $0x684] ss:$16 sps:$4 sm:$0xff]   ;;  %v6472_v49 = vld [vmem:[%s6077_s14 + $0x68c] ss:$16 sps:$4 sm:$0xff]  }
 0x110   : > { %2289 = vmatprep.subr.bf16.mxu0 %v5394_v50  ;;  %2541 = vmatprep.subr.bf16.mxu1 %v6273_v51  ;;  %v839_v50 = vpack.c.bf16 %v815_v47, %v807_v46  ;;  %v6514_v46 = vld [vmem:[%s6077_s14 + $0x6c8] ss:$16 sps:$4 sm:$0xff]   ;;  %v6519_v47 = vld [vmem:[%s6077_s14 + $0x6e4] ss:$16 sps:$4 sm:$0xff]  }
 0x111   : > { %7778 = vst [vmem:[#allocation10_spill] sm:$0xff] %v6514_v46  ;;  %7779 = vst [vmem:[#allocation11_spill] sm:$0xff] %v6519_v47 }
 0x113   : > { %2290 = vmatpush1.bf16.msra.mxu0 %v6276_v52  ;;  %2542 = vmatpush1.bf16.msra.mxu1 %v6279_v53 }
 0x114   : > { %2291 = vmatprep.subr.bf16.mxu0 %v6282_v54  ;;  %2543 = vmatprep.subr.bf16.mxu1 %v6286_v55 }
 0x117   : > { %2292 = vmatpush1.bf16.msra.mxu0 %v6289_v56  ;;  %2544 = vmatpush1.bf16.msra.mxu1 %v6292_v57 }
 0x118   : > { %2293 = vmatprep.subr.bf16.mxu0 %v6297_v58  ;;  %2545 = vmatprep.subr.bf16.mxu1 %v6302_v59 }
 0x11b   : > { %2294 = vmatpush1.bf16.msra.mxu0 %v6305_v60  ;;  %2546 = vmatpush1.bf16.msra.mxu1 %v6310_v61 }
 0x11c   : > { %2295 = vmatprep.subr.bf16.mxu0 %v6315_v62  ;;  %2547 = vmatprep.subr.bf16.mxu1 %v6318_v63 }
 0x11f   : > { %2296 = vmatpush1.bf16.msra.mxu0 %v6321_v0  ;;  %2548 = vmatpush1.bf16.msra.mxu1 %v6324_v1 }
 0x120   : > { %2297 = vmatprep.subr.bf16.mxu0 %v6329_v2  ;;  %2549 = vmatprep.subr.bf16.mxu1 %v6334_v3 }
 0x123   : > { %2298 = vmatpush1.bf16.msra.mxu0 %v6339_v4  ;;  %2550 = vmatpush1.bf16.msra.mxu1 %v6342_v5 }
 0x124   : > { %2299 = vmatprep.subr.bf16.mxu0 %v6345_v6  ;;  %2551 = vmatprep.subr.bf16.mxu1 %v6350_v7 }
 0x127   : > { %2300 = vmatpush1.bf16.msra.mxu0 %v6353_v8  ;;  %2552 = vmatpush1.bf16.msra.mxu1 %v6356_v9 }
 0x128   : > { %2301 = vmatprep.subr.bf16.mxu0 %v6361_v10  ;;  %2553 = vmatprep.subr.bf16.mxu1 %v6366_v11 }
 0x12b   : > { %2302 = vmatpush1.bf16.msra.mxu0 %v6371_v12  ;;  %2554 = vmatpush1.bf16.msra.mxu1 %v6374_v13 }
 0x12c   : > { %2303 = vmatprep.subr.bf16.mxu0 %v6379_v14  ;;  %2555 = vmatprep.subr.bf16.mxu1 %v6382_v15 }
 0x12f   : > { %2304 = vmatpush1.bf16.msra.mxu0 %v6385_v16  ;;  %2556 = vmatpush1.bf16.msra.mxu1 %v6390_v17 }
 0x130   : > { %2336 = vmatprep.subr.bf16.mxu0 %v6397_v20  ;;  %2588 = vmatprep.subr.bf16.mxu1 %v6400_v21 }
 0x132   : > { %2306 = vmatmul.mubr.bf16.vlgmr.msra.gmra.mrb[0].mxu0 %v823_v22  ;;  %2558 = vmatmul.mubr.bf16.vlgmr.msra.gmra.mrb[0].mxu1 %v823_v22  ;;  %v6479_v22 = vld [vmem:[%s6077_s14 + $0x680] ss:$16 sps:$4 sm:$0xff]  }
 0x133   : > { %2337 = vmatpush1.bf16.msra.mxu0 %v6407_v25  ;;  %2589 = vmatpush1.bf16.msra.mxu1 %v6410_v26 }
 0x134   : > { %2338 = vmatprep.subr.bf16.mxu0 %v6415_v27  ;;  %2590 = vmatprep.subr.bf16.mxu1 %v6418_v28 }
 0x135   : > { %2315 = vmatprep.mubr.bf16.mxu0 %v832_v29  ;;  %2567 = vmatprep.mubr.bf16.mxu1 %v832_v29  ;;  %v6490_v29 = vld [vmem:[%s6077_s14 + $0x6ac] ss:$16 sps:$4 sm:$0xff]  }
 0x136   : > { %7772 = vst [vmem:[#allocation4_spill] sm:$0xff] %v6490_v29 }
 0x137   : > { %2339 = vmatpush1.bf16.msra.mxu0 %v6421_v30  ;;  %2591 = vmatpush1.bf16.msra.mxu1 %v6426_v31 }
 0x138   : > { %2340 = vmatprep.subr.bf16.mxu0 %v6433_v34  ;;  %2592 = vmatprep.subr.bf16.mxu1 %v6436_v35 }
 0x13a   : > { %2316 = vmatmul.mubr.bf16.gmra.mrb[4].mxu0 %v831_v36  ;;  %2568 = vmatmul.mubr.bf16.gmra.mrb[4].mxu1 %v831_v36  ;;  %v6498_v36 = vld [vmem:[%s6077_s14 + $0x6a8] ss:$16 sps:$4 sm:$0xff]  }
 0x13b   : > { %2341 = vmatpush1.bf16.msra.mxu0 %v6443_v39  ;;  %2593 = vmatpush1.bf16.msra.mxu1 %v6446_v40  ;;  %7774 = vst [vmem:[#allocation6_spill] sm:$0xff] %v6498_v36 }
 0x13c   : > { %2342 = vmatprep.subr.bf16.mxu0 %v6451_v41  ;;  %2594 = vmatprep.subr.bf16.mxu1 %v6454_v42 }
 0x13d   : > { %2325 = vmatprep.mubr.bf16.mxu0 %v840_v43  ;;  %2577 = vmatprep.mubr.bf16.mxu1 %v840_v43  ;;  %v6511_v43 = vld [vmem:[%s6077_s14 + $0x6c0] ss:$16 sps:$4 sm:$0xff]  }
 0x13e   : > { %7777 = vst [vmem:[#allocation9_spill] sm:$0xff] %v6511_v43 }
 0x13f   : > { %2343 = vmatpush1.bf16.msra.mxu0 %v6457_v44  ;;  %2595 = vmatpush1.bf16.msra.mxu1 %v6462_v45 }
 0x140   : > { %2344 = vmatprep.subr.bf16.mxu0 %v6469_v48  ;;  %2596 = vmatprep.subr.bf16.mxu1 %v6472_v49 }
 0x142   : > { %2326 = vmatmul.mubr.bf16.gmra.mrb[8].mxu0 %v839_v50  ;;  %2578 = vmatmul.mubr.bf16.gmra.mrb[8].mxu1 %v839_v50  ;;  %v6522_v50 = vld [vmem:[%s6077_s14 + $0x6ec] ss:$16 sps:$4 sm:$0xff]  }
 0x143   : > { %2345 = vmatpush1.bf16.msra.mxu0 %v6479_v22  ;;  %2597 = vmatpush1.bf16.msra.mxu1 %v6482_v23  ;;  %7780 = vst [vmem:[#allocation12_spill] sm:$0xff] %v6522_v50 }
 0x144   : > { %2346 = vmatprep.subr.bf16.mxu0 %v6487_v24  ;;  %2598 = vmatprep.subr.bf16.mxu1 %v6490_v29 }
 0x145   : > { %2368 = vmatprep.mubr.bf16.mxu0 %v826_v32  ;;  %2620 = vmatprep.mubr.bf16.mxu1 %v826_v32  ;;  %v6535_v32 = vld [vmem:[%s6077_s14 + $0x704] ss:$16 sps:$4 sm:$0xff]  }
 0x146   : > { %7783 = vst [vmem:[#allocation15_spill] sm:$0xff] %v6535_v32 }
 0x147   : > { %2347 = vmatpush1.bf16.msra.mxu0 %v6495_v33  ;;  %2599 = vmatpush1.bf16.msra.mxu1 %v6498_v36  ;;  %v785_v36 = vld [vmem:[%s6079_s15 + $0x70] sm:$0xff]  ;;  %v802_v33 = vld [vmem:[%s6079_s15 + $0xf8] sm:$0xff] }
 0x148   : > { %2348 = vmatprep.subr.bf16.mxu0 %v6503_v37  ;;  %2600 = vmatprep.subr.bf16.mxu1 %v6506_v38  ;;  %v6538_v38 = vld [vmem:[%s6077_s14 + $0x70c] ss:$16 sps:$4 sm:$0xff]   ;;  %v6653_v37 = vld [vmem:[%s6077_s14 + $0x7e0] ss:$16 sps:$4 sm:$0xff]  }
 0x149   : > { %7784 = vst [vmem:[#allocation16_spill] sm:$0xff] %v6538_v38  ;;  %7813 = vst [vmem:[#allocation45_spill] sm:$0xff] %v6653_v37 }
 0x14b   : > { %2349 = vmatpush1.bf16.msra.mxu0 %v6511_v43  ;;  %2601 = vmatpush1.bf16.msra.mxu1 %v6514_v46  ;;  %v6543_v46 = vld [vmem:[%s6077_s14 + $0x700] ss:$16 sps:$4 sm:$0xff]   ;;  %v6546_v43 = vld [vmem:[%s6077_s14 + $0x708] ss:$16 sps:$4 sm:$0xff]  }
 0x14c   : > { %2350 = vmatprep.subr.bf16.mxu0 %v6519_v47  ;;  %2602 = vmatprep.subr.bf16.mxu1 %v6522_v50  ;;  %7785 = vst [vmem:[#allocation17_spill] sm:$0xff] %v6543_v46  ;;  %7786 = vst [vmem:[#allocation18_spill] sm:$0xff] %v6546_v43  ;;  %v6551_v50 = vld [vmem:[%s6077_s14 + $0x724] ss:$16 sps:$4 sm:$0xff]   ;;  %v6554_v47 = vld [vmem:[%s6077_s14 + $0x72c] ss:$16 sps:$4 sm:$0xff]  }
 0x14d   : > { %7787 = vst [vmem:[#allocation19_spill] sm:$0xff] %v6551_v50  ;;  %7788 = vst [vmem:[#allocation20_spill] sm:$0xff] %v6554_v47 }
 0x14f   : > { %2351 = vmatpush1.bf16.msra.mxu0 %v6527_v18  ;;  %2603 = vmatpush1.bf16.msra.mxu1 %v6530_v19  ;;  %v6559_v19 = vld [vmem:[%s6077_s14 + $0x720] ss:$16 sps:$4 sm:$0xff]   ;;  %v6562_v18 = vld [vmem:[%s6077_s14 + $0x728] ss:$16 sps:$4 sm:$0xff]  }
 0x150   : > { %2352 = vmatprep.subr.bf16.mxu0 %v6535_v32  ;;  %2604 = vmatprep.subr.bf16.mxu1 %v6538_v38  ;;  %7789 = vst [vmem:[#allocation21_spill] sm:$0xff] %v6559_v19  ;;  %7790 = vst [vmem:[#allocation22_spill] sm:$0xff] %v6562_v18  ;;  %v6567_v38 = vld [vmem:[%s6077_s14 + $0x744] ss:$16 sps:$4 sm:$0xff]   ;;  %v6570_v32 = vld [vmem:[%s6077_s14 + $0x74c] ss:$16 sps:$4 sm:$0xff]  }
 0x151   : > { %7791 = vst [vmem:[#allocation23_spill] sm:$0xff] %v6567_v38  ;;  %7792 = vst [vmem:[#allocation24_spill] sm:$0xff] %v6570_v32 }
 0x153   : > { %2353 = vmatpush1.bf16.msra.mxu0 %v6543_v46  ;;  %2605 = vmatpush1.bf16.msra.mxu1 %v6546_v43  ;;  %v6575_v43 = vld [vmem:[%s6077_s14 + $0x740] ss:$16 sps:$4 sm:$0xff]   ;;  %v6578_v46 = vld [vmem:[%s6077_s14 + $0x748] ss:$16 sps:$4 sm:$0xff]  }
 0x154   : > { %2354 = vmatprep.subr.bf16.mxu0 %v6551_v50  ;;  %2606 = vmatprep.subr.bf16.mxu1 %v6554_v47  ;;  %7793 = vst [vmem:[#allocation25_spill] sm:$0xff] %v6575_v43  ;;  %7794 = vst [vmem:[#allocation26_spill] sm:$0xff] %v6578_v46  ;;  %v6583_v47 = vld [vmem:[%s6077_s14 + $0x764] ss:$16 sps:$4 sm:$0xff]   ;;  %v6586_v50 = vld [vmem:[%s6077_s14 + $0x76c] ss:$16 sps:$4 sm:$0xff]  }
 0x155   : > { %7795 = vst [vmem:[#allocation27_spill] sm:$0xff] %v6583_v47  ;;  %7796 = vst [vmem:[#allocation28_spill] sm:$0xff] %v6586_v50 }
 0x157   : > { %2355 = vmatpush1.bf16.msra.mxu0 %v6559_v19  ;;  %2607 = vmatpush1.bf16.msra.mxu1 %v6562_v18  ;;  %v6591_v18 = vld [vmem:[%s6077_s14 + $0x760] ss:$16 sps:$4 sm:$0xff]   ;;  %v6594_v19 = vld [vmem:[%s6077_s14 + $0x768] ss:$16 sps:$4 sm:$0xff]  }
 0x158   : > { %2356 = vmatprep.subr.bf16.mxu0 %v6567_v38  ;;  %2608 = vmatprep.subr.bf16.mxu1 %v6570_v32  ;;  %7797 = vst [vmem:[#allocation29_spill] sm:$0xff] %v6591_v18  ;;  %7798 = vst [vmem:[#allocation30_spill] sm:$0xff] %v6594_v19  ;;  %v6599_v32 = vld [vmem:[%s6077_s14 + $0x784] ss:$16 sps:$4 sm:$0xff]   ;;  %v6602_v38 = vld [vmem:[%s6077_s14 + $0x78c] ss:$16 sps:$4 sm:$0xff]  }
 0x159   : > { %7799 = vst [vmem:[#allocation31_spill] sm:$0xff] %v6599_v32  ;;  %7800 = vst [vmem:[#allocation32_spill] sm:$0xff] %v6602_v38 }
 0x15b   : > { %2357 = vmatpush1.bf16.msra.mxu0 %v6575_v43  ;;  %2609 = vmatpush1.bf16.msra.mxu1 %v6578_v46  ;;  %v6607_v46 = vld [vmem:[%s6077_s14 + $0x780] ss:$16 sps:$4 sm:$0xff]   ;;  %v6610_v43 = vld [vmem:[%s6077_s14 + $0x788] ss:$16 sps:$4 sm:$0xff]  }
 0x15c   : > { %2358 = vmatprep.subr.bf16.mxu0 %v6583_v47  ;;  %2610 = vmatprep.subr.bf16.mxu1 %v6586_v50  ;;  %7801 = vst [vmem:[#allocation33_spill] sm:$0xff] %v6607_v46  ;;  %7802 = vst [vmem:[#allocation34_spill] sm:$0xff] %v6610_v43  ;;  %v6615_v50 = vld [vmem:[%s6077_s14 + $0x7a4] ss:$16 sps:$4 sm:$0xff]   ;;  %v6618_v47 = vld [vmem:[%s6077_s14 + $0x7ac] ss:$16 sps:$4 sm:$0xff]  }
 0x15d   : > { %7803 = vst [vmem:[#allocation35_spill] sm:$0xff] %v6615_v50  ;;  %7804 = vst [vmem:[#allocation36_spill] sm:$0xff] %v6618_v47 }
 0x15f   : > { %2359 = vmatpush1.bf16.msra.mxu0 %v6591_v18  ;;  %2611 = vmatpush1.bf16.msra.mxu1 %v6594_v19  ;;  %v6623_v19 = vld [vmem:[%s6077_s14 + $0x7a0] ss:$16 sps:$4 sm:$0xff]   ;;  %v6626_v18 = vld [vmem:[%s6077_s14 + $0x7a8] ss:$16 sps:$4 sm:$0xff]  }
 0x160   : > { %2360 = vmatprep.subr.bf16.mxu0 %v6599_v32  ;;  %2612 = vmatprep.subr.bf16.mxu1 %v6602_v38  ;;  %7805 = vst [vmem:[#allocation37_spill] sm:$0xff] %v6623_v19  ;;  %7806 = vst [vmem:[#allocation38_spill] sm:$0xff] %v6626_v18  ;;  %v6631_v38 = vld [vmem:[%s6077_s14 + $0x7c4] ss:$16 sps:$4 sm:$0xff]   ;;  %v6634_v32 = vld [vmem:[%s6077_s14 + $0x7cc] ss:$16 sps:$4 sm:$0xff]  }
 0x161   : > { %7807 = vst [vmem:[#allocation39_spill] sm:$0xff] %v6631_v38  ;;  %7808 = vst [vmem:[#allocation40_spill] sm:$0xff] %v6634_v32 }
 0x163   : > { %2361 = vmatpush1.bf16.msra.mxu0 %v6607_v46  ;;  %2613 = vmatpush1.bf16.msra.mxu1 %v6610_v43  ;;  %v6639_v43 = vld [vmem:[%s6077_s14 + $0x7c0] ss:$16 sps:$4 sm:$0xff]   ;;  %v6642_v46 = vld [vmem:[%s6077_s14 + $0x7c8] ss:$16 sps:$4 sm:$0xff]  }
 0x164   : > { %2362 = vmatprep.subr.bf16.mxu0 %v6615_v50  ;;  %2614 = vmatprep.subr.bf16.mxu1 %v6618_v47  ;;  %7809 = vst [vmem:[#allocation41_spill] sm:$0xff] %v6639_v43  ;;  %7810 = vst [vmem:[#allocation42_spill] sm:$0xff] %v6642_v46  ;;  %v6647_v47 = vld [vmem:[%s6077_s14 + $0x7e4] ss:$16 sps:$4 sm:$0xff]   ;;  %v6650_v50 = vld [vmem:[%s6077_s14 + $0x7ec] ss:$16 sps:$4 sm:$0xff]  }
 0x165   : > { %7811 = vst [vmem:[#allocation43_spill] sm:$0xff] %v6647_v47  ;;  %7812 = vst [vmem:[#allocation44_spill] sm:$0xff] %v6650_v50 }
 0x167   : > { %2363 = vmatpush1.bf16.msra.mxu0 %v6623_v19  ;;  %2615 = vmatpush1.bf16.msra.mxu1 %v6626_v18  ;;  %v6658_v18 = vld [vmem:[%s6077_s14 + $0x7e8] ss:$16 sps:$4 sm:$0xff]   ;;  %v777_v19 = vld [vmem:[%s6079_s15 + $0x30] sm:$0xff] }
 0x168   : > { %2364 = vmatprep.subr.bf16.mxu0 %v6631_v38  ;;  %2616 = vmatprep.subr.bf16.mxu1 %v6634_v32  ;;  %7814 = vst [vmem:[#allocation46_spill] sm:$0xff] %v6658_v18  ;;  %v825_v32 = vpack.c.bf16 %v785_v36, %v777_v19  ;;  %v794_v38 = vld [vmem:[%s6079_s15 + $0xb8] sm:$0xff]  ;;  %v5538_v36 = vld [vmem:[%s6077_s14] ss:$16 sps:$4 sm:$0xff]  }
 0x169   : > { %v834_v29 = vpack.c.bf16 %v802_v33, %v794_v38  ;;  %v5539_v19 = vld [vmem:[%s6077_s14 + $0x8] ss:$16 sps:$4 sm:$0xff]  }
 0x16a   : > { %v810_v38 = vld [vmem:[%s6079_s15 + $0x138] sm:$0xff] }
 0x16b   : > { %2365 = vmatpush1.bf16.msra.mxu0 %v6639_v43  ;;  %2617 = vmatpush1.bf16.msra.mxu1 %v6642_v46  ;;  %v5536_v46 = vld [vmem:[%s6077_s14 + $0x4] ss:$16 sps:$4 sm:$0xff]   ;;  %v5537_v43 = vld [vmem:[%s6077_s14 + $0xc] ss:$16 sps:$4 sm:$0xff]  }
 0x16c   : > { %2366 = vmatprep.subr.bf16.mxu0 %v6647_v47  ;;  %2618 = vmatprep.subr.bf16.mxu1 %v6650_v50  ;;  %v801_v50 = vld [vmem:[%s6079_s15 + $0xf0] sm:$0xff]  ;;  %v5553_v47 = vld [vmem:[%s6077_s14 + $0x8c] ss:$16 sps:$4 sm:$0xff]  }
 0x16f   : > { %2367 = vmatpush1.bf16.msra.mxu0 %v6653_v37  ;;  %2619 = vmatpush1.bf16.msra.mxu1 %v6658_v18  ;;  %v793_v37 = vld [vmem:[%s6079_s15 + $0xb0] sm:$0xff] }
 0x170   : > { %2797 = vmatprep.subr.bf16.mxu0 %v5536_v46  ;;  %3049 = vmatprep.subr.bf16.mxu1 %v5537_v43  ;;  %v5540_v18 = vld [vmem:[%s6077_s14 + $0x24] ss:$16 sps:$4 sm:$0xff]   ;;  %v5541_v46 = vld [vmem:[%s6077_s14 + $0x2c] ss:$16 sps:$4 sm:$0xff]   ;;  %v833_v33 = vpack.c.bf16 %v801_v50, %v793_v37  ;;  %v5547_v37 = vld [vmem:[%s6077_s14 + $0x48] ss:$16 sps:$4 sm:$0xff]  }
 0x171   : > { %v818_v43 = vld [vmem:[%s6079_s15 + $0x178] sm:$0x1f]  ;;  %v809_v50 = vld [vmem:[%s6079_s15 + $0x130] sm:$0xff] }
 0x172   : > { %2369 = vmatmul.mubr.bf16.vlgmr.msra.gmra.mrb[0].mxu0 %v825_v32  ;;  %2621 = vmatmul.mubr.bf16.vlgmr.msra.gmra.mrb[0].mxu1 %v825_v32  ;;  %v5542_v32 = vld [vmem:[%s6077_s14 + $0x20] ss:$16 sps:$4 sm:$0xff]  }
 0x173   : > { %2798 = vmatpush1.bf16.msra.mxu0 %v5538_v36  ;;  %3050 = vmatpush1.bf16.msra.mxu1 %v5539_v19  ;;  %v5543_v36 = vld [vmem:[%s6077_s14 + $0x28] ss:$16 sps:$4 sm:$0xff]   ;;  %v5544_v19 = vld [vmem:[%s6077_s14 + $0x44] ss:$16 sps:$4 sm:$0xff]  }
 0x174   : > { %2799 = vmatprep.subr.bf16.mxu0 %v5540_v18  ;;  %3051 = vmatprep.subr.bf16.mxu1 %v5541_v46  ;;  %v5545_v18 = vld [vmem:[%s6077_s14 + $0x4c] ss:$16 sps:$4 sm:$0xff]   ;;  %v842_v46 = vpack.c.bf16 %v818_v43, %v810_v38 }
 0x175   : > { %2378 = vmatprep.mubr.bf16.mxu0 %v834_v29  ;;  %2630 = vmatprep.mubr.bf16.mxu1 %v834_v29  ;;  %v5546_v29 = vld [vmem:[%s6077_s14 + $0x40] ss:$16 sps:$4 sm:$0xff]   ;;  %v4756_v43 = vld [vmem:[%s6079_s15 + $0x1c8] sm:$0xff] }
 0x177   : > { %2800 = vmatpush1.bf16.msra.mxu0 %v5542_v32  ;;  %3052 = vmatpush1.bf16.msra.mxu1 %v5543_v36  ;;  %v817_v32 = vld [vmem:[%s6079_s15 + $0x170] sm:$0x1f] }
 0x178   : > { %2801 = vmatprep.subr.bf16.mxu0 %v5544_v19  ;;  %3053 = vmatprep.subr.bf16.mxu1 %v5545_v18  ;;  %v5548_v36 = vld [vmem:[%s6077_s14 + $0x64] ss:$16 sps:$4 sm:$0xff]   ;;  %v5549_v19 = vld [vmem:[%s6077_s14 + $0x6c] ss:$16 sps:$4 sm:$0xff]   ;;  %v841_v38 = vpack.c.bf16 %v817_v32, %v809_v50  ;;  %v5550_v18 = vld [vmem:[%s6077_s14 + $0x60] ss:$16 sps:$4 sm:$0xff]  }
 0x179   : > { %v5555_v50 = vld [vmem:[%s6077_s14 + $0x88] ss:$16 sps:$4 sm:$0xff]   ;;  %v5556_v32 = vld [vmem:[%s6077_s14 + $0xa4] ss:$16 sps:$4 sm:$0xff]  }
 0x17a   : > { %2379 = vmatmul.mubr.bf16.gmra.mrb[4].mxu0 %v833_v33  ;;  %2631 = vmatmul.mubr.bf16.gmra.mrb[4].mxu1 %v833_v33  ;;  %v4748_v33 = vld [vmem:[%s6079_s15 + $0x188] sm:$0xff] }
 0x17b   : > { %2802 = vmatpush1.bf16.msra.mxu0 %v5546_v29  ;;  %3054 = vmatpush1.bf16.msra.mxu1 %v5547_v37  ;;  %v5551_v29 = vld [vmem:[%s6077_s14 + $0x68] ss:$16 sps:$4 sm:$0xff]   ;;  %v5552_v37 = vld [vmem:[%s6077_s14 + $0x84] ss:$16 sps:$4 sm:$0xff]  }
 0x17c   : > { %2803 = vmatprep.subr.bf16.mxu0 %v5548_v36  ;;  %3055 = vmatprep.subr.bf16.mxu1 %v5549_v19  ;;  %v2749_v36 = vpack.c.bf16 %v4756_v43, %v4748_v33  ;;  %v5557_v19 = vld [vmem:[%s6077_s14 + $0xac] ss:$16 sps:$4 sm:$0xff]   ;;  %v5559_v33 = vld [vmem:[%s6077_s14 + $0xa8] ss:$16 sps:$4 sm:$0xff]  }
 0x17d   : > { %2388 = vmatprep.mubr.bf16.mxu0 %v842_v46  ;;  %2640 = vmatprep.mubr.bf16.mxu1 %v842_v46  ;;  %v5554_v46 = vld [vmem:[%s6077_s14 + $0x80] ss:$16 sps:$4 sm:$0xff]   ;;  %v5561_v43 = vld [vmem:[%s6077_s14 + $0xcc] ss:$16 sps:$4 sm:$0xff]  }
 0x17f   : > { %2804 = vmatpush1.bf16.msra.mxu0 %v5550_v18  ;;  %3056 = vmatpush1.bf16.msra.mxu1 %v5551_v29  ;;  %v5562_v18 = vld [vmem:[%s6077_s14 + $0xc0] ss:$16 sps:$4 sm:$0xff]   ;;  %v5563_v29 = vld [vmem:[%s6077_s14 + $0xc8] ss:$16 sps:$4 sm:$0xff]  }
 0x180   : > { %2805 = vmatprep.subr.bf16.mxu0 %v5552_v37  ;;  %3057 = vmatprep.subr.bf16.mxu1 %v5553_v47  ;;  %v5558_v47 = vld [vmem:[%s6077_s14 + $0xa0] ss:$16 sps:$4 sm:$0xff]   ;;  %v5564_v37 = vld [vmem:[%s6077_s14 + $0xe4] ss:$16 sps:$4 sm:$0xff]  }
 0x182   : > { %2389 = vmatmul.mubr.bf16.gmra.mrb[8].mxu0 %v841_v38  ;;  %2641 = vmatmul.mubr.bf16.gmra.mrb[8].mxu1 %v841_v38  ;;  %v5560_v38 = vld [vmem:[%s6077_s14 + $0xc4] ss:$16 sps:$4 sm:$0xff]  }
 0x183   : > { %2806 = vmatpush1.bf16.msra.mxu0 %v5554_v46  ;;  %3058 = vmatpush1.bf16.msra.mxu1 %v5555_v50  ;;  %v5566_v46 = vld [vmem:[%s6077_s14 + $0xe0] ss:$16 sps:$4 sm:$0xff]   ;;  %v5567_v50 = vld [vmem:[%s6077_s14 + $0xe8] ss:$16 sps:$4 sm:$0xff]  }
 0x184   : > { %2807 = vmatprep.subr.bf16.mxu0 %v5556_v32  ;;  %3059 = vmatprep.subr.bf16.mxu1 %v5557_v19  ;;  %v5568_v32 = vld [vmem:[%s6077_s14 + $0x104] ss:$16 sps:$4 sm:$0xff]   ;;  %v5569_v19 = vld [vmem:[%s6077_s14 + $0x10c] ss:$16 sps:$4 sm:$0xff]  }
 0x185   : > { %2829 = vmatprep.mubr.bf16.mxu0 %v2749_v36  ;;  %3081 = vmatprep.mubr.bf16.mxu1 %v2749_v36  ;;  %v5565_v36 = vld [vmem:[%s6077_s14 + $0xec] ss:$16 sps:$4 sm:$0xff]  }
 0x187   : > { %2808 = vmatpush1.bf16.msra.mxu0 %v5558_v47  ;;  %3060 = vmatpush1.bf16.msra.mxu1 %v5559_v33  ;;  %v5570_v47 = vld [vmem:[%s6077_s14 + $0x100] ss:$16 sps:$4 sm:$0xff]   ;;  %v5571_v33 = vld [vmem:[%s6077_s14 + $0x108] ss:$16 sps:$4 sm:$0xff]  }
 0x188   : > { %2809 = vmatprep.subr.bf16.mxu0 %v5560_v38  ;;  %3061 = vmatprep.subr.bf16.mxu1 %v5561_v43  ;;  %v5572_v38 = vld [vmem:[%s6077_s14 + $0x124] ss:$16 sps:$4 sm:$0xff]   ;;  %v5573_v43 = vld [vmem:[%s6077_s14 + $0x12c] ss:$16 sps:$4 sm:$0xff]  }
 0x18b   : > { %2810 = vmatpush1.bf16.msra.mxu0 %v5562_v18  ;;  %3062 = vmatpush1.bf16.msra.mxu1 %v5563_v29  ;;  %v5574_v18 = vld [vmem:[%s6077_s14 + $0x120] ss:$16 sps:$4 sm:$0xff]   ;;  %v5575_v29 = vld [vmem:[%s6077_s14 + $0x128] ss:$16 sps:$4 sm:$0xff]  }
 0x18c   : > { %2811 = vmatprep.subr.bf16.mxu0 %v5564_v37  ;;  %3063 = vmatprep.subr.bf16.mxu1 %v5565_v36  ;;  %v5576_v37 = vld [vmem:[%s6077_s14 + $0x144] ss:$16 sps:$4 sm:$0xff]   ;;  %v5577_v36 = vld [vmem:[%s6077_s14 + $0x14c] ss:$16 sps:$4 sm:$0xff]  }
 0x18f   : > { %2812 = vmatpush1.bf16.msra.mxu0 %v5566_v46  ;;  %3064 = vmatpush1.bf16.msra.mxu1 %v5567_v50  ;;  %v5578_v46 = vld [vmem:[%s6077_s14 + $0x140] ss:$16 sps:$4 sm:$0xff]   ;;  %v5579_v50 = vld [vmem:[%s6077_s14 + $0x148] ss:$16 sps:$4 sm:$0xff]  }
 0x190   : > { %2813 = vmatprep.subr.bf16.mxu0 %v5568_v32  ;;  %3065 = vmatprep.subr.bf16.mxu1 %v5569_v19  ;;  %v5580_v32 = vld [vmem:[%s6077_s14 + $0x164] ss:$16 sps:$4 sm:$0xff]   ;;  %v5581_v19 = vld [vmem:[%s6077_s14 + $0x16c] ss:$16 sps:$4 sm:$0xff]  }
 0x193   : > { %2814 = vmatpush1.bf16.msra.mxu0 %v5570_v47  ;;  %3066 = vmatpush1.bf16.msra.mxu1 %v5571_v33  ;;  %v5582_v47 = vld [vmem:[%s6077_s14 + $0x160] ss:$16 sps:$4 sm:$0xff]   ;;  %v5583_v33 = vld [vmem:[%s6077_s14 + $0x168] ss:$16 sps:$4 sm:$0xff]  }
 0x194   : > { %2815 = vmatprep.subr.bf16.mxu0 %v5572_v38  ;;  %3067 = vmatprep.subr.bf16.mxu1 %v5573_v43  ;;  %v5584_v38 = vld [vmem:[%s6077_s14 + $0x184] ss:$16 sps:$4 sm:$0xff]   ;;  %v5585_v43 = vld [vmem:[%s6077_s14 + $0x18c] ss:$16 sps:$4 sm:$0xff]  }
 0x197   : > { %2816 = vmatpush1.bf16.msra.mxu0 %v5574_v18  ;;  %3068 = vmatpush1.bf16.msra.mxu1 %v5575_v29  ;;  %v5586_v18 = vld [vmem:[%s6077_s14 + $0x180] ss:$16 sps:$4 sm:$0xff]   ;;  %v5587_v29 = vld [vmem:[%s6077_s14 + $0x188] ss:$16 sps:$4 sm:$0xff]  }
 0x198   : > { %2817 = vmatprep.subr.bf16.mxu0 %v5576_v37  ;;  %3069 = vmatprep.subr.bf16.mxu1 %v5577_v36  ;;  %v5588_v37 = vld [vmem:[%s6077_s14 + $0x1a4] ss:$16 sps:$4 sm:$0xff]   ;;  %v5589_v36 = vld [vmem:[%s6077_s14 + $0x1ac] ss:$16 sps:$4 sm:$0xff]  }
 0x19b   : > { %2818 = vmatpush1.bf16.msra.mxu0 %v5578_v46  ;;  %3070 = vmatpush1.bf16.msra.mxu1 %v5579_v50  ;;  %v5590_v46 = vld [vmem:[%s6077_s14 + $0x1a0] ss:$16 sps:$4 sm:$0xff]   ;;  %v5591_v50 = vld [vmem:[%s6077_s14 + $0x1a8] ss:$16 sps:$4 sm:$0xff]  }
 0x19c   : > { %2819 = vmatprep.subr.bf16.mxu0 %v5580_v32  ;;  %3071 = vmatprep.subr.bf16.mxu1 %v5581_v19  ;;  %v5592_v32 = vld [vmem:[%s6077_s14 + $0x1c4] ss:$16 sps:$4 sm:$0xff]   ;;  %v5593_v19 = vld [vmem:[%s6077_s14 + $0x1cc] ss:$16 sps:$4 sm:$0xff]  }
 0x19f   : > { %2820 = vmatpush1.bf16.msra.mxu0 %v5582_v47  ;;  %3072 = vmatpush1.bf16.msra.mxu1 %v5583_v33  ;;  %v5594_v47 = vld [vmem:[%s6077_s14 + $0x1c0] ss:$16 sps:$4 sm:$0xff]   ;;  %v5595_v33 = vld [vmem:[%s6077_s14 + $0x1c8] ss:$16 sps:$4 sm:$0xff]  }
 0x1a0   : > { %2821 = vmatprep.subr.bf16.mxu0 %v5584_v38  ;;  %3073 = vmatprep.subr.bf16.mxu1 %v5585_v43  ;;  %v4747_v38 = vld [vmem:[%s6079_s15 + $0x180] sm:$0xff] }
 0x1a1   : > { %v4755_v43 = vld [vmem:[%s6079_s15 + $0x1c0] sm:$0xff] }
 0x1a3   : > { %2822 = vmatpush1.bf16.msra.mxu0 %v5586_v18  ;;  %3074 = vmatpush1.bf16.msra.mxu1 %v5587_v29  ;;  %v5596_v18 = vld [vmem:[%s6077_s14 + $0x1e4] ss:$16 sps:$4 sm:$0xff]   ;;  %v5597_v29 = vld [vmem:[%s6077_s14 + $0x1ec] ss:$16 sps:$4 sm:$0xff]  }
 0x1a4   : > { %2823 = vmatprep.subr.bf16.mxu0 %v5588_v37  ;;  %3075 = vmatprep.subr.bf16.mxu1 %v5589_v36  ;;  %v2748_v37 = vpack.c.bf16 %v4755_v43, %v4747_v38  ;;  %v4764_v36 = vld [vmem:[%s6079_s15 + $0x208] sm:$0xff]  ;;  %v5602_v38 = vld [vmem:[%s6077_s14 + $0x200] ss:$16 sps:$4 sm:$0xff]  }
 0x1a5   : > { %v5603_v43 = vld [vmem:[%s6077_s14 + $0x208] ss:$16 sps:$4 sm:$0xff]  }
 0x1a7   : > { %2824 = vmatpush1.bf16.msra.mxu0 %v5590_v46  ;;  %3076 = vmatpush1.bf16.msra.mxu1 %v5591_v50  ;;  %v4772_v46 = vld [vmem:[%s6079_s15 + $0x248] sm:$0xff]  ;;  %v5598_v50 = vld [vmem:[%s6077_s14 + $0x1e0] ss:$16 sps:$4 sm:$0xff]  }
 0x1a8   : > { %2825 = vmatprep.subr.bf16.mxu0 %v5592_v32  ;;  %3077 = vmatprep.subr.bf16.mxu1 %v5593_v19  ;;  %v5599_v32 = vld [vmem:[%s6077_s14 + $0x1e8] ss:$16 sps:$4 sm:$0xff]   ;;  %v5600_v19 = vld [vmem:[%s6077_s14 + $0x204] ss:$16 sps:$4 sm:$0xff]  }
 0x1ab   : > { %2826 = vmatpush1.bf16.msra.mxu0 %v5594_v47  ;;  %3078 = vmatpush1.bf16.msra.mxu1 %v5595_v33  ;;  %v5601_v47 = vld [vmem:[%s6077_s14 + $0x20c] ss:$16 sps:$4 sm:$0xff]   ;;  %v2757_v33 = vpack.c.bf16 %v4772_v46, %v4764_v36 }
 0x1ac   : > { %2827 = vmatprep.subr.bf16.mxu0 %v5596_v18  ;;  %3079 = vmatprep.subr.bf16.mxu1 %v5597_v29  ;;  %v4763_v18 = vld [vmem:[%s6079_s15 + $0x200] sm:$0xff]  ;;  %v4788_v46 = vld [vmem:[%s6079_s15 + $0x2c8] sm:$0x1f] }
 0x1ad   : > { %v4771_v29 = vld [vmem:[%s6079_s15 + $0x240] sm:$0xff] }
 0x1ae   : > { %v2756_v36 = vpack.c.bf16 %v4771_v29, %v4763_v18  ;;  %v5611_v18 = vld [vmem:[%s6077_s14 + $0x248] ss:$16 sps:$4 sm:$0xff]   ;;  %v4779_v29 = vld [vmem:[%s6079_s15 + $0x280] sm:$0xff] }
 0x1af   : > { %2828 = vmatpush1.bf16.msra.mxu0 %v5598_v50  ;;  %3080 = vmatpush1.bf16.msra.mxu1 %v5599_v32  ;;  %v5604_v50 = vld [vmem:[%s6077_s14 + $0x224] ss:$16 sps:$4 sm:$0xff]   ;;  %v5605_v32 = vld [vmem:[%s6077_s14 + $0x22c] ss:$16 sps:$4 sm:$0xff]  }
 0x1b0   : > { %2860 = vmatprep.subr.bf16.mxu0 %v5600_v19  ;;  %3112 = vmatprep.subr.bf16.mxu1 %v5601_v47  ;;  %v5606_v19 = vld [vmem:[%s6077_s14 + $0x220] ss:$16 sps:$4 sm:$0xff]   ;;  %v5607_v47 = vld [vmem:[%s6077_s14 + $0x228] ss:$16 sps:$4 sm:$0xff]  }
 0x1b2   : > { %2830 = vmatmul.mubr.bf16.vlgmr.msra.gmra.mrb[12].mxu0 %v2748_v37  ;;  %3082 = vmatmul.mubr.bf16.vlgmr.msra.gmra.mrb[12].mxu1 %v2748_v37  ;;  %v4780_v37 = vld [vmem:[%s6079_s15 + $0x288] sm:$0xff] }
 0x1b3   : > { %2861 = vmatpush1.bf16.msra.mxu0 %v5602_v38  ;;  %3113 = vmatpush1.bf16.msra.mxu1 %v5603_v43  ;;  %v5608_v38 = vld [vmem:[%s6077_s14 + $0x244] ss:$16 sps:$4 sm:$0xff]   ;;  %v5609_v43 = vld [vmem:[%s6077_s14 + $0x24c] ss:$16 sps:$4 sm:$0xff]  }
 0x1b4   : > { %2862 = vmatprep.subr.bf16.mxu0 %v5604_v50  ;;  %3114 = vmatprep.subr.bf16.mxu1 %v5605_v32  ;;  %v2765_v50 = vpack.c.bf16 %v4788_v46, %v4780_v37  ;;  %v4787_v32 = vld [vmem:[%s6079_s15 + $0x2c0] sm:$0x1f]  ;;  %v4758_v46 = vld [vmem:[%s6079_s15 + $0x1d8] sm:$0xff] }
 0x1b5   : > { %2839 = vmatprep.mubr.bf16.mxu0 %v2757_v33  ;;  %3091 = vmatprep.mubr.bf16.mxu1 %v2757_v33  ;;  %v5610_v33 = vld [vmem:[%s6077_s14 + $0x240] ss:$16 sps:$4 sm:$0xff]   ;;  %v2764_v37 = vpack.c.bf16 %v4787_v32, %v4779_v29  ;;  %v5619_v29 = vld [vmem:[%s6077_s14 + $0x288] ss:$16 sps:$4 sm:$0xff]   ;;  %v5620_v32 = vld [vmem:[%s6077_s14 + $0x2a4] ss:$16 sps:$4 sm:$0xff]  }
 0x1b7   : > { %2863 = vmatpush1.bf16.msra.mxu0 %v5606_v19  ;;  %3115 = vmatpush1.bf16.msra.mxu1 %v5607_v47  ;;  %v5612_v19 = vld [vmem:[%s6077_s14 + $0x264] ss:$16 sps:$4 sm:$0xff]   ;;  %v5613_v47 = vld [vmem:[%s6077_s14 + $0x26c] ss:$16 sps:$4 sm:$0xff]  }
 0x1b8   : > { %2864 = vmatprep.subr.bf16.mxu0 %v5608_v38  ;;  %3116 = vmatprep.subr.bf16.mxu1 %v5609_v43  ;;  %v5614_v38 = vld [vmem:[%s6077_s14 + $0x260] ss:$16 sps:$4 sm:$0xff]   ;;  %v5615_v43 = vld [vmem:[%s6077_s14 + $0x268] ss:$16 sps:$4 sm:$0xff]  }
 0x1ba   : > { %2840 = vmatmul.mubr.bf16.gmra.mrb[16].mxu0 %v2756_v36  ;;  %3092 = vmatmul.mubr.bf16.gmra.mrb[16].mxu1 %v2756_v36  ;;  %v4750_v36 = vld [vmem:[%s6079_s15 + $0x198] sm:$0xff] }
 0x1bb   : > { %2865 = vmatpush1.bf16.msra.mxu0 %v5610_v33  ;;  %3117 = vmatpush1.bf16.msra.mxu1 %v5611_v18  ;;  %v5616_v33 = vld [vmem:[%s6077_s14 + $0x284] ss:$16 sps:$4 sm:$0xff]   ;;  %v5617_v18 = vld [vmem:[%s6077_s14 + $0x28c] ss:$16 sps:$4 sm:$0xff]  }
 0x1bc   : > { %2866 = vmatprep.subr.bf16.mxu0 %v5612_v19  ;;  %3118 = vmatprep.subr.bf16.mxu1 %v5613_v47  ;;  %v2751_v19 = vpack.c.bf16 %v4758_v46, %v4750_v36  ;;  %v5621_v47 = vld [vmem:[%s6077_s14 + $0x2ac] ss:$16 sps:$4 sm:$0xff]   ;;  %v5623_v36 = vld [vmem:[%s6077_s14 + $0x2a8] ss:$16 sps:$4 sm:$0xff]  }
 0x1bd   : > { %2849 = vmatprep.mubr.bf16.mxu0 %v2765_v50  ;;  %3101 = vmatprep.mubr.bf16.mxu1 %v2765_v50  ;;  %v5618_v50 = vld [vmem:[%s6077_s14 + $0x280] ss:$16 sps:$4 sm:$0xff]   ;;  %v5625_v46 = vld [vmem:[%s6077_s14 + $0x2cc] ss:$16 sps:$4 sm:$0xff]  }
 0x1bf   : > { %2867 = vmatpush1.bf16.msra.mxu0 %v5614_v38  ;;  %3119 = vmatpush1.bf16.msra.mxu1 %v5615_v43  ;;  %v5622_v38 = vld [vmem:[%s6077_s14 + $0x2a0] ss:$16 sps:$4 sm:$0xff]  }
 0x1c0   : > { %2868 = vmatprep.subr.bf16.mxu0 %v5616_v33  ;;  %3120 = vmatprep.subr.bf16.mxu1 %v5617_v18  ;;  %v5626_v43 = vld [vmem:[%s6077_s14 + $0x2c0] ss:$16 sps:$4 sm:$0xff]   ;;  %v5627_v33 = vld [vmem:[%s6077_s14 + $0x2c8] ss:$16 sps:$4 sm:$0xff]   ;;  %v5628_v18 = vld [vmem:[%s6077_s14 + $0x2e4] ss:$16 sps:$4 sm:$0xff]  }
 0x1c2   : > { %2850 = vmatmul.mubr.bf16.gmra.mrb[20].mxu0 %v2764_v37  ;;  %3102 = vmatmul.mubr.bf16.gmra.mrb[20].mxu1 %v2764_v37  ;;  %v5624_v37 = vld [vmem:[%s6077_s14 + $0x2c4] ss:$16 sps:$4 sm:$0xff]  }
 0x1c3   : > { %2869 = vmatpush1.bf16.msra.mxu0 %v5618_v50  ;;  %3121 = vmatpush1.bf16.msra.mxu1 %v5619_v29  ;;  %v5630_v50 = vld [vmem:[%s6077_s14 + $0x2e0] ss:$16 sps:$4 sm:$0xff]   ;;  %v5631_v29 = vld [vmem:[%s6077_s14 + $0x2e8] ss:$16 sps:$4 sm:$0xff]  }
 0x1c4   : > { %2870 = vmatprep.subr.bf16.mxu0 %v5620_v32  ;;  %3122 = vmatprep.subr.bf16.mxu1 %v5621_v47  ;;  %v5632_v32 = vld [vmem:[%s6077_s14 + $0x304] ss:$16 sps:$4 sm:$0xff]   ;;  %v5633_v47 = vld [vmem:[%s6077_s14 + $0x30c] ss:$16 sps:$4 sm:$0xff]  }
 0x1c5   : > { %2892 = vmatprep.mubr.bf16.mxu0 %v2751_v19  ;;  %3144 = vmatprep.mubr.bf16.mxu1 %v2751_v19  ;;  %v5629_v19 = vld [vmem:[%s6077_s14 + $0x2ec] ss:$16 sps:$4 sm:$0xff]  }
 0x1c7   : > { %2871 = vmatpush1.bf16.msra.mxu0 %v5622_v38  ;;  %3123 = vmatpush1.bf16.msra.mxu1 %v5623_v36  ;;  %v5634_v38 = vld [vmem:[%s6077_s14 + $0x300] ss:$16 sps:$4 sm:$0xff]   ;;  %v5635_v36 = vld [vmem:[%s6077_s14 + $0x308] ss:$16 sps:$4 sm:$0xff]  }
 0x1c8   : > { %2872 = vmatprep.subr.bf16.mxu0 %v5624_v37  ;;  %3124 = vmatprep.subr.bf16.mxu1 %v5625_v46  ;;  %v5636_v37 = vld [vmem:[%s6077_s14 + $0x324] ss:$16 sps:$4 sm:$0xff]   ;;  %v5637_v46 = vld [vmem:[%s6077_s14 + $0x32c] ss:$16 sps:$4 sm:$0xff]  }
 0x1cb   : > { %2873 = vmatpush1.bf16.msra.mxu0 %v5626_v43  ;;  %3125 = vmatpush1.bf16.msra.mxu1 %v5627_v33  ;;  %v5638_v43 = vld [vmem:[%s6077_s14 + $0x320] ss:$16 sps:$4 sm:$0xff]   ;;  %v5639_v33 = vld [vmem:[%s6077_s14 + $0x328] ss:$16 sps:$4 sm:$0xff]  }
 0x1cc   : > { %2874 = vmatprep.subr.bf16.mxu0 %v5628_v18  ;;  %3126 = vmatprep.subr.bf16.mxu1 %v5629_v19  ;;  %v5640_v18 = vld [vmem:[%s6077_s14 + $0x344] ss:$16 sps:$4 sm:$0xff]   ;;  %v5641_v19 = vld [vmem:[%s6077_s14 + $0x34c] ss:$16 sps:$4 sm:$0xff]  }
 0x1cf   : > { %2875 = vmatpush1.bf16.msra.mxu0 %v5630_v50  ;;  %3127 = vmatpush1.bf16.msra.mxu1 %v5631_v29  ;;  %v5642_v50 = vld [vmem:[%s6077_s14 + $0x340] ss:$16 sps:$4 sm:$0xff]   ;;  %v5643_v29 = vld [vmem:[%s6077_s14 + $0x348] ss:$16 sps:$4 sm:$0xff]  }
 0x1d0   : > { %2876 = vmatprep.subr.bf16.mxu0 %v5632_v32  ;;  %3128 = vmatprep.subr.bf16.mxu1 %v5633_v47  ;;  %v5644_v32 = vld [vmem:[%s6077_s14 + $0x364] ss:$16 sps:$4 sm:$0xff]   ;;  %v5645_v47 = vld [vmem:[%s6077_s14 + $0x36c] ss:$16 sps:$4 sm:$0xff]  }
 0x1d3   : > { %2877 = vmatpush1.bf16.msra.mxu0 %v5634_v38  ;;  %3129 = vmatpush1.bf16.msra.mxu1 %v5635_v36  ;;  %v5646_v38 = vld [vmem:[%s6077_s14 + $0x360] ss:$16 sps:$4 sm:$0xff]   ;;  %v5647_v36 = vld [vmem:[%s6077_s14 + $0x368] ss:$16 sps:$4 sm:$0xff]  }
 0x1d4   : > { %2878 = vmatprep.subr.bf16.mxu0 %v5636_v37  ;;  %3130 = vmatprep.subr.bf16.mxu1 %v5637_v46  ;;  %v5648_v37 = vld [vmem:[%s6077_s14 + $0x384] ss:$16 sps:$4 sm:$0xff]   ;;  %v5649_v46 = vld [vmem:[%s6077_s14 + $0x38c] ss:$16 sps:$4 sm:$0xff]  }
 0x1d7   : > { %2879 = vmatpush1.bf16.msra.mxu0 %v5638_v43  ;;  %3131 = vmatpush1.bf16.msra.mxu1 %v5639_v33  ;;  %v5650_v43 = vld [vmem:[%s6077_s14 + $0x380] ss:$16 sps:$4 sm:$0xff]   ;;  %v5651_v33 = vld [vmem:[%s6077_s14 + $0x388] ss:$16 sps:$4 sm:$0xff]  }
 0x1d8   : > { %2880 = vmatprep.subr.bf16.mxu0 %v5640_v18  ;;  %3132 = vmatprep.subr.bf16.mxu1 %v5641_v19  ;;  %v5652_v18 = vld [vmem:[%s6077_s14 + $0x3a4] ss:$16 sps:$4 sm:$0xff]   ;;  %v5653_v19 = vld [vmem:[%s6077_s14 + $0x3ac] ss:$16 sps:$4 sm:$0xff]  }
 0x1db   : > { %2881 = vmatpush1.bf16.msra.mxu0 %v5642_v50  ;;  %3133 = vmatpush1.bf16.msra.mxu1 %v5643_v29  ;;  %v5654_v50 = vld [vmem:[%s6077_s14 + $0x3a0] ss:$16 sps:$4 sm:$0xff]   ;;  %v5655_v29 = vld [vmem:[%s6077_s14 + $0x3a8] ss:$16 sps:$4 sm:$0xff]  }
 0x1dc   : > { %2882 = vmatprep.subr.bf16.mxu0 %v5644_v32  ;;  %3134 = vmatprep.subr.bf16.mxu1 %v5645_v47  ;;  %v5656_v32 = vld [vmem:[%s6077_s14 + $0x3c4] ss:$16 sps:$4 sm:$0xff]   ;;  %v5657_v47 = vld [vmem:[%s6077_s14 + $0x3cc] ss:$16 sps:$4 sm:$0xff]  }
 0x1df   : > { %2883 = vmatpush1.bf16.msra.mxu0 %v5646_v38  ;;  %3135 = vmatpush1.bf16.msra.mxu1 %v5647_v36  ;;  %v5658_v38 = vld [vmem:[%s6077_s14 + $0x3c0] ss:$16 sps:$4 sm:$0xff]   ;;  %v5659_v36 = vld [vmem:[%s6077_s14 + $0x3c8] ss:$16 sps:$4 sm:$0xff]  }
 0x1e0   : > { %2884 = vmatprep.subr.bf16.mxu0 %v5648_v37  ;;  %3136 = vmatprep.subr.bf16.mxu1 %v5649_v46  ;;  %v4749_v37 = vld [vmem:[%s6079_s15 + $0x190] sm:$0xff] }
 0x1e1   : > { %v4757_v46 = vld [vmem:[%s6079_s15 + $0x1d0] sm:$0xff] }
 0x1e3   : > { %2885 = vmatpush1.bf16.msra.mxu0 %v5650_v43  ;;  %3137 = vmatpush1.bf16.msra.mxu1 %v5651_v33  ;;  %v5660_v43 = vld [vmem:[%s6077_s14 + $0x3e4] ss:$16 sps:$4 sm:$0xff]   ;;  %v5661_v33 = vld [vmem:[%s6077_s14 + $0x3ec] ss:$16 sps:$4 sm:$0xff]  }
 0x1e4   : > { %2886 = vmatprep.subr.bf16.mxu0 %v5652_v18  ;;  %3138 = vmatprep.subr.bf16.mxu1 %v5653_v19  ;;  %v2750_v18 = vpack.c.bf16 %v4757_v46, %v4749_v37  ;;  %v4766_v19 = vld [vmem:[%s6079_s15 + $0x218] sm:$0xff]  ;;  %v5666_v37 = vld [vmem:[%s6077_s14 + $0x400] ss:$16 sps:$4 sm:$0xff]  }
 0x1e5   : > { %v5667_v46 = vld [vmem:[%s6077_s14 + $0x408] ss:$16 sps:$4 sm:$0xff]  }
 0x1e7   : > { %2887 = vmatpush1.bf16.msra.mxu0 %v5654_v50  ;;  %3139 = vmatpush1.bf16.msra.mxu1 %v5655_v29  ;;  %v4774_v50 = vld [vmem:[%s6079_s15 + $0x258] sm:$0xff]  ;;  %v5662_v29 = vld [vmem:[%s6077_s14 + $0x3e0] ss:$16 sps:$4 sm:$0xff]  }
 0x1e8   : > { %2888 = vmatprep.subr.bf16.mxu0 %v5656_v32  ;;  %3140 = vmatprep.subr.bf16.mxu1 %v5657_v47  ;;  %v5663_v32 = vld [vmem:[%s6077_s14 + $0x3e8] ss:$16 sps:$4 sm:$0xff]   ;;  %v5664_v47 = vld [vmem:[%s6077_s14 + $0x404] ss:$16 sps:$4 sm:$0xff]  }
 0x1eb   : > { %2889 = vmatpush1.bf16.msra.mxu0 %v5658_v38  ;;  %3141 = vmatpush1.bf16.msra.mxu1 %v5659_v36  ;;  %v5665_v38 = vld [vmem:[%s6077_s14 + $0x40c] ss:$16 sps:$4 sm:$0xff]   ;;  %v2759_v36 = vpack.c.bf16 %v4774_v50, %v4766_v19 }
 0x1ec   : > { %2890 = vmatprep.subr.bf16.mxu0 %v5660_v43  ;;  %3142 = vmatprep.subr.bf16.mxu1 %v5661_v33  ;;  %v4765_v43 = vld [vmem:[%s6079_s15 + $0x210] sm:$0xff]  ;;  %v4790_v50 = vld [vmem:[%s6079_s15 + $0x2d8] sm:$0x1f] }
 0x1ed   : > { %v4773_v33 = vld [vmem:[%s6079_s15 + $0x250] sm:$0xff] }
 0x1ee   : > { %v2758_v19 = vpack.c.bf16 %v4773_v33, %v4765_v43  ;;  %v5675_v43 = vld [vmem:[%s6077_s14 + $0x448] ss:$16 sps:$4 sm:$0xff]   ;;  %v4781_v33 = vld [vmem:[%s6079_s15 + $0x290] sm:$0xff] }
 0x1ef   : > { %2891 = vmatpush1.bf16.msra.mxu0 %v5662_v29  ;;  %3143 = vmatpush1.bf16.msra.mxu1 %v5663_v32  ;;  %v5668_v29 = vld [vmem:[%s6077_s14 + $0x424] ss:$16 sps:$4 sm:$0xff]   ;;  %v5669_v32 = vld [vmem:[%s6077_s14 + $0x42c] ss:$16 sps:$4 sm:$0xff]  }
 0x1f0   : > { %2923 = vmatprep.subr.bf16.mxu0 %v5664_v47  ;;  %3175 = vmatprep.subr.bf16.mxu1 %v5665_v38  ;;  %v5670_v47 = vld [vmem:[%s6077_s14 + $0x420] ss:$16 sps:$4 sm:$0xff]   ;;  %v5671_v38 = vld [vmem:[%s6077_s14 + $0x428] ss:$16 sps:$4 sm:$0xff]  }
 0x1f2   : > { %2893 = vmatmul.mubr.bf16.vlgmr.msra.gmra.mrb[12].mxu0 %v2750_v18  ;;  %3145 = vmatmul.mubr.bf16.vlgmr.msra.gmra.mrb[12].mxu1 %v2750_v18  ;;  %v4782_v18 = vld [vmem:[%s6079_s15 + $0x298] sm:$0xff] }
 0x1f3   : > { %2924 = vmatpush1.bf16.msra.mxu0 %v5666_v37  ;;  %3176 = vmatpush1.bf16.msra.mxu1 %v5667_v46  ;;  %v5672_v37 = vld [vmem:[%s6077_s14 + $0x444] ss:$16 sps:$4 sm:$0xff]   ;;  %v5673_v46 = vld [vmem:[%s6077_s14 + $0x44c] ss:$16 sps:$4 sm:$0xff]  }
 0x1f4   : > { %2925 = vmatprep.subr.bf16.mxu0 %v5668_v29  ;;  %3177 = vmatprep.subr.bf16.mxu1 %v5669_v32  ;;  %v2767_v29 = vpack.c.bf16 %v4790_v50, %v4782_v18  ;;  %v4789_v32 = vld [vmem:[%s6079_s15 + $0x2d0] sm:$0x1f]  ;;  %v4760_v50 = vld [vmem:[%s6079_s15 + $0x1e8] sm:$0xff] }
 0x1f5   : > { %2902 = vmatprep.mubr.bf16.mxu0 %v2759_v36  ;;  %3154 = vmatprep.mubr.bf16.mxu1 %v2759_v36  ;;  %v5674_v36 = vld [vmem:[%s6077_s14 + $0x440] ss:$16 sps:$4 sm:$0xff]   ;;  %v2766_v18 = vpack.c.bf16 %v4789_v32, %v4781_v33  ;;  %v5683_v33 = vld [vmem:[%s6077_s14 + $0x488] ss:$16 sps:$4 sm:$0xff]   ;;  %v5684_v32 = vld [vmem:[%s6077_s14 + $0x4a4] ss:$16 sps:$4 sm:$0xff]  }
 0x1f7   : > { %2926 = vmatpush1.bf16.msra.mxu0 %v5670_v47  ;;  %3178 = vmatpush1.bf16.msra.mxu1 %v5671_v38  ;;  %v5676_v47 = vld [vmem:[%s6077_s14 + $0x464] ss:$16 sps:$4 sm:$0xff]   ;;  %v5677_v38 = vld [vmem:[%s6077_s14 + $0x46c] ss:$16 sps:$4 sm:$0xff]  }
 0x1f8   : > { %2927 = vmatprep.subr.bf16.mxu0 %v5672_v37  ;;  %3179 = vmatprep.subr.bf16.mxu1 %v5673_v46  ;;  %v5678_v37 = vld [vmem:[%s6077_s14 + $0x460] ss:$16 sps:$4 sm:$0xff]   ;;  %v5679_v46 = vld [vmem:[%s6077_s14 + $0x468] ss:$16 sps:$4 sm:$0xff]  }
 0x1fa   : > { %2903 = vmatmul.mubr.bf16.gmra.mrb[16].mxu0 %v2758_v19  ;;  %3155 = vmatmul.mubr.bf16.gmra.mrb[16].mxu1 %v2758_v19  ;;  %v4752_v19 = vld [vmem:[%s6079_s15 + $0x1a8] sm:$0xff] }
 0x1fb   : > { %2928 = vmatpush1.bf16.msra.mxu0 %v5674_v36  ;;  %3180 = vmatpush1.bf16.msra.mxu1 %v5675_v43  ;;  %v5680_v36 = vld [vmem:[%s6077_s14 + $0x484] ss:$16 sps:$4 sm:$0xff]   ;;  %v5681_v43 = vld [vmem:[%s6077_s14 + $0x48c] ss:$16 sps:$4 sm:$0xff]  }
 0x1fc   : > { %2929 = vmatprep.subr.bf16.mxu0 %v5676_v47  ;;  %3181 = vmatprep.subr.bf16.mxu1 %v5677_v38  ;;  %v2753_v47 = vpack.c.bf16 %v4760_v50, %v4752_v19  ;;  %v5685_v38 = vld [vmem:[%s6077_s14 + $0x4ac] ss:$16 sps:$4 sm:$0xff]   ;;  %v5687_v19 = vld [vmem:[%s6077_s14 + $0x4a8] ss:$16 sps:$4 sm:$0xff]  }
 0x1fd   : > { %2912 = vmatprep.mubr.bf16.mxu0 %v2767_v29  ;;  %3164 = vmatprep.mubr.bf16.mxu1 %v2767_v29  ;;  %v5682_v29 = vld [vmem:[%s6077_s14 + $0x480] ss:$16 sps:$4 sm:$0xff]   ;;  %v5689_v50 = vld [vmem:[%s6077_s14 + $0x4cc] ss:$16 sps:$4 sm:$0xff]  }
 0x1ff   : > { %2930 = vmatpush1.bf16.msra.mxu0 %v5678_v37  ;;  %3182 = vmatpush1.bf16.msra.mxu1 %v5679_v46  ;;  %v5686_v37 = vld [vmem:[%s6077_s14 + $0x4a0] ss:$16 sps:$4 sm:$0xff]  }
 0x200   : > { %2931 = vmatprep.subr.bf16.mxu0 %v5680_v36  ;;  %3183 = vmatprep.subr.bf16.mxu1 %v5681_v43  ;;  %v5690_v46 = vld [vmem:[%s6077_s14 + $0x4c0] ss:$16 sps:$4 sm:$0xff]   ;;  %v5691_v36 = vld [vmem:[%s6077_s14 + $0x4c8] ss:$16 sps:$4 sm:$0xff]   ;;  %v5692_v43 = vld [vmem:[%s6077_s14 + $0x4e4] ss:$16 sps:$4 sm:$0xff]  }
 0x202   : > { %2913 = vmatmul.mubr.bf16.gmra.mrb[20].mxu0 %v2766_v18  ;;  %3165 = vmatmul.mubr.bf16.gmra.mrb[20].mxu1 %v2766_v18  ;;  %v5688_v18 = vld [vmem:[%s6077_s14 + $0x4c4] ss:$16 sps:$4 sm:$0xff]  }
 0x203   : > { %2932 = vmatpush1.bf16.msra.mxu0 %v5682_v29  ;;  %3184 = vmatpush1.bf16.msra.mxu1 %v5683_v33  ;;  %v5693_v29 = vld [vmem:[%s6077_s14 + $0x4ec] ss:$16 sps:$4 sm:$0xff]   ;;  %v5695_v33 = vld [vmem:[%s6077_s14 + $0x4e8] ss:$16 sps:$4 sm:$0xff]  }
 0x204   : > { %2933 = vmatprep.subr.bf16.mxu0 %v5684_v32  ;;  %3185 = vmatprep.subr.bf16.mxu1 %v5685_v38  ;;  %v5696_v32 = vld [vmem:[%s6077_s14 + $0x504] ss:$16 sps:$4 sm:$0xff]   ;;  %v854_v38 = vld [vmem:[#allocation2 + $0x58] sm:$0xff] }
 0x205   : > { %2955 = vmatprep.mubr.bf16.mxu0 %v2753_v47  ;;  %3207 = vmatprep.mubr.bf16.mxu1 %v2753_v47  ;;  %v5694_v47 = vld [vmem:[%s6077_s14 + $0x4e0] ss:$16 sps:$4 sm:$0xff]  }
 0x207   : > { %2934 = vmatpush1.bf16.msra.mxu0 %v5686_v37  ;;  %3186 = vmatpush1.bf16.msra.mxu1 %v5687_v19  ;;  %v7822_v37 = vld [vmem:[#allocation11_spill] sm:$0xff]  ;;  %v7823_v19 = vld [vmem:[#allocation12_spill] sm:$0xff] }
 0x208   : > { %2935 = vmatprep.subr.bf16.mxu0 %v5688_v18  ;;  %3187 = vmatprep.subr.bf16.mxu1 %v5689_v50 }
 0x20b   : > { %2936 = vmatpush1.bf16.msra.mxu0 %v5690_v46  ;;  %3188 = vmatpush1.bf16.msra.mxu1 %v5691_v36  ;;  %v855_v46 = vld [vmem:[#allocation2 + $0x60] sm:$0xff]  ;;  %v857_v36 = vld [vmem:[#allocation2 + $0x70] sm:$0xff] }
 0x20c   : > { %2937 = vmatprep.subr.bf16.mxu0 %v5692_v43  ;;  %3189 = vmatprep.subr.bf16.mxu1 %v5693_v29 }
 0x20f   : > { %2938 = vmatpush1.bf16.msra.mxu0 %v5694_v47  ;;  %3190 = vmatpush1.bf16.msra.mxu1 %v5695_v33 }
 0x210   : > { %2939 = vmatprep.subr.bf16.mxu0 %v5696_v32  ;;  %3191 = vmatprep.subr.bf16.mxu1 %v6273_v51  ;;  %v4751_v51 = vld [vmem:[%s6079_s15 + $0x1a0] sm:$0xff]  ;;  %v856_v32 = vld [vmem:[#allocation2 + $0x68] sm:$0xff] }
 0x213   : > { %2940 = vmatpush1.bf16.msra.mxu0 %v6276_v52  ;;  %3192 = vmatpush1.bf16.msra.mxu1 %v6279_v53  ;;  %v4759_v52 = vld [vmem:[%s6079_s15 + $0x1e0] sm:$0xff] }
 0x214   : > { %2941 = vmatprep.subr.bf16.mxu0 %v6282_v54  ;;  %3193 = vmatprep.subr.bf16.mxu1 %v6286_v55  ;;  %v2752_v53 = vpack.c.bf16 %v4759_v52, %v4751_v51  ;;  %v4768_v54 = vld [vmem:[%s6079_s15 + $0x228] sm:$0xff]  ;;  %v858_v51 = vld [vmem:[#allocation2 + $0x78] sm:$0xff] }
 0x215   : > { %v4776_v55 = vld [vmem:[%s6079_s15 + $0x268] sm:$0xff] }
 0x217   : > { %2942 = vmatpush1.bf16.msra.mxu0 %v6289_v56  ;;  %3194 = vmatpush1.bf16.msra.mxu1 %v6292_v57  ;;  %v2761_v56 = vpack.c.bf16 %v4776_v55, %v4768_v54  ;;  %v4767_v57 = vld [vmem:[%s6079_s15 + $0x220] sm:$0xff] }
 0x218   : > { %2943 = vmatprep.subr.bf16.mxu0 %v6297_v58  ;;  %3195 = vmatprep.subr.bf16.mxu1 %v6302_v59  ;;  %v4775_v58 = vld [vmem:[%s6079_s15 + $0x260] sm:$0xff] }
 0x219   : > { %v2760_v59 = vpack.c.bf16 %v4775_v58, %v4767_v57  ;;  %v7825_v57 = vld [vmem:[#allocation14_spill] sm:$0xff] }
 0x21b   : > { %2944 = vmatpush1.bf16.msra.mxu0 %v6305_v60  ;;  %3196 = vmatpush1.bf16.msra.mxu1 %v6310_v61  ;;  %v4784_v60 = vld [vmem:[%s6079_s15 + $0x2a8] sm:$0xff] }
 0x21c   : > { %2945 = vmatprep.subr.bf16.mxu0 %v6315_v62  ;;  %3197 = vmatprep.subr.bf16.mxu1 %v6318_v63  ;;  %v4792_v61 = vld [vmem:[%s6079_s15 + $0x2e8] sm:$0x1f]  ;;  %v4783_v63 = vld [vmem:[%s6079_s15 + $0x2a0] sm:$0xff] }
 0x21d   : > { %v2769_v62 = vpack.c.bf16 %v4792_v61, %v4784_v60 }
 0x21f   : > { %2946 = vmatpush1.bf16.msra.mxu0 %v6321_v0  ;;  %3198 = vmatpush1.bf16.msra.mxu1 %v6324_v1  ;;  %v4791_v0 = vld [vmem:[%s6079_s15 + $0x2e0] sm:$0x1f] }
 0x220   : > { %2947 = vmatprep.subr.bf16.mxu0 %v6329_v2  ;;  %3199 = vmatprep.subr.bf16.mxu1 %v6334_v3  ;;  %v2768_v1 = vpack.c.bf16 %v4791_v0, %v4783_v63  ;;  %v4754_v2 = vld [vmem:[%s6079_s15 + $0x1b8] sm:$0xff]  ;;  %v7827_v63 = vld [vmem:[#allocation16_spill] sm:$0xff] }
 0x221   : > { %v4762_v3 = vld [vmem:[%s6079_s15 + $0x1f8] sm:$0xff] }
 0x223   : > { %2948 = vmatpush1.bf16.msra.mxu0 %v6339_v4  ;;  %3200 = vmatpush1.bf16.msra.mxu1 %v6342_v5  ;;  %v2755_v4 = vpack.c.bf16 %v4762_v3, %v4754_v2  ;;  %v843_v5 = vld [vmem:[#allocation2] sm:$0xff]  ;;  %v7828_v2 = vld [vmem:[#allocation17_spill] sm:$0xff]  ;;  %v7829_v3 = vld [vmem:[#allocation18_spill] sm:$0xff] }
 0x224   : > { %2949 = vmatprep.subr.bf16.mxu0 %v6345_v6  ;;  %3201 = vmatprep.subr.bf16.mxu1 %v6350_v7  ;;  %v845_v6 = vld [vmem:[#allocation2 + $0x10] sm:$0xff]  ;;  %v844_v7 = vld [vmem:[#allocation2 + $0x8] sm:$0xff] }
 0x227   : > { %2950 = vmatpush1.bf16.msra.mxu0 %v6353_v8  ;;  %3202 = vmatpush1.bf16.msra.mxu1 %v6356_v9  ;;  %v846_v8 = vld [vmem:[#allocation2 + $0x18] sm:$0xff]  ;;  %v7815_v9 = vld [vmem:[#allocation4_spill] sm:$0xff] }
 0x228   : > { %2951 = vmatprep.subr.bf16.mxu0 %v6361_v10  ;;  %3203 = vmatprep.subr.bf16.mxu1 %v6366_v11 }
 0x22b   : > { %2952 = vmatpush1.bf16.msra.mxu0 %v6371_v12  ;;  %3204 = vmatpush1.bf16.msra.mxu1 %v6374_v13  ;;  %v847_v12 = vld [vmem:[#allocation2 + $0x20] sm:$0xff]  ;;  %v849_v13 = vld [vmem:[#allocation2 + $0x30] sm:$0xff] }
 0x22c   : > { %2953 = vmatprep.subr.bf16.mxu0 %v6379_v14  ;;  %3205 = vmatprep.subr.bf16.mxu1 %v6382_v15 }
 0x22f   : > { %2954 = vmatpush1.bf16.msra.mxu0 %v6385_v16  ;;  %3206 = vmatpush1.bf16.msra.mxu1 %v6390_v17 }
 0x230   : > { %2986 = vmatprep.subr.bf16.mxu0 %v6397_v20  ;;  %3238 = vmatprep.subr.bf16.mxu1 %v6400_v21  ;;  %v848_v20 = vld [vmem:[#allocation2 + $0x28] sm:$0xff]  ;;  %v850_v21 = vld [vmem:[#allocation2 + $0x38] sm:$0xff] }
 0x232   : > { %2956 = vmatmul.mubr.bf16.vlgmr.msra.gmra.mrb[12].mxu0 %v2752_v53  ;;  %3208 = vmatmul.mubr.bf16.vlgmr.msra.gmra.mrb[12].mxu1 %v2752_v53 }
 0x233   : > { %2987 = vmatpush1.bf16.msra.mxu0 %v6407_v25  ;;  %3239 = vmatpush1.bf16.msra.mxu1 %v6410_v26 }
 0x234   : > { %2988 = vmatprep.subr.bf16.mxu0 %v6415_v27  ;;  %3240 = vmatprep.subr.bf16.mxu1 %v6418_v28 }
 0x235   : > { %2965 = vmatprep.mubr.bf16.mxu0 %v2761_v56  ;;  %3217 = vmatprep.mubr.bf16.mxu1 %v2761_v56  ;;  %v7824_v56 = vld [vmem:[#allocation13_spill] sm:$0xff] }
 0x237   : > { %2989 = vmatpush1.bf16.msra.mxu0 %v6421_v30  ;;  %3241 = vmatpush1.bf16.msra.mxu1 %v6426_v31  ;;  %v7816_v30 = vld [vmem:[#allocation5_spill] sm:$0xff]  ;;  %v7817_v31 = vld [vmem:[#allocation6_spill] sm:$0xff] }
 0x238   : > { %2990 = vmatprep.subr.bf16.mxu0 %v6433_v34  ;;  %3242 = vmatprep.subr.bf16.mxu1 %v6436_v35 }
 0x23a   : > { %2966 = vmatmul.mubr.bf16.gmra.mrb[16].mxu0 %v2760_v59  ;;  %3218 = vmatmul.mubr.bf16.gmra.mrb[16].mxu1 %v2760_v59 }
 0x23b   : > { %2991 = vmatpush1.bf16.msra.mxu0 %v6443_v39  ;;  %3243 = vmatpush1.bf16.msra.mxu1 %v6446_v40 }
 0x23c   : > { %2992 = vmatprep.subr.bf16.mxu0 %v6451_v41  ;;  %3244 = vmatprep.subr.bf16.mxu1 %v6454_v42  ;;  %v7818_v41 = vld [vmem:[#allocation7_spill] sm:$0xff]  ;;  %v7819_v42 = vld [vmem:[#allocation8_spill] sm:$0xff] }
 0x23d   : > { %2975 = vmatprep.mubr.bf16.mxu0 %v2769_v62  ;;  %3227 = vmatprep.mubr.bf16.mxu1 %v2769_v62  ;;  %v7826_v62 = vld [vmem:[#allocation15_spill] sm:$0xff] }
 0x23f   : > { %2993 = vmatpush1.bf16.msra.mxu0 %v6457_v44  ;;  %3245 = vmatpush1.bf16.msra.mxu1 %v6462_v45 }
 0x240   : > { %2994 = vmatprep.subr.bf16.mxu0 %v6469_v48  ;;  %3246 = vmatprep.subr.bf16.mxu1 %v6472_v49  ;;  %v7820_v48 = vld [vmem:[#allocation9_spill] sm:$0xff]  ;;  %v7821_v49 = vld [vmem:[#allocation10_spill] sm:$0xff] }
 0x242   : > { %2976 = vmatmul.mubr.bf16.gmra.mrb[20].mxu0 %v2768_v1  ;;  %3228 = vmatmul.mubr.bf16.gmra.mrb[20].mxu1 %v2768_v1 }
 0x243   : > { %2995 = vmatpush1.bf16.msra.mxu0 %v6479_v22  ;;  %3247 = vmatpush1.bf16.msra.mxu1 %v6482_v23  ;;  %v851_v22 = vld [vmem:[#allocation2 + $0x40] sm:$0xff]  ;;  %v853_v23 = vld [vmem:[#allocation2 + $0x50] sm:$0xff] }
 0x244   : > { %2996 = vmatprep.subr.bf16.mxu0 %v6487_v24  ;;  %3248 = vmatprep.subr.bf16.mxu1 %v7815_v9  ;;  %v852_v24 = vld [vmem:[#allocation2 + $0x48] sm:$0xff]  ;;  %v7831_v9 = vld [vmem:[#allocation20_spill] sm:$0xff] }
 0x245   : > { %v2370_v10 = vpop.f32.mrb[0].mxu0  ;;  %v2622_v11 = vpop.f32.mrb[0].mxu1  ;;  %3018 = vmatprep.mubr.bf16.mxu0 %v2755_v4  ;;  %3270 = vmatprep.mubr.bf16.mxu1 %v2755_v4  ;;  %v859_v4 = vld [vmem:[#allocation2 + $0x80] sm:$0xff] }
 0x246   : > { %v2651_v14 = vadd.f32 %v2370_v10, %v843_v5  ;;  %v2653_v15 = vadd.f32 %v2622_v11, %v845_v6  ;;  %v2372_v16 = vpop.f32.mrb[1].mxu0  ;;  %v2624_v17 = vpop.f32.mrb[1].mxu1  ;;  %v861_v5 = vld [vmem:[#allocation2 + $0x90] sm:$0xff]  ;;  %v860_v6 = vld [vmem:[#allocation2 + $0x88] sm:$0xff] }
 0x247   : > { %v2652_v25 = vadd.f32 %v2372_v16, %v844_v7  ;;  %v2654_v26 = vadd.f32 %v2624_v17, %v846_v8  ;;  %v2374_v27 = vpop.f32.mrb[2].mxu0  ;;  %v2626_v28 = vpop.f32.mrb[2].mxu1  ;;  %2997 = vmatpush1.bf16.msra.mxu0 %v7816_v30  ;;  %3249 = vmatpush1.bf16.msra.mxu1 %v7817_v31  ;;  %v862_v7 = vld [vmem:[#allocation2 + $0x98] sm:$0xff]  ;;  %v7832_v30 = vld [vmem:[#allocation21_spill] sm:$0xff]  ;;  %v7833_v31 = vld [vmem:[#allocation22_spill] sm:$0xff] }
 0x248   : > { %2675 = vst [vmem:[#allocation2] sm:$0xff] %v2651_v14  ;;  %2677 = vst [vmem:[#allocation2 + $0x10] sm:$0xff] %v2653_v15  ;;  %v2655_v34 = vadd.f32 %v2374_v27, %v847_v12  ;;  %v2657_v35 = vadd.f32 %v2626_v28, %v849_v13  ;;  %v2376_v39 = vpop.f32.mrb[3].mxu0  ;;  %v2628_v40 = vpop.f32.mrb[3].mxu1  ;;  %2998 = vmatprep.subr.bf16.mxu0 %v7818_v41  ;;  %3250 = vmatprep.subr.bf16.mxu1 %v7819_v42  ;;  %v7830_v8 = vld [vmem:[#allocation19_spill] sm:$0xff]  ;;  %v7835_v42 = vld [vmem:[#allocation24_spill] sm:$0xff] }
 0x249   : > { %2676 = vst [vmem:[#allocation2 + $0x8] sm:$0xff] %v2652_v25  ;;  %2678 = vst [vmem:[#allocation2 + $0x18] sm:$0xff] %v2654_v26  ;;  %v2656_v44 = vadd.f32 %v2376_v39, %v848_v20  ;;  %v2658_v45 = vadd.f32 %v2628_v40, %v850_v21  ;;  %v863_v12 = vld [vmem:[#allocation2 + $0xa0] sm:$0x1f]  ;;  %v865_v13 = vld [vmem:[#allocation2 + $0xb0] sm:$0x1f] }
 0x24a   : > { %2679 = vst [vmem:[#allocation2 + $0x20] sm:$0xff] %v2655_v34  ;;  %2681 = vst [vmem:[#allocation2 + $0x30] sm:$0xff] %v2657_v35  ;;  %v864_v20 = vld [vmem:[#allocation2 + $0xa8] sm:$0x1f]  ;;  %v866_v21 = vld [vmem:[#allocation2 + $0xb8] sm:$0x1f] }
 0x24b   : > { %2680 = vst [vmem:[#allocation2 + $0x28] sm:$0xff] %v2656_v44  ;;  %2682 = vst [vmem:[#allocation2 + $0x38] sm:$0xff] %v2658_v45  ;;  %2999 = vmatpush1.bf16.msra.mxu0 %v7820_v48  ;;  %3251 = vmatpush1.bf16.msra.mxu1 %v7821_v49  ;;  %v7834_v41 = vld [vmem:[#allocation23_spill] sm:$0xff]  ;;  %v7836_v48 = vld [vmem:[#allocation25_spill] sm:$0xff] }
 0x24c   : > { %3000 = vmatprep.subr.bf16.mxu0 %v7822_v37  ;;  %3252 = vmatprep.subr.bf16.mxu1 %v7823_v19  ;;  %v7837_v49 = vld [vmem:[#allocation26_spill] sm:$0xff]  ;;  %v7842_v37 = vld [vmem:[#allocation31_spill] sm:$0xff]  ;;  %v7843_v19 = vld [vmem:[#allocation32_spill] sm:$0xff] }
 0x24d   : > { %v2380_v18 = vpop.f32.mrb[4].mxu0  ;;  %v2632_v50 = vpop.f32.mrb[4].mxu1 }
 0x24e   : > { %v2659_v43 = vadd.f32 %v2380_v18, %v851_v22  ;;  %v2661_v29 = vadd.f32 %v2632_v50, %v853_v23  ;;  %v2382_v47 = vpop.f32.mrb[5].mxu0  ;;  %v2634_v33 = vpop.f32.mrb[5].mxu1  ;;  %v7838_v22 = vld [vmem:[#allocation27_spill] sm:$0xff]  ;;  %v7839_v23 = vld [vmem:[#allocation28_spill] sm:$0xff]  ;;  %v7844_v18 = vld [vmem:[#allocation33_spill] sm:$0xff] }
 0x24f   : > { %v2660_v52 = vadd.f32 %v2382_v47, %v852_v24  ;;  %v2662_v53 = vadd.f32 %v2634_v33, %v854_v38  ;;  %v2384_v54 = vpop.f32.mrb[6].mxu0  ;;  %v2636_v55 = vpop.f32.mrb[6].mxu1  ;;  %3001 = vmatpush1.bf16.msra.mxu0 %v7824_v56  ;;  %3253 = vmatpush1.bf16.msra.mxu1 %v7825_v57  ;;  %v7840_v24 = vld [vmem:[#allocation29_spill] sm:$0xff]  ;;  %v7841_v38 = vld [vmem:[#allocation30_spill] sm:$0xff]  ;;  %v7850_v47 = vld [vmem:[#allocation39_spill] sm:$0xff] }
 0x250   : > { %2683 = vst [vmem:[#allocation2 + $0x40] sm:$0xff] %v2659_v43  ;;  %2685 = vst [vmem:[#allocation2 + $0x50] sm:$0xff] %v2661_v29  ;;  %v2663_v58 = vadd.f32 %v2384_v54, %v855_v46  ;;  %v2665_v59 = vadd.f32 %v2636_v55, %v857_v36  ;;  %v2386_v60 = vpop.f32.mrb[7].mxu0  ;;  %v2638_v61 = vpop.f32.mrb[7].mxu1  ;;  %3002 = vmatprep.subr.bf16.mxu0 %v7826_v62  ;;  %3254 = vmatprep.subr.bf16.mxu1 %v7827_v63  ;;  %v7845_v50 = vld [vmem:[#allocation34_spill] sm:$0xff]  ;;  %v7846_v46 = vld [vmem:[#allocation35_spill] sm:$0xff] }
 0x251   : > { %2684 = vst [vmem:[#allocation2 + $0x48] sm:$0xff] %v2660_v52  ;;  %2686 = vst [vmem:[#allocation2 + $0x58] sm:$0xff] %v2662_v53  ;;  %v2664_v0 = vadd.f32 %v2386_v60, %v856_v32  ;;  %v2666_v1 = vadd.f32 %v2638_v61, %v858_v51  ;;  %v7847_v36 = vld [vmem:[#allocation36_spill] sm:$0xff]  ;;  %v7848_v43 = vld [vmem:[#allocation37_spill] sm:$0xff] }
 0x252   : > { %2687 = vst [vmem:[#allocation2 + $0x60] sm:$0xff] %v2663_v58  ;;  %2689 = vst [vmem:[#allocation2 + $0x70] sm:$0xff] %v2665_v59  ;;  %v7849_v29 = vld [vmem:[#allocation38_spill] sm:$0xff]  ;;  %v7851_v33 = vld [vmem:[#allocation40_spill] sm:$0xff] }
 0x253   : > { %2688 = vst [vmem:[#allocation2 + $0x68] sm:$0xff] %v2664_v0  ;;  %2690 = vst [vmem:[#allocation2 + $0x78] sm:$0xff] %v2666_v1  ;;  %3003 = vmatpush1.bf16.msra.mxu0 %v7828_v2  ;;  %3255 = vmatpush1.bf16.msra.mxu1 %v7829_v3  ;;  %v7852_v32 = vld [vmem:[#allocation41_spill] sm:$0xff]  ;;  %v7853_v51 = vld [vmem:[#allocation42_spill] sm:$0xff] }
 0x254   : > { %3004 = vmatprep.subr.bf16.mxu0 %v7830_v8  ;;  %3256 = vmatprep.subr.bf16.mxu1 %v7831_v9  ;;  %v4753_v52 = vld [vmem:[%s6079_s15 + $0x1b0] sm:$0xff]  ;;  %v7854_v54 = vld [vmem:[#allocation43_spill] sm:$0xff]  ;;  %v7855_v55 = vld [vmem:[#allocation44_spill] sm:$0xff] }
 0x255   : > { %v2390_v10 = vpop.f32.mrb[8].mxu0  ;;  %v2642_v11 = vpop.f32.mrb[8].mxu1  ;;  %v4761_v53 = vld [vmem:[%s6079_s15 + $0x1f0] sm:$0xff]  ;;  %v4770_v56 = vld [vmem:[%s6079_s15 + $0x238] sm:$0xff]  ;;  %v7856_v59 = vld [vmem:[#allocation45_spill] sm:$0xff] }
 0x256   : > { %v2667_v14 = vadd.f32 %v2390_v10, %v859_v4  ;;  %v2669_v15 = vadd.f32 %v2642_v11, %v861_v5  ;;  %v2392_v16 = vpop.f32.mrb[9].mxu0  ;;  %v2644_v17 = vpop.f32.mrb[9].mxu1  ;;  %v4778_v57 = vld [vmem:[%s6079_s15 + $0x278] sm:$0xff]  ;;  %v2754_v58 = vpack.c.bf16 %v4761_v53, %v4753_v52  ;;  %v7857_v60 = vld [vmem:[#allocation46_spill] sm:$0xff]  ;;  %v2774_v9 = vld [vmem:[#allocation2 + $0xc8] sm:$0xff] }
 0x257   : > { %v2668_v25 = vadd.f32 %v2392_v16, %v860_v6  ;;  %v2670_v26 = vadd.f32 %v2644_v17, %v862_v7  ;;  %v2394_v27 = vpop.f32.mrb[10].mxu0  ;;  %v2646_v28 = vpop.f32.mrb[10].mxu1  ;;  %3005 = vmatpush1.bf16.msra.mxu0 %v7832_v30  ;;  %3257 = vmatpush1.bf16.msra.mxu1 %v7833_v31  ;;  %v2763_v61 = vpack.c.bf16 %v4778_v57, %v4770_v56  ;;  %v4769_v62 = vld [vmem:[%s6079_s15 + $0x230] sm:$0xff]  ;;  %v4786_v0 = vld [vmem:[%s6079_s15 + $0x2b8] sm:$0xff]  ;;  %v2773_v7 = vld [vmem:[#allocation2 + $0xc0] sm:$0xff] }
 0x258   : > { %2691 = vst [vmem:[#allocation2 + $0x80] sm:$0xff] %v2667_v14  ;;  %2693 = vst [vmem:[#allocation2 + $0x90] sm:$0xff] %v2669_v15  ;;  %v2671_v34 = vadd.f32 %v2394_v27, %v863_v12  ;;  %v2673_v35 = vadd.f32 %v2646_v28, %v865_v13  ;;  %v2396_v39 = vpop.f32.mrb[11].mxu0  ;;  %v2648_v40 = vpop.f32.mrb[11].mxu1  ;;  %3006 = vmatprep.subr.bf16.mxu0 %v7834_v41  ;;  %3258 = vmatprep.subr.bf16.mxu1 %v7835_v42  ;;  %v4777_v63 = vld [vmem:[%s6079_s15 + $0x270] sm:$0xff]  ;;  %v2776_v10 = vld [vmem:[#allocation2 + $0xd8] sm:$0xff] }
 0x259   : > { %2692 = vst [vmem:[#allocation2 + $0x88] sm:$0xff] %v2668_v25  ;;  %2694 = vst [vmem:[#allocation2 + $0x98] sm:$0xff] %v2670_v26  ;;  %v2672_v44 = vadd.f32 %v2396_v39, %v864_v20  ;;  %v2674_v45 = vadd.f32 %v2648_v40, %v866_v21  ;;  %v4794_v1 = vld [vmem:[%s6079_s15 + $0x2f8] sm:$0x1f]  ;;  %v2762_v2 = vpack.c.bf16 %v4777_v63, %v4769_v62  ;;  %v4785_v4 = vld [vmem:[%s6079_s15 + $0x2b0] sm:$0xff] }
 0x25a   : > { %2695 = vst [vmem:[#allocation2 + $0xa0] sm:$0x1f] %v2671_v34  ;;  %2697 = vst [vmem:[#allocation2 + $0xb0] sm:$0x1f] %v2673_v35  ;;  %v2771_v3 = vpack.c.bf16 %v4794_v1, %v4786_v0  ;;  %v4793_v5 = vld [vmem:[%s6079_s15 + $0x2f0] sm:$0x1f] }
 0x25b   : > { %2696 = vst [vmem:[#allocation2 + $0xa8] sm:$0x1f] %v2672_v44  ;;  %2698 = vst [vmem:[#allocation2 + $0xb8] sm:$0x1f] %v2674_v45  ;;  %3007 = vmatpush1.bf16.msra.mxu0 %v7836_v48  ;;  %3259 = vmatpush1.bf16.msra.mxu1 %v7837_v49  ;;  %v2770_v6 = vpack.c.bf16 %v4793_v5, %v4785_v4  ;;  %v2775_v8 = vld [vmem:[#allocation2 + $0xd0] sm:$0xff]  ;;  %v2777_v13 = vld [vmem:[#allocation2 + $0xe0] sm:$0xff] }
 0x25c   : > { %3008 = vmatprep.subr.bf16.mxu0 %v7838_v22  ;;  %3260 = vmatprep.subr.bf16.mxu1 %v7839_v23  ;;  %v2779_v14 = vld [vmem:[#allocation2 + $0xf0] sm:$0xff]  ;;  %v2778_v21 = vld [vmem:[#allocation2 + $0xe8] sm:$0xff]  ;;  %v2780_v25 = vld [vmem:[#allocation2 + $0xf8] sm:$0xff] }
 0x25d   : > { %v2781_v42 = vld [vmem:[#allocation2 + $0x100] sm:$0xff]  ;;  %v2783_v44 = vld [vmem:[#allocation2 + $0x110] sm:$0xff]  ;;  %v2782_v45 = vld [vmem:[#allocation2 + $0x108] sm:$0xff] }
 0x25e   : > { %v2784_v48 = vld [vmem:[#allocation2 + $0x118] sm:$0xff]  ;;  %v2785_v23 = vld [vmem:[#allocation2 + $0x120] sm:$0xff]  ;;  %v2791_v56 = vld [vmem:[#allocation2 + $0x150] sm:$0xff] }
 0x25f   : > { %3009 = vmatpush1.bf16.msra.mxu0 %v7840_v24  ;;  %3261 = vmatpush1.bf16.msra.mxu1 %v7841_v38  ;;  %v2787_v24 = vld [vmem:[#allocation2 + $0x130] sm:$0xff]  ;;  %v2790_v57 = vld [vmem:[#allocation2 + $0x148] sm:$0xff]  ;;  %v2796_v4 = vld [vmem:[#allocation2 + $0x178] sm:$0x1f] }
 0x260   : > { %3010 = vmatprep.subr.bf16.mxu0 %v7842_v37  ;;  %3262 = vmatprep.subr.bf16.mxu1 %v7843_v19  ;;  %v2795_v62 = vld [vmem:[#allocation2 + $0x170] sm:$0x1f] }
 0x263   : > { %3011 = vmatpush1.bf16.msra.mxu0 %v7844_v18  ;;  %3263 = vmatpush1.bf16.msra.mxu1 %v7845_v50  ;;  %v2786_v50 = vld [vmem:[#allocation2 + $0x128] sm:$0xff] }
 0x264   : > { %3012 = vmatprep.subr.bf16.mxu0 %v7846_v46  ;;  %3264 = vmatprep.subr.bf16.mxu1 %v7847_v36  ;;  %v2788_v46 = vld [vmem:[#allocation2 + $0x138] sm:$0xff] }
 0x267   : > { %3013 = vmatpush1.bf16.msra.mxu0 %v7848_v43  ;;  %3265 = vmatpush1.bf16.msra.mxu1 %v7849_v29 }
 0x268   : > { %3014 = vmatprep.subr.bf16.mxu0 %v7850_v47  ;;  %3266 = vmatprep.subr.bf16.mxu1 %v7851_v33 }
 0x26b   : > { %3015 = vmatpush1.bf16.msra.mxu0 %v7852_v32  ;;  %3267 = vmatpush1.bf16.msra.mxu1 %v7853_v51 }
 0x26c   : > { %3016 = vmatprep.subr.bf16.mxu0 %v7854_v54  ;;  %3268 = vmatprep.subr.bf16.mxu1 %v7855_v55  ;;  %v2789_v55 = vld [vmem:[#allocation2 + $0x140] sm:$0xff] }
 0x26f   : > { %3017 = vmatpush1.bf16.msra.mxu0 %v7856_v59  ;;  %3269 = vmatpush1.bf16.msra.mxu1 %v7857_v60 }
 0x272   : > { %3019 = vmatmul.mubr.bf16.vlgmr.msra.gmra.mrb[12].mxu0 %v2754_v58  ;;  %3271 = vmatmul.mubr.bf16.vlgmr.msra.gmra.mrb[12].mxu1 %v2754_v58  ;;  %v2792_v58 = vld [vmem:[#allocation2 + $0x158] sm:$0xff] }
 0x273   : > { %3028 = vmatprep.mubr.bf16.mxu0 %v2763_v61  ;;  %3280 = vmatprep.mubr.bf16.mxu1 %v2763_v61  ;;  %v2793_v61 = vld [vmem:[#allocation2 + $0x160] sm:$0x1f] }
 0x27a   : > { %3029 = vmatmul.mubr.bf16.gmra.mrb[16].mxu0 %v2762_v2  ;;  %3281 = vmatmul.mubr.bf16.gmra.mrb[16].mxu1 %v2762_v2 }
 0x27b   : > { %3038 = vmatprep.mubr.bf16.mxu0 %v2771_v3  ;;  %3290 = vmatprep.mubr.bf16.mxu1 %v2771_v3  ;;  %v2794_v3 = vld [vmem:[#allocation2 + $0x168] sm:$0x1f] }
 0x282   : > { %3039 = vmatmul.mubr.bf16.gmra.mrb[20].mxu0 %v2770_v6  ;;  %3291 = vmatmul.mubr.bf16.gmra.mrb[20].mxu1 %v2770_v6 }
 0x345   : > { %v3020_v11 = vpop.f32.mrb[12].mxu0  ;;  %v3272_v12 = vpop.f32.mrb[12].mxu1 }
 0x346   : > { %v3301_v15 = vadd.f32 %v3020_v11, %v2773_v7  ;;  %v3303_v16 = vadd.f32 %v3272_v12, %v2775_v8  ;;  %v3022_v17 = vpop.f32.mrb[13].mxu0  ;;  %v3274_v20 = vpop.f32.mrb[13].mxu1 }
 0x347   : > { %v3302_v26 = vadd.f32 %v3022_v17, %v2774_v9  ;;  %v3304_v27 = vadd.f32 %v3274_v20, %v2776_v10  ;;  %v3024_v28 = vpop.f32.mrb[14].mxu0  ;;  %v3276_v30 = vpop.f32.mrb[14].mxu1 }
 0x348   : > { %3325 = vst [vmem:[#allocation2 + $0xc0] sm:$0xff] %v3301_v15  ;;  %3327 = vst [vmem:[#allocation2 + $0xd0] sm:$0xff] %v3303_v16  ;;  %v3305_v31 = vadd.f32 %v3024_v28, %v2777_v13  ;;  %v3307_v34 = vadd.f32 %v3276_v30, %v2779_v14  ;;  %v3026_v35 = vpop.f32.mrb[15].mxu0  ;;  %v3278_v39 = vpop.f32.mrb[15].mxu1 }
 0x349   : > { %3326 = vst [vmem:[#allocation2 + $0xc8] sm:$0xff] %v3302_v26  ;;  %3328 = vst [vmem:[#allocation2 + $0xd8] sm:$0xff] %v3304_v27  ;;  %v3306_v40 = vadd.f32 %v3026_v35, %v2778_v21  ;;  %v3308_v41 = vadd.f32 %v3278_v39, %v2780_v25 }
 0x34a   : > { %3329 = vst [vmem:[#allocation2 + $0xe0] sm:$0xff] %v3305_v31  ;;  %3331 = vst [vmem:[#allocation2 + $0xf0] sm:$0xff] %v3307_v34 }
 0x34b   : > { %3330 = vst [vmem:[#allocation2 + $0xe8] sm:$0xff] %v3306_v40  ;;  %3332 = vst [vmem:[#allocation2 + $0xf8] sm:$0xff] %v3308_v41 }
 0x34d   : > { %v3030_v49 = vpop.f32.mrb[16].mxu0  ;;  %v3282_v22 = vpop.f32.mrb[16].mxu1 }
 0x34e   : > { %v3309_v38 = vadd.f32 %v3030_v49, %v2781_v42  ;;  %v3311_v37 = vadd.f32 %v3282_v22, %v2783_v44  ;;  %v3032_v19 = vpop.f32.mrb[17].mxu0  ;;  %v3284_v18 = vpop.f32.mrb[17].mxu1 }
 0x34f   : > { %v3310_v36 = vadd.f32 %v3032_v19, %v2782_v45  ;;  %v3312_v43 = vadd.f32 %v3284_v18, %v2784_v48  ;;  %v3034_v29 = vpop.f32.mrb[18].mxu0  ;;  %v3286_v47 = vpop.f32.mrb[18].mxu1 }
 0x350   : > { %3333 = vst [vmem:[#allocation2 + $0x100] sm:$0xff] %v3309_v38  ;;  %3335 = vst [vmem:[#allocation2 + $0x110] sm:$0xff] %v3311_v37  ;;  %v3313_v33 = vadd.f32 %v3034_v29, %v2785_v23  ;;  %v3315_v32 = vadd.f32 %v3286_v47, %v2787_v24  ;;  %v3036_v51 = vpop.f32.mrb[19].mxu0  ;;  %v3288_v52 = vpop.f32.mrb[19].mxu1 }
 0x351   : > { %3334 = vst [vmem:[#allocation2 + $0x108] sm:$0xff] %v3310_v36  ;;  %3336 = vst [vmem:[#allocation2 + $0x118] sm:$0xff] %v3312_v43  ;;  %v3314_v53 = vadd.f32 %v3036_v51, %v2786_v50  ;;  %v3316_v54 = vadd.f32 %v3288_v52, %v2788_v46 }
 0x352   : > { %3337 = vst [vmem:[#allocation2 + $0x120] sm:$0xff] %v3313_v33  ;;  %3339 = vst [vmem:[#allocation2 + $0x130] sm:$0xff] %v3315_v32 }
 0x353   : > { %3338 = vst [vmem:[#allocation2 + $0x128] sm:$0xff] %v3314_v53  ;;  %3340 = vst [vmem:[#allocation2 + $0x138] sm:$0xff] %v3316_v54 }
 0x355   : > { %v3040_v59 = vpop.f32.mrb[20].mxu0  ;;  %v3292_v60 = vpop.f32.mrb[20].mxu1  ;;  %3352 = sbr.rel (%p4795_p10) target bundleno = 1607 (0x647), region = 71 }
 0x356   : > { %v3317_v63 = vadd.f32 %v3040_v59, %v2789_v55  ;;  %v3319_v0 = vadd.f32 %v3292_v60, %v2791_v56  ;;  %v3042_v1 = vpop.f32.mrb[21].mxu0  ;;  %v3294_v2 = vpop.f32.mrb[21].mxu1 }
 0x357   : > { %v3318_v5 = vadd.f32 %v3042_v1, %v2790_v57  ;;  %v3320_v6 = vadd.f32 %v3294_v2, %v2792_v58  ;;  %v3044_v7 = vpop.f32.mrb[22].mxu0  ;;  %v3296_v8 = vpop.f32.mrb[22].mxu1 }
 0x358   : > { %3341 = vst [vmem:[#allocation2 + $0x140] sm:$0xff] %v3317_v63  ;;  %3343 = vst [vmem:[#allocation2 + $0x150] sm:$0xff] %v3319_v0  ;;  %v3321_v9 = vadd.f32 %v3044_v7, %v2793_v61  ;;  %v3323_v10 = vadd.f32 %v3296_v8, %v2795_v62  ;;  %v3046_v11 = vpop.f32.mrb[23].mxu0  ;;  %v3298_v12 = vpop.f32.mrb[23].mxu1 }
 0x359   : > { %3342 = vst [vmem:[#allocation2 + $0x148] sm:$0xff] %v3318_v5  ;;  %3344 = vst [vmem:[#allocation2 + $0x158] sm:$0xff] %v3320_v6  ;;  %v3322_v13 = vadd.f32 %v3046_v11, %v2794_v3  ;;  %v3324_v14 = vadd.f32 %v3298_v12, %v2796_v4 }
 0x35a   : > { %3345 = vst [vmem:[#allocation2 + $0x160] sm:$0x1f] %v3321_v9  ;;  %3347 = vst [vmem:[#allocation2 + $0x170] sm:$0x1f] %v3323_v10 }
 0x35b   : > { %3346 = vst [vmem:[#allocation2 + $0x168] sm:$0x1f] %v3322_v13  ;;  %3348 = vst [vmem:[#allocation2 + $0x178] sm:$0x1f] %v3324_v14 }
 0x35c   : > { %v6979_v15 = vld [vmem:[#allocation2 + $0xc0] sm:$0xff]  ;;  %v6981_v16 = vld [vmem:[#allocation2 + $0xc8] sm:$0xff]  ;;  %v6983_v17 = vld [vmem:[#allocation2 + $0xd0] sm:$0xff]  ;;  %vm3426_vm0 = vcmask 1044480  }
 0x35d   : > { %v3436_v20 = vadd.f32 %v6981_v16, %v6979_v15  ;;  %v6987_v21 = vld [vmem:[#allocation2] sm:$0xff]  ;;  %v6989_v25 = vld [vmem:[#allocation2 + $0x8] sm:$0xff]  ;;  %v6991_v26 = vld [vmem:[#allocation2 + $0xd8] sm:$0xff] }
 0x35e   : > { %7858 = vst [vmem:[#allocation47_spill] sm:$0xff] %v6987_v21  ;;  %7859 = vst [vmem:[#allocation48_spill] sm:$0xff] %v6989_v25  ;;  %v6993_v27 = vld [vmem:[#allocation2 + $0x10] sm:$0xff]  ;;  %v3401_v28 = vadd.f32 %v6989_v25, %v6987_v21  ;;  %v6997_v30 = vld [vmem:[#allocation2 + $0xe0] sm:$0xff] }
 0x35f   : > { %7860 = vst [vmem:[#allocation49_spill] sm:$0xff] %v6993_v27  ;;  %v3437_v31 = vadd.f32 %v3436_v20, %v6983_v17  ;;  %v7000_v34 = vld [vmem:[#allocation2 + $0x18] sm:$0xff]  ;;  %v7002_v35 = vld [vmem:[#allocation2 + $0xe8] sm:$0xff]  ;;  %v7004_v39 = vld [vmem:[#allocation2 + $0xf0] sm:$0xff] }
 0x360   : > { %7861 = vst [vmem:[#allocation50_spill] sm:$0xff] %v7000_v34  ;;  %v3402_v40 = vadd.f32 %v3401_v28, %v6993_v27  ;;  %v3441_v41 = vadd.f32 %v7002_v35, %v6997_v30  ;;  %v7009_v42 = vld [vmem:[#allocation2 + $0x20] sm:$0xff]  ;;  %v7011_v44 = vld [vmem:[#allocation2 + $0x28] sm:$0xff]  ;;  %v7013_v45 = vld [vmem:[#allocation2 + $0x30] sm:$0xff] }
 0x361   : > { %7862 = vst [vmem:[#allocation51_spill] sm:$0xff] %v7009_v42  ;;  %7863 = vst [vmem:[#allocation52_spill] sm:$0xff] %v7011_v44  ;;  %v3438_v48 = vadd.f32 %v3437_v31, %v6991_v26  ;;  %v7016_v49 = vld [vmem:[#allocation2 + $0xf8] sm:$0xff]  ;;  %v3406_v22 = vadd.f32 %v7011_v44, %v7009_v42  ;;  %v7020_v23 = vld [vmem:[#allocation2 + $0x60] sm:$0xff] }
 0x362   : > { %7864 = vst [vmem:[#allocation53_spill] sm:$0xff] %v7013_v45  ;;  %v7022_v24 = vld [vmem:[#allocation2 + $0x68] sm:$0xff]  ;;  %v3403_v38 = vadd.f32 %v3402_v40, %v7000_v34  ;;  %v3442_v37 = vadd.f32 %v3441_v41, %v7004_v39  ;;  %v7026_v19 = vld [vmem:[#allocation2 + $0x38] sm:$0xff]  ;;  %v7028_v18 = vld [vmem:[#allocation2 + $0x70] sm:$0xff] }
 0x363   : > { %7865 = vst [vmem:[#allocation54_spill] sm:$0xff] %v7026_v19  ;;  %v3416_v50 = vadd.f32 %v7022_v24, %v7020_v23  ;;  %v7032_v46 = vld [vmem:[#allocation2 + $0x40] sm:$0xff]  ;;  %3439 = vadd.xlane.f32.xlu1 %v3438_v48  ;;  %v3407_v36 = vadd.f32 %v3406_v22, %v7013_v45  ;;  %v7035_v43 = vld [vmem:[#allocation2 + $0x78] sm:$0xff]  ;;  %v7037_v29 = vld [vmem:[#allocation2 + $0x48] sm:$0xff] }
 0x364   : > { %v7039_v47 = vld [vmem:[#allocation2 + $0x50] sm:$0xff]  ;;  %3404 = vadd.xlane.f32.xlu0 %v3403_v38  ;;  %v3443_v33 = vadd.f32 %v3442_v37, %v7016_v49  ;;  %v3411_v51 = vadd.f32 %v7037_v29, %v7032_v46  ;;  %v7045_v52 = vld [vmem:[#allocation2 + $0x120] sm:$0xff]  ;;  %v7047_v53 = vld [vmem:[#allocation2 + $0x128] sm:$0xff] }
 0x365   : > { %v3417_v32 = vadd.f32 %v3416_v50, %v7028_v18  ;;  %v7049_v54 = vld [vmem:[#allocation2 + $0x130] sm:$0xff]  ;;  %v3408_v55 = vadd.f32 %v3407_v36, %v7026_v19  ;;  %v7052_v56 = vld [vmem:[#allocation2 + $0x58] sm:$0xff]  ;;  %v3451_v57 = vadd.f32 %v7047_v53, %v7045_v52  ;;  %v7056_v58 = vld [vmem:[#allocation2 + $0x100] sm:$0xff] }
 0x366   : > { %v7058_v59 = vld [vmem:[#allocation2 + $0x108] sm:$0xff]  ;;  %v3412_v60 = vadd.f32 %v3411_v51, %v7039_v47  ;;  %v7061_v61 = vld [vmem:[#allocation2 + $0x138] sm:$0xff]  ;;  %v7063_v62 = vld [vmem:[#allocation2 + $0x110] sm:$0xff] }
 0x367   : > { %v3446_v63 = vadd.f32 %v7058_v59, %v7056_v58  ;;  %v7067_v0 = vld [vmem:[#allocation2 + $0x160] sm:$0x1f]  ;;  %3444 = vadd.xlane.f32.xlu1 %v3443_v33  ;;  %v3418_v1 = vadd.f32 %v3417_v32, %v7035_v43  ;;  %v3452_v2 = vadd.f32 %v3451_v57, %v7049_v54  ;;  %v7071_v3 = vld [vmem:[#allocation2 + $0x168] sm:$0x1f]  ;;  %v7073_v4 = vld [vmem:[#allocation2 + $0x170] sm:$0x1f] }
 0x368   : > { %v7075_v5 = vld [vmem:[#allocation2 + $0x178] sm:$0x1f]  ;;  %3409 = vadd.xlane.f32.xlu0 %v3408_v55  ;;  %v3413_v6 = vadd.f32 %v3412_v60, %v7052_v56  ;;  %v3461_v8 = vsel %vm3426_vm0, %v7067_v0, 0.0  ;;  %v3462_v9 = vsel %vm3426_vm0, %v7071_v3, 0.0  ;;  %v7083_v10 = vld [vmem:[#allocation2 + $0xa0] sm:$0x1f] }
 0x369   : > { %v3447_v7 = vadd.f32 %v3446_v63, %v7063_v62  ;;  %v7085_v11 = vld [vmem:[#allocation2 + $0xa8] sm:$0x1f]  ;;  %v7087_v12 = vld [vmem:[#allocation2 + $0x118] sm:$0xff]  ;;  %v3463_v13 = vadd.f32 %v3462_v9, %v3461_v8  ;;  %v3464_v14 = vsel %vm3426_vm0, %v7073_v4, 0.0  ;;  %v7091_v20 = vld [vmem:[#allocation2 + $0xb0] sm:$0x1f]  ;;  %v3453_v38 = vadd.f32 %v3452_v2, %v7061_v61 }
 0x36a   : > { %v7093_v28 = vld [vmem:[#allocation2 + $0xb8] sm:$0x1f]  ;;  %v3427_v31 = vsel %vm3426_vm0, %v7083_v10, 0.0  ;;  %v3428_v40 = vsel %vm3426_vm0, %v7085_v11, 0.0  ;;  %v3430_v41 = vsel %vm3426_vm0, %v7091_v20, 0.0  ;;  %v7101_v48 = vld [vmem:[#allocation2 + $0x140] sm:$0xff] }
 0x36b   : > { %v7103_v22 = vld [vmem:[#allocation2 + $0x148] sm:$0xff]  ;;  %3419 = vadd.xlane.f32.xlu1 %v3418_v1  ;;  %v3465_v37 = vadd.f32 %v3464_v14, %v3463_v13  ;;  %v3429_v50 = vadd.f32 %v3428_v40, %v3427_v31  ;;  %v7108_v33 = vld [vmem:[#allocation2 + $0x80] sm:$0xff]  ;;  %v3448_v51 = vadd.f32 %v3447_v7, %v7087_v12  ;;  %v3466_v55 = vsel %vm3426_vm0, %v7075_v5, 0.0  ;;  %v7117_v60 = vld [vmem:[#allocation2 + $0x150] sm:$0xff] }
 0x36c   : > { %v3456_v36 = vadd.f32 %v7103_v22, %v7101_v48  ;;  %v7110_v32 = vld [vmem:[#allocation2 + $0x88] sm:$0xff]  ;;  %3414 = vadd.xlane.f32.xlu0 %v3413_v6  ;;  %v3432_v57 = vsel %vm3426_vm0, %v7093_v28, 0.0  ;;  %v7119_v63 = vld [vmem:[#allocation2 + $0x90] sm:$0xff]  ;;  %v7123_v8 = vld [vmem:[#allocation2 + $0x158] sm:$0xff] }
 0x36d   : > { %7866 = vst [vmem:[#allocation55_spill] sm:$0xff] %v7110_v32  ;;  %v3421_v1 = vadd.f32 %v7110_v32, %v7108_v33  ;;  %v3431_v2 = vadd.f32 %v3430_v41, %v3429_v50  ;;  %v3467_v6 = vadd.f32 %v3466_v55, %v3465_v37  ;;  %v7126_v9 = vld [vmem:[#allocation2 + $0x98] sm:$0xff] }
 0x36e   : > { %v3457_v7 = vadd.f32 %v3456_v36, %v7117_v60 }
 0x36f   : > { %3454 = vadd.xlane.f32.xlu1 %v3453_v38  ;;  %v3433_v13 = vadd.f32 %v3432_v57, %v3431_v2  ;;  %v3422_v14 = vadd.f32 %v3421_v1, %v7119_v63 }
 0x370   : > { %3449 = vadd.xlane.f32.xlu0 %v3448_v51  ;;  %v3458_v31 = vadd.f32 %v3457_v7, %v7123_v8 }
 0x371   : > { %v3423_v40 = vadd.f32 %v3422_v14, %v7126_v9 }
 0x373   : > { %3468 = vadd.xlane.f32.xlu1 %v3467_v6 }
 0x374   : > { %3434 = vadd.xlane.f32.xlu0 %v3433_v13 }
 0x377   : > { %3459 = vadd.xlane.f32.xlu1 %v3458_v31 }
 0x378   : > { %3424 = vadd.xlane.f32.xlu0 %v3423_v40 }
 0x3f0   : > { %v3440_v41 = vpop.xlane.xlu1 %3439 }
 0x3f1   : > { %v3405_v50 = vpop.xlane.xlu0 %3404 }
 0x3f2   : > { %v3470_v38 = vadd.f32 %v3440_v41, %v3405_v50 }
 0x3f4   : > { %v7131_v37 = vmul.f32 0.0009765625, %v3470_v38  ;;  %v3445_v36 = vpop.xlane.xlu1 %3444 }
 0x3f5   : > { %v3410_v55 = vpop.xlane.xlu0 %3409 }
 0x3f6   : > { %7867 = vst [vmem:[#allocation56_spill] sm:$0xff] %v7131_v37  ;;  %v3471_v32 = vadd.f32 %v3445_v36, %v3410_v55  ;;  %v3484_v51 = vsub.f32 %v6987_v21, %v7131_v37  ;;  %v3485_v57 = vsub.f32 %v6989_v25, %v7131_v37  ;;  %v3486_v1 = vsub.f32 %v6993_v27, %v7131_v37 }
 0x3f7   : > { %v3487_v2 = vsub.f32 %v7000_v34, %v7131_v37  ;;  %v3508_v6 = vsub.f32 %v6979_v15, %v7131_v37  ;;  %v3509_v7 = vsub.f32 %v6981_v16, %v7131_v37  ;;  %v3510_v13 = vsub.f32 %v6983_v17, %v7131_v37 }
 0x3f8   : > { %v7147_v14 = vmul.f32 0.0009765625, %v3471_v32  ;;  %v3420_v31 = vpop.xlane.xlu1 %3419  ;;  %v3532_v40 = vmul.f32 %v3484_v51, %v3484_v51  ;;  %v3533_v41 = vmul.f32 %v3485_v57, %v3485_v57  ;;  %v3534_v50 = vmul.f32 %v3486_v1, %v3486_v1 }
 0x3f9   : > { %v3415_v38 = vpop.xlane.xlu0 %3414  ;;  %v3535_v36 = vmul.f32 %v3487_v2, %v3487_v2  ;;  %v3511_v55 = vsub.f32 %v6991_v26, %v7131_v37  ;;  %v3556_v27 = vmul.f32 %v3508_v6, %v3508_v6  ;;  %v3557_v21 = vmul.f32 %v3509_v7, %v3509_v7 }
 0x3fa   : > { %v3580_v15 = vadd.f32 %v3533_v41, %v3532_v40  ;;  %v3558_v34 = vmul.f32 %v3510_v13, %v3510_v13  ;;  %v3488_v16 = vsub.f32 %v7009_v42, %v7147_v14  ;;  %v3489_v17 = vsub.f32 %v7011_v44, %v7147_v14 }
 0x3fb   : > { %v3559_v32 = vmul.f32 %v3511_v55, %v3511_v55  ;;  %v3614_v25 = vadd.f32 %v3557_v21, %v3556_v27  ;;  %v3490_v51 = vsub.f32 %v7013_v45, %v7147_v14  ;;  %v3491_v57 = vsub.f32 %v7026_v19, %v7147_v14 }
 0x3fc   : > { %v3455_v1 = vpop.xlane.xlu1 %3454  ;;  %v3581_v26 = vadd.f32 %v3580_v15, %v3534_v50  ;;  %v3536_v2 = vmul.f32 %v3488_v16, %v3488_v16  ;;  %v3537_v6 = vmul.f32 %v3489_v17, %v3489_v17  ;;  %v3512_v7 = vsub.f32 %v6997_v30, %v7147_v14 }
 0x3fd   : > { %v3473_v13 = vadd.f32 %v3455_v1, %v3420_v31  ;;  %v3450_v40 = vpop.xlane.xlu0 %3449  ;;  %v3615_v41 = vadd.f32 %v3614_v25, %v3558_v34  ;;  %v3538_v42 = vmul.f32 %v3490_v51, %v3490_v51  ;;  %v3539_v44 = vmul.f32 %v3491_v57, %v3491_v57 }
 0x3fe   : > { %v3472_v55 = vadd.f32 %v3450_v40, %v3415_v38  ;;  %v3582_v21 = vadd.f32 %v3581_v26, %v3535_v36  ;;  %v3585_v27 = vadd.f32 %v3537_v6, %v3536_v2  ;;  %v3513_v45 = vsub.f32 %v7002_v35, %v7147_v14 }
 0x3ff   : > { %v7163_v37 = vmul.f32 0.0009765625, %v3473_v13  ;;  %v3616_v19 = vadd.f32 %v3615_v41, %v3559_v32  ;;  %v3514_v50 = vsub.f32 %v7004_v39, %v7147_v14  ;;  %v3515_v30 = vsub.f32 %v7016_v49, %v7147_v14 }
 0x400   : > { %v7169_v31 = vmul.f32 0.0009765625, %v3472_v55  ;;  %3583 = vadd.xlane.f32.xlu0 %v3582_v21  ;;  %v3469_v25 = vpop.xlane.xlu1 %3468  ;;  %v3586_v34 = vadd.f32 %v3585_v27, %v3538_v42  ;;  %v3560_v38 = vmul.f32 %v3512_v7, %v3512_v7  ;;  %v3561_v36 = vmul.f32 %v3513_v45, %v3513_v45 }
 0x401   : > { %v3476_v15 = vsel %vm3426_vm0, %v3469_v25, 0.0  ;;  %v3435_v16 = vpop.xlane.xlu0 %3434  ;;  %v3562_v35 = vmul.f32 %v3514_v50, %v3514_v50  ;;  %v3563_v17 = vmul.f32 %v3515_v30, %v3515_v30  ;;  %v3496_v32 = vsub.f32 %v7020_v23, %v7163_v37 }
 0x402   : > { %v3475_v39 = vsel %vm3426_vm0, %v3435_v16, 0.0  ;;  %v3587_v51 = vadd.f32 %v3586_v34, %v3539_v44  ;;  %v3619_v57 = vadd.f32 %v3561_v36, %v3560_v38  ;;  %v3497_v49 = vsub.f32 %v7022_v24, %v7163_v37 }
 0x403   : > { %v3477_v1 = vadd.f32 %v3476_v15, %v3475_v39  ;;  %v3498_v42 = vsub.f32 %v7028_v18, %v7163_v37  ;;  %v3499_v45 = vsub.f32 %v7035_v43, %v7163_v37  ;;  %v3544_v26 = vmul.f32 %v3496_v32, %v3496_v32 }
 0x404   : > { %3617 = vadd.xlane.f32.xlu0 %v3616_v19  ;;  %3588 = vadd.xlane.f32.xlu1 %v3587_v51  ;;  %v3620_v2 = vadd.f32 %v3619_v57, %v3562_v35  ;;  %v3460_v6 = vpop.xlane.xlu1 %3459  ;;  %v3545_v23 = vmul.f32 %v3497_v49, %v3497_v49  ;;  %v3492_v44 = vsub.f32 %v7032_v46, %v7169_v31 }
 0x405   : > { %v7183_v7 = vmul.f32 0.0009765625, %v3477_v1  ;;  %v3425_v13 = vpop.xlane.xlu0 %3424  ;;  %v3546_v24 = vmul.f32 %v3498_v42, %v3498_v42  ;;  %v3547_v40 = vmul.f32 %v3499_v45, %v3499_v45  ;;  %v3493_v18 = vsub.f32 %v7037_v29, %v7169_v31 }
 0x406   : > { %v3621_v41 = vadd.f32 %v3620_v2, %v3563_v17  ;;  %v3474_v55 = vadd.f32 %v3460_v6, %v3425_v13  ;;  %v3595_v43 = vadd.f32 %v3545_v23, %v3544_v26  ;;  %v3494_v19 = vsub.f32 %v7039_v47, %v7169_v31 }
 0x407   : > { %v3495_v21 = vsub.f32 %v7052_v56, %v7169_v31  ;;  %v3540_v27 = vmul.f32 %v3492_v44, %v3492_v44  ;;  %v3541_v50 = vmul.f32 %v3493_v18, %v3493_v18  ;;  %v3520_v46 = vsub.f32 %v7045_v52, %v7163_v37 }
 0x408   : > { %3622 = vadd.xlane.f32.xlu1 %v3621_v41  ;;  %v7193_v30 = vmul.f32 0.0009765625, %v3474_v55  ;;  %v3596_v25 = vadd.f32 %v3595_v43, %v3546_v24  ;;  %v3542_v34 = vmul.f32 %v3494_v19, %v3494_v19  ;;  %v3521_v29 = vsub.f32 %v7047_v53, %v7163_v37 }
 0x409   : > { %v3543_v38 = vmul.f32 %v3495_v21, %v3495_v21  ;;  %v3590_v36 = vadd.f32 %v3541_v50, %v3540_v27  ;;  %v3522_v47 = vsub.f32 %v7049_v54, %v7163_v37  ;;  %v3523_v56 = vsub.f32 %v7061_v61, %v7163_v37 }
 0x40a   : > { %v3597_v15 = vadd.f32 %v3596_v25, %v3547_v40  ;;  %v3568_v16 = vmul.f32 %v3520_v46, %v3520_v46  ;;  %v3569_v35 = vmul.f32 %v3521_v29, %v3521_v29  ;;  %v3516_v52 = vsub.f32 %v7056_v58, %v7169_v31 }
 0x40b   : > { %v3591_v17 = vadd.f32 %v3590_v36, %v3542_v34  ;;  %v3570_v32 = vmul.f32 %v3522_v47, %v3522_v47  ;;  %v3571_v39 = vmul.f32 %v3523_v56, %v3523_v56  ;;  %v3517_v53 = vsub.f32 %v7058_v59, %v7169_v31 }
 0x40c   : > { %3598 = vadd.xlane.f32.xlu1 %v3597_v15  ;;  %v3629_v51 = vadd.f32 %v3569_v35, %v3568_v16  ;;  %v3518_v54 = vsub.f32 %v7063_v62, %v7169_v31  ;;  %v3519_v61 = vsub.f32 %v7087_v12, %v7169_v31  ;;  %v3564_v57 = vmul.f32 %v3516_v52, %v3516_v52 }
 0x40d   : > { %v3592_v49 = vadd.f32 %v3591_v17, %v3543_v38  ;;  %v3565_v1 = vmul.f32 %v3517_v53, %v3517_v53  ;;  %v3528_v58 = vsub.f32 %v7067_v0, %v7183_v7  ;;  %v3529_v42 = vsub.f32 %v7071_v3, %v7183_v7  ;;  %v7868_v17 = vld [vmem:[#allocation55_spill] sm:$0xff] }
 0x40e   : > { %v3630_v45 = vadd.f32 %v3629_v51, %v3570_v32  ;;  %v3566_v26 = vmul.f32 %v3518_v54, %v3518_v54  ;;  %v3567_v59 = vmul.f32 %v3519_v61, %v3519_v61  ;;  %v3530_v2 = vsub.f32 %v7073_v4, %v7183_v7 }
 0x40f   : > { %3593 = vadd.xlane.f32.xlu0 %v3592_v49  ;;  %v3624_v62 = vadd.f32 %v3565_v1, %v3564_v57  ;;  %v3531_v12 = vsub.f32 %v7075_v5, %v7183_v7  ;;  %v3576_v6 = vmul.f32 %v3528_v58, %v3528_v58  ;;  %v3577_v23 = vmul.f32 %v3529_v42, %v3529_v42 }
 0x410   : > { %v3631_v44 = vadd.f32 %v3630_v45, %v3571_v39  ;;  %v3578_v13 = vmul.f32 %v3530_v2, %v3530_v2  ;;  %v3504_v0 = vsub.f32 %v7083_v10, %v7183_v7  ;;  %v3505_v3 = vsub.f32 %v7085_v11, %v7183_v7  ;;  %v7262_v2 = vld [vmem:[%s7717_s4] sm:$0xff]  }
 0x411   : > { %v3625_v24 = vadd.f32 %v3624_v62, %v3566_v26  ;;  %v3579_v40 = vmul.f32 %v3531_v12, %v3531_v12  ;;  %v3639_v18 = vsel %vm3426_vm0, %v3576_v6, 0.0  ;;  %v3640_v4 = vsel %vm3426_vm0, %v3577_v23, 0.0  ;;  %v7267_v62 = vld [vmem:[%s7717_s4 + $0x80] sm:$0xff]   ;;  %v7272_v12 = vld [vmem:[%s7717_s4 + $0x48] sm:$0xff]  }
 0x412   : > { %3632 = vadd.xlane.f32.xlu1 %v3631_v44  ;;  %v3641_v41 = vadd.f32 %v3640_v4, %v3639_v18  ;;  %v3642_v5 = vsel %vm3426_vm0, %v3578_v13, 0.0  ;;  %v3506_v55 = vsub.f32 %v7091_v20, %v7183_v7  ;;  %v3507_v43 = vsub.f32 %v7093_v28, %v7183_v7  ;;  %v7277_v6 = vld [vmem:[%s7717_s4 + $0xc8] sm:$0xff]   ;;  %v7298_v13 = vld [vmem:[%s7717_s4 + $0x50] sm:$0xff]   ;;  %v7327_v18 = vld [vmem:[%s7717_s4 + $0xd8] sm:$0xff]  }
 0x413   : > { %v3626_v10 = vadd.f32 %v3625_v24, %v3567_v59  ;;  %v3644_v19 = vsel %vm3426_vm0, %v3579_v40, 0.0  ;;  %v3552_v11 = vmul.f32 %v3504_v0, %v3504_v0  ;;  %v3553_v21 = vmul.f32 %v3505_v3, %v3505_v3  ;;  %v7257_v59 = vld [vmem:[%s7717_s4 + $0xc0] sm:$0xff]   ;;  %v7286_v23 = vld [vmem:[%s7717_s4 + $0x8] sm:$0xff]   ;;  %v7303_v0 = vld [vmem:[%s7717_s4 + $0xd0] sm:$0xff]  }
 0x414   : > { %v3643_v27 = vadd.f32 %v3642_v5, %v3641_v41  ;;  %v3554_v50 = vmul.f32 %v3506_v55, %v3506_v55  ;;  %v3555_v46 = vmul.f32 %v3507_v43, %v3507_v43  ;;  %v3524_v25 = vsub.f32 %v7101_v48, %v7193_v30  ;;  %4878 = vmatprep.subr.bf16.mxu1 %v7257_v59  ;;  %v7291_v44 = vld [vmem:[%s7717_s4 + $0x88] sm:$0xff]   ;;  %v7310_v3 = vld [vmem:[%s7717_s4 + $0x10] sm:$0xff]   ;;  %v7322_v40 = vld [vmem:[%s7717_s4 + $0x58] sm:$0xff]  }
 0x415   : > { %3627 = vadd.xlane.f32.xlu0 %v3626_v10  ;;  %v3605_v34 = vsel %vm3426_vm0, %v3552_v11, 0.0  ;;  %v3606_v29 = vsel %vm3426_vm0, %v3553_v21, 0.0  ;;  %v3525_v20 = vsub.f32 %v7103_v22, %v7193_v30  ;;  %v3526_v28 = vsub.f32 %v7117_v60, %v7193_v30  ;;  %4879 = vmatpush3.bf16.msra.mxu1 %v7267_v62  ;;  %v7315_v24 = vld [vmem:[%s7717_s4 + $0x90] sm:$0xff]  }
 0x416   : > { %v3645_v38 = vadd.f32 %v3644_v19, %v3643_v27  ;;  %v3607_v36 = vadd.f32 %v3606_v29, %v3605_v34  ;;  %v3608_v47 = vsel %vm3426_vm0, %v3554_v50, 0.0  ;;  %v3610_v56 = vsel %vm3426_vm0, %v3555_v46, 0.0  ;;  %4880 = vmatprep.subr.bf16.mxu1 %v7277_v6  ;;  %v3674_v29 = vld [vmem:[%s7716_s3] sm:$0xff] }
 0x417   : > { %v3527_v48 = vsub.f32 %v7123_v8, %v7193_v30  ;;  %v3572_v15 = vmul.f32 %v3524_v25, %v3524_v25  ;;  %v3573_v16 = vmul.f32 %v3525_v20, %v3525_v20  ;;  %v3574_v35 = vmul.f32 %v3526_v28, %v3526_v28 }
 0x418   : > { %3646 = vadd.xlane.f32.xlu1 %v3645_v38  ;;  %v3609_v52 = vadd.f32 %v3608_v47, %v3607_v36  ;;  %v3500_v22 = vsub.f32 %v7108_v33, %v7193_v30  ;;  %v3501_v60 = vsub.f32 %v7868_v17, %v7193_v30  ;;  %v3502_v32 = vsub.f32 %v7119_v63, %v7193_v30  ;;  %v7252_v63 = vld [vmem:[%s7717_s4 + $0x40] sm:$0xff]  }
 0x419   : > { %v3575_v39 = vmul.f32 %v3527_v48, %v3527_v48  ;;  %v3634_v53 = vadd.f32 %v3573_v16, %v3572_v15  ;;  %v3503_v51 = vsub.f32 %v7126_v9, %v7193_v30  ;;  %v5806_v26 = vmov 0   ;;  %4844 = vmatprep.subr.bf16.mxu0 %v7252_v63  ;;  %4881 = vmatpush3.bf16.msra.mxu1 %v7291_v44  ;;  %v7342_v48 = vld [vmem:[%s7717_s4 + $0x18] sm:$0xff]   ;;  %v7352_v16 = vld [vmem:[%s7717_s4 + $0x60] sm:$0xff]  }
 0x41a   : > { %v3611_v8 = vadd.f32 %v3610_v56, %v3609_v52  ;;  %v3548_v54 = vmul.f32 %v3500_v22, %v3500_v22  ;;  %v3549_v61 = vmul.f32 %v3501_v60, %v3501_v60  ;;  %v3550_v57 = vmul.f32 %v3502_v32, %v3502_v32  ;;  %5697 = vset.pattern.permute.xlu0 %v5806_v26  ;;  %v3675_v56 = vld [vmem:[%s7716_s3 + $0x8] sm:$0xff]  ;;  %v7347_v15 = vld [vmem:[%s7717_s4 + $0x98] sm:$0xff]   ;;  %v7357_v22 = vld [vmem:[%s7717_s4 + $0xe0] sm:$0xff]  }
 0x41b   : > { %v3635_v49 = vadd.f32 %v3634_v53, %v3574_v35  ;;  %v3551_v1 = vmul.f32 %v3503_v51, %v3503_v51  ;;  %5698 = vset.pattern.permute.xlu1 %v5806_v26  ;;  %4845 = vmatpush3.bf16.msra.mxu0 %v7262_v2  ;;  %v4796_v53 = vld [vmem:[%s7716_s3 + $0x30] sm:$0xff]  ;;  %v7869_v51 = vld [vmem:[#allocation56_spill] sm:$0xff]  ;;  %v4797_v26 = vld [vmem:[%s7716_s3 + $0x38] sm:$0xff] }
 0x41c   : > { %3612 = vadd.xlane.f32.xlu0 %v3611_v8  ;;  %v3600_v58 = vadd.f32 %v3549_v61, %v3548_v54  ;;  %4846 = vmatprep.subr.bf16.mxu0 %v7272_v12  ;;  %v7371_v61 = vld [vmem:[%s7717_s4 + $0x20] sm:$0xff]  }
 0x41d   : > { %v3636_v33 = vadd.f32 %v3635_v49, %v3575_v39  ;;  %4882 = vmatprep.subr.bf16.mxu1 %v7303_v0  ;;  %v7381_v49 = vld [vmem:[%s7717_s4 + $0x68] sm:$0xff]  }
 0x41e   : > { %v3601_v42 = vadd.f32 %v3600_v58, %v3550_v57  ;;  %4883 = vmatpush3.bf16.msra.mxu1 %v7315_v24  ;;  %v7376_v57 = vld [vmem:[%s7717_s4 + $0xa0] sm:$0xff]   ;;  %v7386_v58 = vld [vmem:[%s7717_s4 + $0xe8] sm:$0xff]  }
 0x41f   : > { %3637 = vadd.xlane.f32.xlu1 %v3636_v33  ;;  %4847 = vmatpush3.bf16.msra.mxu0 %v7286_v23 }
 0x420   : > { %v3602_v45 = vadd.f32 %v3601_v42, %v3551_v1  ;;  %4848 = vmatprep.subr.bf16.mxu0 %v7298_v13  ;;  %4884 = vmatprep.subr.bf16.mxu1 %v7327_v18 }
 0x422   : > { %3603 = vadd.xlane.f32.xlu0 %v3602_v45  ;;  %4885 = vmatpush3.bf16.msra.mxu1 %v7347_v15 }
 0x423   : > { %4849 = vmatpush3.bf16.msra.mxu0 %v7310_v3  ;;  %4886 = vmatprep.subr.bf16.mxu1 %v7357_v22 }
 0x424   : > { %4850 = vmatprep.subr.bf16.mxu0 %v7322_v40 }
 0x426   : > { %4887 = vmatpush3.bf16.msra.mxu1 %v7376_v57 }
 0x427   : > { %4851 = vmatpush3.bf16.msra.mxu0 %v7342_v48  ;;  %4888 = vmatprep.subr.bf16.mxu1 %v7386_v58 }
 0x428   : > { %4852 = vmatprep.subr.bf16.mxu0 %v7352_v16 }
 0x42b   : > { %4853 = vmatpush3.bf16.msra.mxu0 %v7371_v61 }
 0x42c   : > { %4854 = vmatprep.subr.bf16.mxu0 %v7381_v49 }
 0x48d   : > { %v3584_v4 = vpop.xlane.xlu0 %3583 }
 0x491   : > { %v3589_v41 = vpop.xlane.xlu1 %3588  ;;  %v3618_v5 = vpop.xlane.xlu0 %3617 }
 0x492   : > { %v3648_v55 = vadd.f32 %v3618_v5, %v3584_v4  ;;  %v7405_v5 = vld [vmem:[%s7717_s4 + $0xa8] sm:$0xff]  }
 0x493   : > { %4889 = vmatpush3.bf16.msra.mxu1 %v7405_v5 }
 0x494   : > { %v3656_v43 = vmul.f32 0.0009765625, %v3648_v55  ;;  %v7410_v55 = vld [vmem:[%s7717_s4 + $0x70] sm:$0xff]  }
 0x495   : > { %v3623_v10 = vpop.xlane.xlu1 %3622 }
 0x496   : > { %v3662_v19 = vadd.f32 1e-05, %v3656_v43  ;;  %v3649_v11 = vadd.f32 %v3623_v10, %v3589_v41  ;;  %v7400_v41 = vld [vmem:[%s7717_s4 + $0x28] sm:$0xff]   ;;  %v7415_v10 = vld [vmem:[%s7717_s4 + $0xf0] sm:$0xff]  }
 0x497   : > { %4855 = vmatpush3.bf16.msra.mxu0 %v7400_v41  ;;  %4890 = vmatprep.subr.bf16.mxu1 %v7415_v10 }
 0x498   : > { %5731 = vrsqrt.f32 %v3662_v19  ;;  %v3657_v21 = vmul.f32 0.0009765625, %v3649_v11  ;;  %4856 = vmatprep.subr.bf16.mxu0 %v7410_v55 }
 0x499   : > { %v3599_v27 = vpop.xlane.xlu1 %3598 }
 0x49a   : > { %v3663_v50 = vadd.f32 1e-05, %v3657_v21 }
 0x49c   : > { %5733 = vrsqrt.f32 %v3663_v50  ;;  %v3594_v46 = vpop.xlane.xlu0 %3593  ;;  %v7424_v50 = vld [vmem:[%s7717_s4 + $0x30] sm:$0xff]  }
 0x49d   : > { %4857 = vmatpush3.bf16.msra.mxu0 %v7424_v50 }
 0x49f   : > { %v3633_v25 = vpop.xlane.xlu1 %3632 }
 0x4a0   : > { %v3651_v34 = vadd.f32 %v3633_v25, %v3599_v27  ;;  %v7434_v25 = vld [vmem:[%s7717_s4 + $0x78] sm:$0xff]  }
 0x4a1   : > { %4858 = vmatprep.subr.bf16.mxu0 %v7434_v25 }
 0x4a2   : > { %v5732_v20 = vpop.eup %5731  ;;  %v3628_v28 = vpop.xlane.xlu0 %3627  ;;  %v3659_v38 = vmul.f32 0.0009765625, %v3651_v34  ;;  %v3676_v34 = vld [vmem:[%s7716_s3 + $0x10] sm:$0xff] }
 0x4a3   : > { %v3650_v36 = vadd.f32 %v3628_v28, %v3594_v46  ;;  %v3687_v47 = vmul.f32 %v5732_v20, %v3674_v29  ;;  %v7429_v46 = vld [vmem:[%s7717_s4 + $0xb0] sm:$0xff]   ;;  %v7442_v29 = vld [vmem:[%s7717_s4 + $0xf8] sm:$0xff]  }
 0x4a4   : > { %v3665_v60 = vadd.f32 1e-05, %v3659_v38  ;;  %4891 = vmatpush3.bf16.msra.mxu1 %v7429_v46 }
 0x4a5   : > { %v3658_v35 = vmul.f32 0.0009765625, %v3650_v36  ;;  %v3647_v52 = vpop.xlane.xlu1 %3646  ;;  %3707 = vperm.xlu0 %5697, %v3687_v47   ;;  %v3693_v8 = vmul.f32 %v3687_v47, %v7869_v51  ;;  %4892 = vmatprep.subr.bf16.mxu1 %v7442_v29 }
 0x4a6   : > { %v5734_v17 = vpop.eup %5733  ;;  %v3654_v54 = vsel %vm3426_vm0, %v3647_v52, 0.0  ;;  %v7459_v52 = vld [vmem:[%s7717_s4 + $0xb8] sm:$0xff]  }
 0x4a7   : > { %v3664_v32 = vadd.f32 1e-05, %v3658_v35  ;;  %v3688_v39 = vmul.f32 %v5734_v17, %v3675_v56  ;;  %v3699_v45 = vsub.f32 %v4796_v53, %v3693_v8  ;;  %v3677_v56 = vld [vmem:[%s7716_s3 + $0x18] sm:$0xff] }
 0x4a8   : > { %v7454_v35 = vld [vmem:[%s7717_s4 + $0x38] sm:$0xff]   ;;  %4893 = vmatpush3.bf16.msra.mxu1 %v7459_v52 }
 0x4a9   : > { %5735 = vrsqrt.f32 %v3664_v32  ;;  %v3613_v1 = vpop.xlane.xlu0 %3612  ;;  %3712 = vperm.xlu1 %5698, %v3688_v39   ;;  %v3694_v4 = vmul.f32 %v3688_v39, %v7147_v14  ;;  %4859 = vmatpush3.bf16.msra.mxu0 %v7454_v35  ;;  %v3679_v32 = vld [vmem:[%s7716_s3 + $0x28] sm:$0x1f]  ;;  %v4798_v39 = vld [vmem:[%s7716_s3 + $0x40] sm:$0xff] }
 0x4aa   : > { %v3653_v33 = vsel %vm3426_vm0, %v3613_v1, 0.0  ;;  %5737 = vrsqrt.f32 %v3665_v60  ;;  %4912 = vmatprep.subr.bf16.mxu0 %v7252_v63  ;;  %4946 = vmatprep.subr.bf16.mxu1 %v7257_v59  ;;  %v4799_v63 = vld [vmem:[%s7716_s3 + $0x48] sm:$0xff]  ;;  %v3678_v1 = vld [vmem:[%s7716_s3 + $0x20] sm:$0xff] }
 0x4ab   : > { %v3655_v42 = vadd.f32 %v3654_v54, %v3653_v33  ;;  %v3700_v21 = vsub.f32 %v4797_v26, %v3694_v4  ;;  %v4800_v4 = vld [vmem:[%s7716_s3 + $0x50] sm:$0xff] }
 0x4ac   : > { %v3638_v43 = vpop.xlane.xlu1 %3637 }
 0x4ad   : > { %v3661_v14 = vmul.f32 0.0009765625, %v3655_v42  ;;  %3785 = vperm.xlu1 %5698, %v3699_v45  }
 0x4af   : > { %v3667_v19 = vadd.f32 1e-05, %v3661_v14  ;;  %v3604_v11 = vpop.xlane.xlu0 %3603 }
 0x4b0   : > { %v3652_v27 = vadd.f32 %v3638_v43, %v3604_v11  ;;  %v7870_v11 = vld [vmem:[#allocation48_spill] sm:$0xff] }
 0x4b1   : > { %5739 = vrsqrt.f32 %v3667_v19  ;;  %3790 = vperm.xlu1 %5698, %v3700_v21  }
 0x4b2   : > { %v3660_v20 = vmul.f32 0.0009765625, %v3652_v27  ;;  %v7871_v27 = vld [vmem:[#allocation50_spill] sm:$0xff] }
 0x4b3   : > { %v5736_v28 = vpop.eup %5735 }
 0x4b4   : > { %v3666_v38 = vadd.f32 1e-05, %v3660_v20  ;;  %v3689_v36 = vmul.f32 %v5736_v28, %v3676_v34  ;;  %v5738_v47 = vpop.eup %5737  ;;  %v7872_v20 = vld [vmem:[#allocation47_spill] sm:$0xff] }
 0x4b5   : > { %v3690_v17 = vmul.f32 %v5738_v47, %v3677_v56 }
 0x4b6   : > { %5741 = vrsqrt.f32 %v3666_v38  ;;  %3717 = vperm.xlu1 %5698, %v3689_v36   ;;  %v3695_v60 = vmul.f32 %v3689_v36, %v7169_v31  ;;  %v4801_v31 = vld [vmem:[%s7716_s3 + $0x58] sm:$0x1f]  ;;  %v7873_v38 = vld [vmem:[#allocation49_spill] sm:$0xff] }
 0x4b7   : > { %v3696_v54 = vmul.f32 %v3690_v17, %v7163_v37 }
 0x4b8   : > { %v3701_v8 = vsub.f32 %v4798_v39, %v3695_v60  ;;  %v7874_v60 = vld [vmem:[#allocation52_spill] sm:$0xff]  ;;  %v7875_v39 = vld [vmem:[#allocation54_spill] sm:$0xff] }
 0x4b9   : > { %v3702_v45 = vsub.f32 %v4799_v63, %v3696_v54  ;;  %v7877_v54 = vld [vmem:[#allocation53_spill] sm:$0xff] }
 0x4ba   : > { %3722 = vperm.xlu1 %5698, %v3690_v17  }
 0x4bb   : > { %v5740_v53 = vpop.eup %5739 }
 0x4bc   : > { %v3692_v51 = vmul.f32 %v5740_v53, %v3679_v32 }
 0x4be   : > { %3732 = vperm.xlu0 %5697, %v3692_v51   ;;  %v3698_v59 = vmul.f32 %v3692_v51, %v7183_v7  ;;  %3795 = vperm.xlu1 %5698, %v3701_v8   ;;  %v7876_v51 = vld [vmem:[#allocation51_spill] sm:$0xff] }
 0x4c0   : > { %v5742_v33 = vpop.eup %5741  ;;  %v3704_v42 = vsub.f32 %v4801_v31, %v3698_v59 }
 0x4c1   : > { %v3691_v37 = vmul.f32 %v5742_v33, %v3678_v1 }
 0x4c2   : > { %3810 = vperm.xlu0 %5697, %v3704_v42   ;;  %3800 = vperm.xlu1 %5698, %v3702_v45  }
 0x4c3   : > { %v3697_v26 = vmul.f32 %v3691_v37, %v7193_v30 }
 0x4c5   : > { %v3703_v14 = vsub.f32 %v4800_v4, %v3697_v26 }
 0x4c6   : > { %3727 = vperm.xlu1 %5698, %v3691_v37  }
 0x4ca   : > { %3805 = vperm.xlu1 %5698, %v3703_v14  }
 0x524   : > { %v3708_v43 = vpop.permute.xlu0 %3707 }
 0x525   : > { %v3736_v21 = vmul.f32 %v3708_v43, %v7870_v11  ;;  %v3738_v34 = vmul.f32 %v3708_v43, %v7871_v27  ;;  %v3735_v28 = vmul.f32 %v3708_v43, %v7872_v20  ;;  %v3737_v36 = vmul.f32 %v3708_v43, %v7873_v38 }
 0x528   : > { %v3713_v7 = vpop.permute.xlu1 %3712 }
 0x529   : > { %v3740_v32 = vmul.f32 %v3713_v7, %v7874_v60  ;;  %v3742_v53 = vmul.f32 %v3713_v7, %v7875_v39  ;;  %v3739_v8 = vmul.f32 %v3713_v7, %v7876_v51  ;;  %v3741_v31 = vmul.f32 %v3713_v7, %v7877_v54 }
 0x52c   : > { %v7487_v19 = vpop.permute.xlu1 %3785 }
 0x52d   : > { %v3814_v30 = vadd.f32 %v7487_v19, %v3736_v21  ;;  %v3816_v47 = vadd.f32 %v7487_v19, %v3738_v34  ;;  %v3813_v56 = vadd.f32 %v7487_v19, %v3735_v28  ;;  %v3815_v17 = vadd.f32 %v7487_v19, %v3737_v36 }
 0x52f   : > { %v3862_v45 = vmax.f32 %v3814_v30, 0.0  ;;  %v3864_v37 = vmax.f32 %v3816_v47, 0.0  ;;  %v3861_v26 = vmax.f32 %v3813_v56, 0.0  ;;  %v3863_v4 = vmax.f32 %v3815_v17, 0.0  ;;  %v5743_v30 = vld [vmem:[#allocation2 + $0xc8] sm:$0xff]  ;;  %v5744_v56 = vld [vmem:[#allocation2 + $0xd8] sm:$0xff] }
 0x530   : > { %v7501_v63 = vpop.permute.xlu1 %3790  ;;  %v3760_v47 = vmul.f32 %v5743_v30, %v3708_v43  ;;  %v3762_v17 = vmul.f32 %v5744_v56, %v3708_v43 }
 0x531   : > { %v3818_v59 = vadd.f32 %v7501_v63, %v3740_v32  ;;  %v3820_v1 = vadd.f32 %v7501_v63, %v3742_v53  ;;  %v3817_v33 = vadd.f32 %v7501_v63, %v3739_v8  ;;  %v3819_v42 = vadd.f32 %v7501_v63, %v3741_v31  ;;  %v5745_v32 = vld [vmem:[#allocation2 + $0xe8] sm:$0xff]  ;;  %v5746_v53 = vld [vmem:[#allocation2 + $0xf8] sm:$0xff]  ;;  %v5747_v8 = vld [vmem:[#allocation2 + $0xc0] sm:$0xff] }
 0x532   : > { %v3764_v39 = vmul.f32 %v5745_v32, %v3713_v7  ;;  %v3766_v51 = vmul.f32 %v5746_v53, %v3713_v7  ;;  %v3759_v54 = vmul.f32 %v5747_v8, %v3708_v43  ;;  %v5748_v31 = vld [vmem:[#allocation2 + $0xd0] sm:$0xff]  ;;  %v5759_v8 = vld [vmem:[#allocation2 + $0xa8] sm:$0x1f] }
 0x533   : > { %v3866_v14 = vmax.f32 %v3818_v59, 0.0  ;;  %v3868_v11 = vmax.f32 %v3820_v1, 0.0  ;;  %v3865_v21 = vmax.f32 %v3817_v33, 0.0  ;;  %v3867_v27 = vmax.f32 %v3819_v42, 0.0  ;;  %v5750_v1 = vld [vmem:[#allocation2 + $0xf0] sm:$0xff] }
 0x534   : > { %v7515_v59 = vmul.f32 %v5748_v31, %v3708_v43  ;;  %v7523_v33 = vmul.f32 %v5750_v1, %v3713_v7 }
 0x535   : > { %v7507_v34 = vpop.permute.xlu1 %3717  ;;  %v3910_v20 = vpack.c.bf16 %v3866_v14, %v3862_v45  ;;  %v3912_v28 = vpack.c.bf16 %v3868_v11, %v3864_v37  ;;  %v3909_v38 = vpack.c.bf16 %v3865_v21, %v3861_v26  ;;  %v3911_v36 = vpack.c.bf16 %v3867_v27, %v3863_v4  ;;  %v5751_v45 = vld [vmem:[#allocation2 + $0x48] sm:$0xff]  ;;  %v5752_v37 = vld [vmem:[#allocation2 + $0x58] sm:$0xff] }
 0x536   : > { %v3744_v43 = vmul.f32 %v5751_v45, %v7507_v34  ;;  %v3746_v26 = vmul.f32 %v5752_v37, %v7507_v34  ;;  %v7532_v4 = vadd.f32 %v7487_v19, %v3759_v54  ;;  %v7543_v11 = vadd.f32 %v7501_v63, %v3766_v51  ;;  %v5760_v45 = vld [vmem:[#allocation2 + $0xb8] sm:$0x1f] }
 0x537   : > { %4228 = vmatprep.mubr.bf16.mxu0 %v3910_v20  ;;  %4285 = vmatprep.mubr.bf16.mxu1 %v3912_v28  ;;  %v5754_v20 = vld [vmem:[#allocation2 + $0x50] sm:$0xff] }
 0x538   : > { %4229 = vmatmul.mubr.bf16.vlgmr.msra.gmra.mrb[0].mxu0 %v3909_v38  ;;  %4286 = vmatmul.mubr.bf16.vlgmr.msra.gmra.mrb[0].mxu1 %v3911_v36  ;;  %v3745_v28 = vmul.f32 %v5754_v20, %v7507_v34  ;;  %v5756_v36 = vld [vmem:[#allocation2 + $0x78] sm:$0xff] }
 0x539   : > { %v7509_v60 = vpop.permute.xlu1 %3722  ;;  %4913 = vmatpush3.bf16.msra.mxu0 %v7262_v2  ;;  %4947 = vmatpush3.bf16.msra.mxu1 %v7267_v62  ;;  %v7518_v2 = vadd.f32 %v7487_v19, %v3760_v47  ;;  %v7521_v62 = vadd.f32 %v7487_v19, %v3762_v17  ;;  %v5757_v47 = vld [vmem:[#allocation2 + $0x60] sm:$0xff] }
 0x53a   : > { %4914 = vmatprep.subr.bf16.mxu0 %v7272_v12  ;;  %4948 = vmatprep.subr.bf16.mxu1 %v7277_v6  ;;  %v5749_v12 = vld [vmem:[#allocation2 + $0xe0] sm:$0xff]  ;;  %v3750_v30 = vmul.f32 %v5756_v36, %v7509_v60  ;;  %v3747_v56 = vmul.f32 %v5757_v47, %v7509_v60 }
 0x53b   : > { %v3763_v6 = vmul.f32 %v5749_v12, %v3713_v7  ;;  %v5753_v7 = vld [vmem:[#allocation2 + $0x40] sm:$0xff] }
 0x53d   : > { %v7525_v42 = vpop.permute.xlu1 %3795  ;;  %4915 = vmatpush3.bf16.msra.mxu0 %v7286_v23  ;;  %4949 = vmatpush3.bf16.msra.mxu1 %v7291_v44  ;;  %v7534_v14 = vpop.permute.xlu0 %3732  ;;  %v3743_v23 = vmul.f32 %v5753_v7, %v7507_v34  ;;  %v7540_v44 = vadd.f32 %v7501_v63, %v3764_v39  ;;  %v5758_v39 = vld [vmem:[#allocation2 + $0x70] sm:$0xff] }
 0x53e   : > { %4916 = vmatprep.subr.bf16.mxu0 %v7298_v13  ;;  %4950 = vmatprep.subr.bf16.mxu1 %v7303_v0  ;;  %v3822_v21 = vadd.f32 %v7525_v42, %v3744_v43  ;;  %v3824_v27 = vadd.f32 %v7525_v42, %v3746_v26  ;;  %v7549_v13 = vadd.f32 %v7501_v63, %v3763_v6  ;;  %v5755_v0 = vld [vmem:[#allocation2 + $0x68] sm:$0xff] }
 0x53f   : > { %v3748_v38 = vmul.f32 %v5755_v0, %v7509_v60  ;;  %v3821_v17 = vadd.f32 %v7525_v42, %v3743_v23  ;;  %v3749_v53 = vmul.f32 %v5758_v39, %v7509_v60  ;;  %v3823_v51 = vadd.f32 %v7525_v42, %v3745_v28  ;;  %v5762_v0 = vld [vmem:[#allocation2 + $0xb0] sm:$0x1f]  ;;  %v5763_v39 = vld [vmem:[#allocation2 + $0x88] sm:$0xff] }
 0x540   : > { %v3756_v54 = vmul.f32 %v5759_v8, %v7534_v14  ;;  %v3870_v6 = vmax.f32 %v3822_v21, 0.0  ;;  %v3758_v43 = vmul.f32 %v5760_v45, %v7534_v14  ;;  %v5764_v8 = vld [vmem:[#allocation2 + $0x80] sm:$0xff] }
 0x541   : > { %v7555_v32 = vpop.permute.xlu1 %3800  ;;  %4917 = vmatpush3.bf16.msra.mxu0 %v7310_v3  ;;  %4951 = vmatpush3.bf16.msra.mxu1 %v7315_v24  ;;  %v3872_v24 = vmax.f32 %v3824_v27, 0.0  ;;  %v7569_v37 = vpop.permute.xlu0 %3810  ;;  %v3871_v20 = vmax.f32 %v3823_v51, 0.0  ;;  %v5761_v27 = vld [vmem:[#allocation2 + $0xa0] sm:$0x1f] }
 0x542   : > { %4918 = vmatprep.subr.bf16.mxu0 %v7322_v40  ;;  %4952 = vmatprep.subr.bf16.mxu1 %v7327_v18  ;;  %v3826_v31 = vadd.f32 %v7555_v32, %v3748_v38  ;;  %v3828_v12 = vadd.f32 %v7555_v32, %v3750_v30  ;;  %v3825_v3 = vadd.f32 %v7555_v32, %v3747_v56  ;;  %v3869_v40 = vmax.f32 %v3821_v17, 0.0 }
 0x543   : > { %v3827_v1 = vadd.f32 %v7555_v32, %v3749_v53  ;;  %v3755_v28 = vmul.f32 %v5761_v27, %v7534_v14  ;;  %v3757_v38 = vmul.f32 %v5762_v0, %v7534_v14  ;;  %v3888_v0 = vmax.f32 %v7521_v62, 0.0 }
 0x544   : > { %v3874_v26 = vmax.f32 %v3826_v31, 0.0  ;;  %v3876_v7 = vmax.f32 %v3828_v12, 0.0  ;;  %v3873_v23 = vmax.f32 %v3825_v3, 0.0  ;;  %v3843_v3 = vadd.f32 %v7501_v63, %v7523_v33 }
 0x545   : > { %v7571_v18 = vpop.permute.xlu1 %3727  ;;  %4919 = vmatpush3.bf16.msra.mxu0 %v7342_v48  ;;  %4953 = vmatpush3.bf16.msra.mxu1 %v7347_v15  ;;  %v3875_v21 = vmax.f32 %v3827_v1, 0.0  ;;  %v3834_v48 = vadd.f32 %v7569_v37, %v3756_v54  ;;  %v3836_v15 = vadd.f32 %v7569_v37, %v3758_v43  ;;  %v3833_v17 = vadd.f32 %v7569_v37, %v3755_v28 }
 0x546   : > { %v3914_v36 = vpack.c.bf16 %v3874_v26, %v3870_v6  ;;  %v3916_v30 = vpack.c.bf16 %v3876_v7, %v3872_v24  ;;  %v3913_v47 = vpack.c.bf16 %v3873_v23, %v3869_v40  ;;  %4920 = vmatprep.subr.bf16.mxu0 %v7352_v16  ;;  %4954 = vmatprep.subr.bf16.mxu1 %v7357_v22  ;;  %v5765_v22 = vld [vmem:[#allocation2 + $0x90] sm:$0xff]  ;;  %v3890_v63 = vmax.f32 %v7540_v44, 0.0 }
 0x547   : > { %v3915_v56 = vpack.c.bf16 %v3875_v21, %v3871_v20  ;;  %v3752_v53 = vmul.f32 %v5763_v39, %v7571_v18  ;;  %v3754_v51 = vmul.f32 %v7571_v18, %v7126_v9  ;;  %v3751_v16 = vmul.f32 %v5764_v8, %v7571_v18  ;;  %v5766_v20 = vld [vmem:[#allocation2 + $0x128] sm:$0xff] }
 0x548   : > { %4236 = vmatprep.mubr.bf16.mxu0 %v3914_v36  ;;  %4293 = vmatprep.mubr.bf16.mxu1 %v3916_v30  ;;  %v3753_v54 = vmul.f32 %v5765_v22, %v7571_v18  ;;  %v3835_v12 = vadd.f32 %v7569_v37, %v3757_v38  ;;  %v3882_v1 = vmax.f32 %v3834_v48, 0.0  ;;  %v3884_v45 = vmax.f32 %v3836_v15, 0.0  ;;  %v5767_v38 = vld [vmem:[#allocation2 + $0x138] sm:$0xff]  ;;  %v5768_v30 = vld [vmem:[#allocation2 + $0x108] sm:$0xff]  ;;  %v5772_v22 = vld [vmem:[#allocation2 + $0x130] sm:$0xff] }
 0x549   : > { %v7586_v31 = vpop.permute.xlu1 %3805  ;;  %4237 = vmatmul.mubr.bf16.gmra.mrb[4].mxu0 %v3913_v47  ;;  %4294 = vmatmul.mubr.bf16.gmra.mrb[4].mxu1 %v3915_v56  ;;  %v3892_v23 = vmax.f32 %v7543_v11, 0.0  ;;  %v3772_v21 = vmul.f32 %v5766_v20, %v7509_v60  ;;  %v3886_v44 = vmax.f32 %v7518_v2, 0.0  ;;  %v3839_v11 = vadd.f32 %v7487_v19, %v7515_v59  ;;  %v5769_v47 = vld [vmem:[#allocation2 + $0x118] sm:$0xff] }
 0x54a   : > { %4921 = vmatpush3.bf16.msra.mxu0 %v7371_v61  ;;  %4955 = vmatpush3.bf16.msra.mxu1 %v7376_v57  ;;  %v3830_v9 = vadd.f32 %v7586_v31, %v3752_v53  ;;  %v3832_v6 = vadd.f32 %v7586_v31, %v3754_v51  ;;  %v3829_v24 = vadd.f32 %v7586_v31, %v3751_v16  ;;  %v3881_v57 = vmax.f32 %v3833_v17, 0.0  ;;  %v5771_v16 = vld [vmem:[#allocation2 + $0x100] sm:$0xff] }
 0x54b   : > { %4922 = vmatprep.subr.bf16.mxu0 %v7381_v49  ;;  %4956 = vmatprep.subr.bf16.mxu1 %v7386_v58  ;;  %v3831_v43 = vadd.f32 %v7586_v31, %v3753_v54  ;;  %v3883_v40 = vmax.f32 %v3835_v12, 0.0  ;;  %v3889_v36 = vmax.f32 %v7549_v13, 0.0  ;;  %v3768_v2 = vmul.f32 %v5768_v30, %v7507_v34  ;;  %v5773_v12 = vld [vmem:[#allocation2 + $0x148] sm:$0xff] }
 0x54c   : > { %v3878_v33 = vmax.f32 %v3830_v9, 0.0  ;;  %v3880_v61 = vmax.f32 %v3832_v6, 0.0  ;;  %v3877_v26 = vmax.f32 %v3829_v24, 0.0  ;;  %v3891_v62 = vmax.f32 %v3843_v3, 0.0  ;;  %v5774_v9 = vld [vmem:[#allocation2 + $0x110] sm:$0xff]  ;;  %v5775_v24 = vld [vmem:[#allocation2 + $0x158] sm:$0xff] }
 0x54d   : > { %v3879_v7 = vmax.f32 %v3831_v43, 0.0  ;;  %v3770_v19 = vmul.f32 %v5769_v47, %v7507_v34  ;;  %v3846_v56 = vadd.f32 %v7525_v42, %v3768_v2  ;;  %v3885_v13 = vmax.f32 %v7532_v4, 0.0  ;;  %v5776_v43 = vld [vmem:[#allocation2 + $0x168] sm:$0x1f] }
 0x54e   : > { %4923 = vmatpush3.bf16.msra.mxu0 %v7400_v41  ;;  %4957 = vmatpush3.bf16.msra.mxu1 %v7405_v5  ;;  %v3918_v49 = vpack.c.bf16 %v3882_v1, %v3878_v33  ;;  %v3920_v58 = vpack.c.bf16 %v3884_v45, %v3880_v61  ;;  %v3917_v27 = vpack.c.bf16 %v3881_v57, %v3877_v26  ;;  %v3887_v48 = vmax.f32 %v3839_v11, 0.0  ;;  %v5777_v61 = vld [vmem:[#allocation2 + $0x178] sm:$0x1f] }
 0x54f   : > { %v3919_v28 = vpack.c.bf16 %v3883_v40, %v3879_v7  ;;  %4924 = vmatprep.subr.bf16.mxu0 %v7410_v55  ;;  %4958 = vmatprep.subr.bf16.mxu1 %v7415_v10  ;;  %v3774_v41 = vmul.f32 %v5767_v38, %v7509_v60  ;;  %v3922_v5 = vpack.c.bf16 %v3890_v63, %v3886_v44 }
 0x550   : > { %4244 = vmatprep.mubr.bf16.mxu0 %v3918_v49  ;;  %4301 = vmatprep.mubr.bf16.mxu1 %v3920_v58  ;;  %v3850_v55 = vadd.f32 %v7555_v32, %v3772_v21  ;;  %v3924_v10 = vpack.c.bf16 %v3892_v23, %v3888_v0  ;;  %v3848_v15 = vadd.f32 %v7525_v42, %v3770_v19  ;;  %v5778_v58 = vld [vmem:[#allocation2 + $0x140] sm:$0xff]  ;;  %v5779_v0 = vld [vmem:[#allocation2 + $0x150] sm:$0xff] }
 0x551   : > { %4245 = vmatmul.mubr.bf16.gmra.mrb[8].mxu0 %v3917_v27  ;;  %4302 = vmatmul.mubr.bf16.gmra.mrb[8].mxu1 %v3919_v28  ;;  %v3852_v59 = vadd.f32 %v7555_v32, %v3774_v41  ;;  %v3921_v39 = vpack.c.bf16 %v3889_v36, %v3885_v13  ;;  %v3923_v53 = vpack.c.bf16 %v3891_v62, %v3887_v48  ;;  %v5780_v41 = vld [vmem:[#allocation2 + $0x160] sm:$0x1f] }
 0x552   : > { %4925 = vmatpush3.bf16.msra.mxu0 %v7424_v50  ;;  %4348 = vmatprep.mubr.bf16.mxu0 %v3922_v5  ;;  %v3898_v17 = vmax.f32 %v3850_v55, 0.0  ;;  %v5770_v50 = vld [vmem:[#allocation2 + $0x120] sm:$0xff]  ;;  %v3767_v4 = vmul.f32 %v5771_v16, %v7507_v34  ;;  %v3773_v54 = vmul.f32 %v5772_v22, %v7509_v60  ;;  %v3769_v6 = vmul.f32 %v5774_v9, %v7507_v34  ;;  %v5781_v55 = vld [vmem:[#allocation2 + $0x170] sm:$0x1f] }
 0x553   : > { %4959 = vmatpush3.bf16.msra.mxu1 %v7429_v46  ;;  %4405 = vmatprep.mubr.bf16.mxu1 %v3924_v10  ;;  %v3900_v51 = vmax.f32 %v3852_v59, 0.0  ;;  %v3771_v8 = vmul.f32 %v5770_v50, %v7509_v60  ;;  %v3894_v46 = vmax.f32 %v3846_v56, 0.0  ;;  %v3780_v60 = vmul.f32 %v5776_v43, %v7534_v14 }
 0x554   : > { %4926 = vmatprep.subr.bf16.mxu0 %v7434_v25  ;;  %4960 = vmatprep.subr.bf16.mxu1 %v7442_v29  ;;  %v3776_v25 = vmul.f32 %v5773_v12, %v7571_v18  ;;  %v3896_v29 = vmax.f32 %v3848_v15, 0.0  ;;  %v3851_v45 = vadd.f32 %v7555_v32, %v3773_v54  ;;  %v3782_v26 = vmul.f32 %v5777_v61, %v7534_v14 }
 0x555   : > { %v3849_v3 = vadd.f32 %v7555_v32, %v3771_v8  ;;  %v3926_v1 = vpack.c.bf16 %v3898_v17, %v3894_v46  ;;  %v3847_v57 = vadd.f32 %v7525_v42, %v3769_v6  ;;  %v3858_v32 = vadd.f32 %v7569_v37, %v3780_v60 }
 0x556   : > { %4927 = vmatpush3.bf16.msra.mxu0 %v7454_v35  ;;  %v3778_v35 = vmul.f32 %v5775_v24, %v7571_v18  ;;  %v3854_v63 = vadd.f32 %v7586_v31, %v3776_v25  ;;  %v3928_v33 = vpack.c.bf16 %v3900_v51, %v3896_v29  ;;  %v3860_v40 = vadd.f32 %v7569_v37, %v3782_v26 }
 0x557   : > { %4961 = vmatpush3.bf16.msra.mxu1 %v7459_v52  ;;  %v3845_v52 = vadd.f32 %v7525_v42, %v3767_v4  ;;  %v3897_v7 = vmax.f32 %v3849_v3, 0.0  ;;  %v3899_v23 = vmax.f32 %v3851_v45, 0.0  ;;  %v3775_v27 = vmul.f32 %v5778_v58, %v7571_v18 }
 0x558   : > { %v3856_v34 = vadd.f32 %v7586_v31, %v3778_v35  ;;  %v3902_v20 = vmax.f32 %v3854_v63, 0.0  ;;  %v3895_v44 = vmax.f32 %v3847_v57, 0.0  ;;  %v3906_v28 = vmax.f32 %v3858_v32, 0.0 }
 0x559   : > { %4349 = vmatmul.mubr.bf16.vlgmr.msra.gmra.mrb[12].mxu0 %v3921_v39  ;;  %v3893_v21 = vmax.f32 %v3845_v52, 0.0  ;;  %v3777_v11 = vmul.f32 %v5779_v0, %v7571_v18  ;;  %v3908_v42 = vmax.f32 %v3860_v40, 0.0  ;;  %v3779_v5 = vmul.f32 %v5780_v41, %v7534_v14 }
 0x55a   : > { %4406 = vmatmul.mubr.bf16.vlgmr.msra.gmra.mrb[12].mxu1 %v3923_v53  ;;  %4356 = vmatprep.mubr.bf16.mxu0 %v3926_v1  ;;  %v3904_v49 = vmax.f32 %v3856_v34, 0.0  ;;  %v3853_v36 = vadd.f32 %v7586_v31, %v3775_v27  ;;  %v3927_v30 = vpack.c.bf16 %v3899_v23, %v3895_v44  ;;  %v3930_v2 = vpack.c.bf16 %v3906_v28, %v3902_v20 }
 0x55b   : > { %4413 = vmatprep.mubr.bf16.mxu1 %v3928_v33  ;;  %v3925_v38 = vpack.c.bf16 %v3897_v7, %v3893_v21  ;;  %v3781_v10 = vmul.f32 %v5781_v55, %v7534_v14  ;;  %v3855_v62 = vadd.f32 %v7586_v31, %v3777_v11  ;;  %v3857_v19 = vadd.f32 %v7569_v37, %v3779_v5  ;;  %v7653_v31 = vld [vmem:[%s7715_s2 + $0x4] ss:$0 sm:$0xff] }
 0x55c   : > { %v3932_v47 = vpack.c.bf16 %v3908_v42, %v3904_v49  ;;  %v3901_v59 = vmax.f32 %v3853_v36, 0.0 }
 0x55d   : > { %v3859_v18 = vadd.f32 %v7569_v37, %v3781_v10  ;;  %v3903_v56 = vmax.f32 %v3855_v62, 0.0  ;;  %v3905_v13 = vmax.f32 %v3857_v19, 0.0 }
 0x55f   : > { %v3907_v48 = vmax.f32 %v3859_v18, 0.0  ;;  %v3929_v15 = vpack.c.bf16 %v3905_v13, %v3901_v59 }
 0x561   : > { %4357 = vmatmul.mubr.bf16.gmra.mrb[16].mxu0 %v3925_v38  ;;  %v3931_v17 = vpack.c.bf16 %v3907_v48, %v3903_v56 }
 0x562   : > { %4414 = vmatmul.mubr.bf16.gmra.mrb[16].mxu1 %v3927_v30  ;;  %4364 = vmatprep.mubr.bf16.mxu0 %v3930_v2 }
 0x563   : > { %4421 = vmatprep.mubr.bf16.mxu1 %v3932_v47 }
 0x569   : > { %4365 = vmatmul.mubr.bf16.gmra.mrb[20].mxu0 %v3929_v15 }
 0x56a   : > { %4422 = vmatmul.mubr.bf16.gmra.mrb[20].mxu1 %v3931_v17 }
 0x60b   : > { %v4860_v14 = vpop.f32.mrb[0].mxu0  ;;  %v4894_v39 = vpop.f32.mrb[0].mxu1 }
 0x60c   : > { %v4861_v53 = vpop.f32.mrb[1].mxu0  ;;  %v4895_v51 = vpop.f32.mrb[1].mxu1 }
 0x60d   : > { %v4862_v50 = vadd.f32 %v4861_v53, %v4860_v14  ;;  %v4896_v37 = vadd.f32 %v4895_v51, %v4894_v39  ;;  %v4863_v8 = vpop.f32.mrb[2].mxu0  ;;  %v4897_v46 = vpop.f32.mrb[2].mxu1 }
 0x60e   : > { %v4864_v16 = vpop.f32.mrb[3].mxu0  ;;  %v4898_v4 = vpop.f32.mrb[3].mxu1 }
 0x60f   : > { %v4231_v22 = vadd.f32 %v4862_v50, %v7653_v31  ;;  %v4865_v54 = vadd.f32 %v4864_v16, %v4863_v8  ;;  %v4899_v12 = vadd.f32 %v4898_v4, %v4897_v46 }
 0x611   : > { %v4288_v25 = vadd.f32 %v4896_v37, %v4231_v22  ;;  %v4234_v29 = vadd.f32 %v4865_v54, %v7653_v31 }
 0x613   : > { %4310 = vst [vmem:[%s7718_s5] sm:$0xff] %v4288_v25  ;;  %v4291_v3 = vadd.f32 %v4899_v12, %v4234_v29 }
 0x615   : > { %4311 = vst [vmem:[%s7718_s5 + $0x8] sm:$0xff] %v4291_v3 }
 0x61c   : > { %v4866_v9 = vpop.f32.mrb[4].mxu0  ;;  %v4900_v6 = vpop.f32.mrb[4].mxu1 }
 0x61d   : > { %v4867_v24 = vpop.f32.mrb[5].mxu0  ;;  %v4901_v35 = vpop.f32.mrb[5].mxu1 }
 0x61e   : > { %v4868_v1 = vadd.f32 %v4867_v24, %v4866_v9  ;;  %v4902_v45 = vadd.f32 %v4901_v35, %v4900_v6  ;;  %v4869_v43 = vpop.f32.mrb[6].mxu0  ;;  %v4903_v60 = vpop.f32.mrb[6].mxu1 }
 0x61f   : > { %v4870_v63 = vpop.f32.mrb[7].mxu0  ;;  %v4904_v33 = vpop.f32.mrb[7].mxu1 }
 0x620   : > { %v4239_v52 = vadd.f32 %v4868_v1, %v7653_v31  ;;  %v4871_v61 = vadd.f32 %v4870_v63, %v4869_v43  ;;  %v4905_v26 = vadd.f32 %v4904_v33, %v4903_v60 }
 0x622   : > { %v4296_v34 = vadd.f32 %v4902_v45, %v4239_v52  ;;  %v4242_v57 = vadd.f32 %v4871_v61, %v7653_v31 }
 0x624   : > { %4312 = vst [vmem:[%s7718_s5 + $0x10] sm:$0xff] %v4296_v34  ;;  %v4299_v32 = vadd.f32 %v4905_v26, %v4242_v57  ;;  %v4872_v7 = vpop.f32.mrb[8].mxu0  ;;  %v4906_v40 = vpop.f32.mrb[8].mxu1 }
 0x625   : > { %v4873_v23 = vpop.f32.mrb[9].mxu0  ;;  %v4907_v20 = vpop.f32.mrb[9].mxu1 }
 0x626   : > { %4313 = vst [vmem:[%s7718_s5 + $0x18] sm:$0xff] %v4299_v32  ;;  %v4874_v21 = vadd.f32 %v4873_v23, %v4872_v7  ;;  %v4908_v49 = vadd.f32 %v4907_v20, %v4906_v40  ;;  %v4875_v58 = vpop.f32.mrb[10].mxu0  ;;  %v4909_v27 = vpop.f32.mrb[10].mxu1 }
 0x627   : > { %v4876_v44 = vpop.f32.mrb[11].mxu0  ;;  %v4910_v28 = vpop.f32.mrb[11].mxu1 }
 0x628   : > { %v4247_v0 = vadd.f32 %v4874_v21, %v7653_v31  ;;  %v4877_v11 = vadd.f32 %v4876_v44, %v4875_v58  ;;  %v4911_v38 = vadd.f32 %v4910_v28, %v4909_v27 }
 0x62a   : > { %v4304_v42 = vadd.f32 %v4908_v49, %v4247_v0  ;;  %v4250_v41 = vadd.f32 %v4877_v11, %v7653_v31 }
 0x62c   : > { %4314 = vst [vmem:[%s7718_s5 + $0x20] sm:$0xff] %v4304_v42  ;;  %v4307_v5 = vadd.f32 %v4911_v38, %v4250_v41  ;;  %v4928_v36 = vpop.f32.mrb[12].mxu0 }
 0x62d   : > { %v4962_v30 = vpop.f32.mrb[12].mxu1  ;;  %v4929_v2 = vpop.f32.mrb[13].mxu0 }
 0x62e   : > { %4315 = vst [vmem:[%s7718_s5 + $0x28] sm:$0x1f] %v4307_v5  ;;  %v4930_v55 = vadd.f32 %v4929_v2, %v4928_v36  ;;  %v4963_v10 = vpop.f32.mrb[13].mxu1  ;;  %v4931_v62 = vpop.f32.mrb[14].mxu0 }
 0x62f   : > { %v4964_v47 = vadd.f32 %v4963_v10, %v4962_v30  ;;  %v4965_v19 = vpop.f32.mrb[14].mxu1  ;;  %v4932_v18 = vpop.f32.mrb[15].mxu0 }
 0x630   : > { %v4351_v59 = vadd.f32 %v4930_v55, %v7653_v31  ;;  %v4933_v56 = vadd.f32 %v4932_v18, %v4931_v62  ;;  %v4966_v13 = vpop.f32.mrb[15].mxu1 }
 0x631   : > { %v4967_v48 = vadd.f32 %v4966_v13, %v4965_v19 }
 0x632   : > { %v4408_v15 = vadd.f32 %v4964_v47, %v4351_v59  ;;  %v4354_v17 = vadd.f32 %v4933_v56, %v7653_v31 }
 0x634   : > { %4835 = vst [vmem:[%s7718_s5 + $0x30] sm:$0xff] %v4408_v15  ;;  %v4411_v14 = vadd.f32 %v4967_v48, %v4354_v17  ;;  %v4934_v39 = vpop.f32.mrb[16].mxu0 }
 0x635   : > { %v4968_v53 = vpop.f32.mrb[16].mxu1  ;;  %v4935_v51 = vpop.f32.mrb[17].mxu0 }
 0x636   : > { %4836 = vst [vmem:[%s7718_s5 + $0x38] sm:$0xff] %v4411_v14  ;;  %v4936_v50 = vadd.f32 %v4935_v51, %v4934_v39  ;;  %v4969_v37 = vpop.f32.mrb[17].mxu1  ;;  %v4937_v8 = vpop.f32.mrb[18].mxu0 }
 0x637   : > { %v4970_v46 = vadd.f32 %v4969_v37, %v4968_v53  ;;  %v4971_v16 = vpop.f32.mrb[18].mxu1  ;;  %v4938_v4 = vpop.f32.mrb[19].mxu0 }
 0x638   : > { %v4359_v22 = vadd.f32 %v4936_v50, %v7653_v31  ;;  %v4939_v54 = vadd.f32 %v4938_v4, %v4937_v8  ;;  %v4972_v12 = vpop.f32.mrb[19].mxu1 }
 0x639   : > { %v4973_v25 = vadd.f32 %v4972_v12, %v4971_v16 }
 0x63a   : > { %v4416_v29 = vadd.f32 %v4970_v46, %v4359_v22  ;;  %v4362_v3 = vadd.f32 %v4939_v54, %v7653_v31 }
 0x63c   : > { %4837 = vst [vmem:[%s7718_s5 + $0x40] sm:$0xff] %v4416_v29  ;;  %v4419_v9 = vadd.f32 %v4973_v25, %v4362_v3  ;;  %v4940_v6 = vpop.f32.mrb[20].mxu0 }
 0x63d   : > { %v4974_v24 = vpop.f32.mrb[20].mxu1  ;;  %v4941_v35 = vpop.f32.mrb[21].mxu0 }
 0x63e   : > { %4838 = vst [vmem:[%s7718_s5 + $0x48] sm:$0xff] %v4419_v9  ;;  %v4942_v1 = vadd.f32 %v4941_v35, %v4940_v6  ;;  %v4975_v45 = vpop.f32.mrb[21].mxu1  ;;  %v4943_v43 = vpop.f32.mrb[22].mxu0 }
 0x63f   : > { %v4976_v60 = vadd.f32 %v4975_v45, %v4974_v24  ;;  %v4977_v63 = vpop.f32.mrb[22].mxu1  ;;  %v4944_v33 = vpop.f32.mrb[23].mxu0 }
 0x640   : > { %v4367_v52 = vadd.f32 %v4942_v1, %v7653_v31  ;;  %v4945_v61 = vadd.f32 %v4944_v33, %v4943_v43  ;;  %v4978_v26 = vpop.f32.mrb[23].mxu1 }
 0x641   : > { %v4979_v34 = vadd.f32 %v4978_v26, %v4977_v63 }
 0x642   : > { %v4424_v57 = vadd.f32 %v4976_v60, %v4367_v52  ;;  %v4370_v32 = vadd.f32 %v4945_v61, %v7653_v31 }
 0x644   : > { %4839 = vst [vmem:[%s7718_s5 + $0x50] sm:$0xff] %v4424_v57  ;;  %v4427_v7 = vadd.f32 %v4979_v34, %v4370_v32 }
 0x646   : > { %4840 = vst [vmem:[%s7718_s5 + $0x58] sm:$0x1f] %v4427_v7 }
 0x647 PF: > { %p12_p11 = scmp.ge.s32.totalorder %s5856_s22, 5   ;;  %s7878_s18 = smov %s5800_s19 }
 0x648   : > { %s7879_s19 = smov %s5865_s25  ;;  %s7880_s20 = smov %s5856_s22 }
 0x649   :  { %14 = sbr.rel (!%p12_p11) target bundleno = 2 (0x2), region = 109 }

</bundles_post_ra>
